<compile_context>
chip_gen: v7x
topology: tpu7x:2x2x1
jax: 0.10.0
libtpu: 0.0.40
codegen_flags: <defaults>
</compile_context>

<pallas_src>
import math

import jax
import jax.numpy as jnp
from jax import lax
from jax.experimental import pallas as pl
from jax.experimental.pallas import tpu as pltpu

HIDDEN = 256  # fixed by the PyTorch module (nn.Linear(..., 256))


def _round_up(x, m):
    return ((x + m - 1) // m) * m


def _double_q_kernel(state_ref, action_ref,
                     w1_ref, b1_ref,
                     w2_1_ref, b2_1_ref, w3_1_ref, b3_1_ref,
                     w2_2_ref, b2_2_ref, w3_2_ref, b3_2_ref,
                     out_ref):
    """One batch tile of min(Q1(x), Q2(x)).

    Activations are feature-major (features x TB): the batch lives in the
    LANE dimension, so intermediates and the final store are lane-dense.
    """
    wdt = w1_ref.dtype

    # torch.cat([state, action], -1) fused in-kernel (tiny lane concat of the
    # batch-major tile) -> (TB, K) with K = state_dim + action_dim.
    x = jnp.concatenate([state_ref[...], action_ref[...]], axis=1).astype(wdt)

    # Layer 1 of BOTH heads as one K-chunk: contract (2H, K) with (TB, K) on K
    # -> (2H, TB).  The batch-major x tile feeds the MXU directly (no wrapper
    # transpose; Mosaic handles the tiny rhs-transposed contraction).
    h1 = lax.dot_general(w1_ref[...], x,
                         dimension_numbers=(((1,), (1,)), ((), ())),
                         preferred_element_type=jnp.float32)
    h1 = jnp.maximum(h1 + b1_ref[...], 0.0)                     # (2H, TB)

    def q_head(h, w2_ref, b2_ref, w3_ref, b3_ref):
        h2 = jnp.dot(w2_ref[...], h.astype(wdt),
                     preferred_element_type=jnp.float32)
        h2 = jnp.maximum(h2 + b2_ref[...], 0.0)                  # (H, TB)
        # Layer 3 has out_features == 1: keep it off the MXU.  VPU multiply by
        # the broadcast weight column + sublane reduction, then scalar bias.
        q = jnp.sum(h2 * w3_ref[...], axis=0, keepdims=True)     # (1, TB)
        return q + b3_ref[...]

    # 256-row head slices are sublane-aligned -> free.
    q1 = q_head(h1[:HIDDEN, :], w2_1_ref, b2_1_ref, w3_1_ref, b3_1_ref)
    q2 = q_head(h1[HIDDEN:, :], w2_2_ref, b2_2_ref, w3_2_ref, b3_2_ref)
    out_ref[...] = jnp.minimum(q1, q2)                           # lane-dense (1, TB)


def double_q_forward(state, action, params, *, batch_tile=2048):
    """Pallas implementation of DoubleQNetwork.forward(state, action) -> (B, 1)."""
    B, sd = state.shape
    Ba, ad = action.shape
    assert Ba == B
    state = state.astype(jnp.float32)
    action = action.astype(jnp.float32)

    # Batch tile (lane dim), multiple of 128.  For B > 128 aim for >= 2 grid
    # steps (v7x has 2 TensorCores), capped at batch_tile.  Ragged last tiles
    # are handled by Pallas partial-block masking -> no jnp.pad for large B.
    if B <= 128:
        tb = 128
    else:
        tb = min(batch_tile, _round_up((B + 1) // 2, 128))
    bp = max(B, tb)
    if bp != B:  # only tiny batches (< 128 rows) get padded; cost is negligible
        state = jnp.pad(state, ((0, bp - B), (0, 0)))
        action = jnp.pad(action, ((0, bp - B), (0, 0)))

    names = ("w1", "b1", "w2_1", "b2_1", "w3_1", "b3_1",
             "w2_2", "b2_2", "w3_2", "b3_2")
    weights = [params[n] for n in names]

    grid = (pl.cdiv(bp, tb),)
    in_specs = (
        [pl.BlockSpec((tb, sd), lambda i: (i, 0)),   # batch-major input tiles
         pl.BlockSpec((tb, ad), lambda i: (i, 0))]
        # Constant index_maps -> weights/biases stay VMEM-resident across grid.
        + [pl.BlockSpec(tuple(w.shape), lambda i: (0, 0)) for w in weights]
    )

    out = pl.pallas_call(
        _double_q_kernel,
        out_shape=jax.ShapeDtypeStruct((1, bp), jnp.float32),
        grid=grid,
        in_specs=in_specs,
        out_specs=pl.BlockSpec((1, tb), lambda i: (0, i)),
        compiler_params=pltpu.CompilerParams(
            dimension_semantics=("parallel",),
            vmem_limit_bytes=64 * 1024 * 1024),
    )(state, action, *weights)

    # Garbage Q values in padded / masked lanes are dropped here.
    return out[0, :B][:, None]   # (B, 1) == torch.min(qf1(x), qf2(x))


def init_params(key, state_dim, action_dim, init_w=None, dtype=jnp.float32):
    """Mirrors the PyTorch module: nn.Linear default init U(+-1/sqrt(fan_in));
    the two 256->1 heads use U(+-init_w) when given (weights_init).

    Both heads' layer-1 weights are packed into one (2*HIDDEN, in_dim) matrix
    so layer 1 runs as a single MXU matmul.  Matmul weights may be bf16
    (dtype=...); biases and the width-1 head weights stay f32.
    """
    in_dim = state_dim + action_dim

    def linear(key, fan_in, fan_out, bound=None):
        kw, kb = jax.random.split(key)
        if bound is None:
            bound = 1.0 / math.sqrt(fan_in)
        w = jax.random.uniform(kw, (fan_out, fan_in), jnp.float32, -bound, bound)
        b = jax.random.uniform(kb, (fan_out,), jnp.float32, -bound, bound)
        return w, b

    ks = jax.random.split(key, 6)
    w1_1, b1_1 = linear(ks[0], in_dim, HIDDEN)
    w2_1, b2_1 = linear(ks[1], HIDDEN, HIDDEN)
    w3_1, b3_1 = linear(ks[2], HIDDEN, 1, bound=init_w)
    w1_2, b1_2 = linear(ks[3], in_dim, HIDDEN)
    w2_2, b2_2 = linear(ks[4], HIDDEN, HIDDEN)
    w3_2, b3_2 = linear(ks[5], HIDDEN, 1, bound=init_w)

    return dict(
        w1=jnp.concatenate([w1_1, w1_2], 0).astype(dtype),   # (2H, in_dim)
        b1=jnp.concatenate([b1_1, b1_2], 0)[:, None],        # (2H, 1)
        w2_1=w2_1.astype(dtype), b2_1=b2_1[:, None],         # (H, H), (H, 1)
        w3_1=w3_1.T, b3_1=b3_1[None, :],                     # (H, 1), (1, 1)
        w2_2=w2_2.astype(dtype), b2_2=b2_2[:, None],
        w3_2=w3_2.T, b3_2=b3_2[None, :],
    )


def _reference_forward(state, action, params):
    """Pure-JAX reference (batch-major, highest matmul precision)."""
    with jax.default_matmul_precision("highest"):
        x = jnp.concatenate([state, action], axis=-1).astype(jnp.float32)
        w1 = params["w1"].astype(jnp.float32)
        h1 = jnp.maximum(x @ w1.T + params["b1"][:, 0], 0.0)     # (B, 2H)

        def head(h, w2, b2, w3, b3):
            h2 = jnp.maximum(h @ w2.astype(jnp.float32).T + b2[:, 0], 0.0)
            return h2 @ w3 + b3                                   # (B, 1)

        q1 = head(h1[:, :HIDDEN], params["w2_1"], params["b2_1"],
                  params["w3_1"], params["b3_1"])
        q2 = head(h1[:, HIDDEN:], params["w2_2"], params["b2_2"],
                  params["w3_2"], params["b3_2"])
        return jnp.minimum(q1, q2)


if __name__ == "__main__":
    key = jax.random.PRNGKey(0)
    k_inp, k_par = jax.random.split(key)

    state_dim, action_dim = 17, 6
    params = init_params(k_par, state_dim, action_dim, init_w=0.003)

    # batch=2: tiny-batch path (single padded 128-lane tile);
    # batch=300: 2-step grid with a ragged (masked) last tile.
    for batch in (2, 300):
        ks, ka = jax.random.split(jax.random.fold_in(k_inp, batch))
        state = jax.random.normal(ks, (batch, state_dim), jnp.float32)
        action = jax.random.normal(ka, (batch, action_dim), jnp.float32)

        out = jax.block_until_ready(double_q_forward(state, action, params))
        ref = _reference_forward(state, action, params)
        assert out.shape == (batch, 1)
        err = float(jnp.max(jnp.abs(out - ref)))
        assert jnp.allclose(out, ref, atol=2e-4, rtol=2e-4), err

    print("KERNEL_OK")
</pallas_src>

<mosaic_0001>
module attributes {stable_mosaic.version = 11 : i64} {
  func.func @_double_q_kernel(%arg0: i32, %arg1: memref<128x17xf32, #tpu.memory_space<vmem>>, %arg2: memref<128x6xf32, #tpu.memory_space<vmem>>, %arg3: memref<512x23xf32, #tpu.memory_space<vmem>>, %arg4: memref<512x1xf32, #tpu.memory_space<vmem>>, %arg5: memref<256x256xf32, #tpu.memory_space<vmem>>, %arg6: memref<256x1xf32, #tpu.memory_space<vmem>>, %arg7: memref<256x1xf32, #tpu.memory_space<vmem>>, %arg8: memref<1x1xf32, #tpu.memory_space<vmem>>, %arg9: memref<256x256xf32, #tpu.memory_space<vmem>>, %arg10: memref<256x1xf32, #tpu.memory_space<vmem>>, %arg11: memref<256x1xf32, #tpu.memory_space<vmem>>, %arg12: memref<1x1xf32, #tpu.memory_space<vmem>>, %arg13: memref<1x128xf32, #tpu.memory_space<vmem>>) attributes {dimension_semantics = [#tpu.dimension_semantics<parallel>], iteration_bounds = array<i64: 1>, scalar_prefetch = 0 : i64, scratch_operands = 0 : i64, tpu.core_type = #tpu.core_type<tc>, window_params = [{transform_indices = @transform_0, window_bounds = array<i64: 128, 17>}, {transform_indices = @transform_1, window_bounds = array<i64: 128, 6>}, {pipeline_mode = #tpu.pipeline_mode<synchronous>, transform_indices = @transform_2, window_bounds = array<i64: 512, 23>}, {pipeline_mode = #tpu.pipeline_mode<synchronous>, transform_indices = @transform_3, window_bounds = array<i64: 512, 1>}, {pipeline_mode = #tpu.pipeline_mode<synchronous>, transform_indices = @transform_4, window_bounds = array<i64: 256, 256>}, {pipeline_mode = #tpu.pipeline_mode<synchronous>, transform_indices = @transform_5, window_bounds = array<i64: 256, 1>}, {pipeline_mode = #tpu.pipeline_mode<synchronous>, transform_indices = @transform_6, window_bounds = array<i64: 256, 1>}, {pipeline_mode = #tpu.pipeline_mode<synchronous>, transform_indices = @transform_7, window_bounds = array<i64: 1, 1>}, {pipeline_mode = #tpu.pipeline_mode<synchronous>, transform_indices = @transform_8, window_bounds = array<i64: 256, 256>}, {pipeline_mode = #tpu.pipeline_mode<synchronous>, transform_indices = @transform_9, window_bounds = array<i64: 256, 1>}, {pipeline_mode = #tpu.pipeline_mode<synchronous>, transform_indices = @transform_10, window_bounds = array<i64: 256, 1>}, {pipeline_mode = #tpu.pipeline_mode<synchronous>, transform_indices = @transform_11, window_bounds = array<i64: 1, 1>}, {transform_indices = @transform_12, window_bounds = array<i64: 1, 128>}]} {
    %c0 = arith.constant 0 : index
    %c0_0 = arith.constant 0 : index
    %0 = vector.load %arg1[%c0, %c0_0] : memref<128x17xf32, #tpu.memory_space<vmem>>, vector<128x17xf32>
    %c0_1 = arith.constant 0 : index
    %c0_2 = arith.constant 0 : index
    %1 = vector.load %arg2[%c0_1, %c0_2] : memref<128x6xf32, #tpu.memory_space<vmem>>, vector<128x6xf32>
    %2 = tpu.concatenate %0, %1 in 1 : vector<128x17xf32>, vector<128x6xf32> -> vector<128x23xf32>
    %c0_3 = arith.constant 0 : index
    %c0_4 = arith.constant 0 : index
    %3 = vector.load %arg3[%c0_3, %c0_4] : memref<512x23xf32, #tpu.memory_space<vmem>>, vector<512x23xf32>
    %cst = arith.constant dense<0.000000e+00> : vector<512x128xf32>
    %4 = tpu.matmul %3, %2, %cst {dimension_numbers = #tpu.dot_dimension_numbers<[1], [1], [0], [0], [0, 0, 1, 0], [], []>} : vector<512x23xf32>, vector<128x23xf32>, vector<512x128xf32> -> vector<512x128xf32>
    %c0_5 = arith.constant 0 : index
    %c0_6 = arith.constant 0 : index
    %5 = vector.load %arg4[%c0_5, %c0_6] : memref<512x1xf32, #tpu.memory_space<vmem>>, vector<512x1xf32>
    %6 = vector.broadcast %5 : vector<512x1xf32> to vector<512x128xf32>
    %7 = arith.addf %4, %6 : vector<512x128xf32>
    %cst_7 = arith.constant 0.000000e+00 : f32
    %8 = vector.broadcast %cst_7 : f32 to vector<512x128xf32>
    %9 = arith.maximumf %7, %8 : vector<512x128xf32>
    %10 = vector.extract_strided_slice %9 {offsets = [0, 0], sizes = [256, 128], strides = [1, 1]} : vector<512x128xf32> to vector<256x128xf32>
    %c0_8 = arith.constant 0 : index
    %c0_9 = arith.constant 0 : index
    %11 = vector.load %arg5[%c0_8, %c0_9] : memref<256x256xf32, #tpu.memory_space<vmem>>, vector<256x256xf32>
    %cst_10 = arith.constant dense<0.000000e+00> : vector<256x128xf32>
    %12 = tpu.matmul %11, %10, %cst_10 {dimension_numbers = #tpu.dot_dimension_numbers<[1], [0], [0], [1], [0, 0, 1, 1], [], []>} : vector<256x256xf32>, vector<256x128xf32>, vector<256x128xf32> -> vector<256x128xf32>
    %c0_11 = arith.constant 0 : index
    %c0_12 = arith.constant 0 : index
    %13 = vector.load %arg6[%c0_11, %c0_12] : memref<256x1xf32, #tpu.memory_space<vmem>>, vector<256x1xf32>
    %14 = vector.broadcast %13 : vector<256x1xf32> to vector<256x128xf32>
    %15 = arith.addf %12, %14 : vector<256x128xf32>
    %cst_13 = arith.constant 0.000000e+00 : f32
    %16 = vector.broadcast %cst_13 : f32 to vector<256x128xf32>
    %17 = arith.maximumf %15, %16 : vector<256x128xf32>
    %c0_14 = arith.constant 0 : index
    %c0_15 = arith.constant 0 : index
    %18 = vector.load %arg7[%c0_14, %c0_15] : memref<256x1xf32, #tpu.memory_space<vmem>>, vector<256x1xf32>
    %19 = vector.broadcast %18 : vector<256x1xf32> to vector<256x128xf32>
    %20 = arith.mulf %17, %19 : vector<256x128xf32>
    %cst_16 = arith.constant dense<0.000000e+00> : vector<128xf32>
    %21 = vector.multi_reduction <add>, %20, %cst_16 [0] : vector<256x128xf32> to vector<128xf32>
    %22 = vector.shape_cast %21 : vector<128xf32> to vector<1x128xf32>
    %c0_17 = arith.constant 0 : index
    %c0_18 = arith.constant 0 : index
    %23 = vector.load %arg8[%c0_17, %c0_18] : memref<1x1xf32, #tpu.memory_space<vmem>>, vector<1x1xf32>
    %24 = vector.broadcast %23 : vector<1x1xf32> to vector<1x128xf32>
    %25 = arith.addf %22, %24 : vector<1x128xf32>
    %26 = vector.extract_strided_slice %9 {offsets = [256, 0], sizes = [256, 128], strides = [1, 1]} : vector<512x128xf32> to vector<256x128xf32>
    %c0_19 = arith.constant 0 : index
    %c0_20 = arith.constant 0 : index
    %27 = vector.load %arg9[%c0_19, %c0_20] : memref<256x256xf32, #tpu.memory_space<vmem>>, vector<256x256xf32>
    %cst_21 = arith.constant dense<0.000000e+00> : vector<256x128xf32>
    %28 = tpu.matmul %27, %26, %cst_21 {dimension_numbers = #tpu.dot_dimension_numbers<[1], [0], [0], [1], [0, 0, 1, 1], [], []>} : vector<256x256xf32>, vector<256x128xf32>, vector<256x128xf32> -> vector<256x128xf32>
    %c0_22 = arith.constant 0 : index
    %c0_23 = arith.constant 0 : index
    %29 = vector.load %arg10[%c0_22, %c0_23] : memref<256x1xf32, #tpu.memory_space<vmem>>, vector<256x1xf32>
    %30 = vector.broadcast %29 : vector<256x1xf32> to vector<256x128xf32>
    %31 = arith.addf %28, %30 : vector<256x128xf32>
    %cst_24 = arith.constant 0.000000e+00 : f32
    %32 = vector.broadcast %cst_24 : f32 to vector<256x128xf32>
    %33 = arith.maximumf %31, %32 : vector<256x128xf32>
    %c0_25 = arith.constant 0 : index
    %c0_26 = arith.constant 0 : index
    %34 = vector.load %arg11[%c0_25, %c0_26] : memref<256x1xf32, #tpu.memory_space<vmem>>, vector<256x1xf32>
    %35 = vector.broadcast %34 : vector<256x1xf32> to vector<256x128xf32>
    %36 = arith.mulf %33, %35 : vector<256x128xf32>
    %cst_27 = arith.constant dense<0.000000e+00> : vector<128xf32>
    %37 = vector.multi_reduction <add>, %36, %cst_27 [0] : vector<256x128xf32> to vector<128xf32>
    %38 = vector.shape_cast %37 : vector<128xf32> to vector<1x128xf32>
    %c0_28 = arith.constant 0 : index
    %c0_29 = arith.constant 0 : index
    %39 = vector.load %arg12[%c0_28, %c0_29] : memref<1x1xf32, #tpu.memory_space<vmem>>, vector<1x1xf32>
    %40 = vector.broadcast %39 : vector<1x1xf32> to vector<1x128xf32>
    %41 = arith.addf %38, %40 : vector<1x128xf32>
    %42 = arith.minimumf %25, %41 : vector<1x128xf32>
    %c0_30 = arith.constant 0 : index
    %c0_31 = arith.constant 0 : index
    %43 = vector.load %arg13[%c0_30, %c0_31] : memref<1x128xf32, #tpu.memory_space<vmem>>, vector<1x128xf32>
    tpu.vector_store %arg13[%c0_30, %c0_31], %42 {strides = array<i32>} : memref<1x128xf32, #tpu.memory_space<vmem>>, vector<1x128xf32>,
    return
  }
  func.func @transform_0(%arg0: i32) -> (i32, i32) {
    %c0_i32 = arith.constant 0 : i32
    %c0_i32_0 = arith.constant 0 : i32
    return %arg0, %c0_i32 : i32, i32
  }
  func.func @transform_1(%arg0: i32) -> (i32, i32) {
    %c0_i32 = arith.constant 0 : i32
    %c0_i32_0 = arith.constant 0 : i32
    return %arg0, %c0_i32 : i32, i32
  }
  func.func @transform_2(%arg0: i32) -> (i32, i32) {
    %c0_i32 = arith.constant 0 : i32
    %c0_i32_0 = arith.constant 0 : i32
    %c0_i32_1 = arith.constant 0 : i32
    return %c0_i32, %c0_i32_0 : i32, i32
  }
  func.func @transform_3(%arg0: i32) -> (i32, i32) {
    %c0_i32 = arith.constant 0 : i32
    %c0_i32_0 = arith.constant 0 : i32
    %c0_i32_1 = arith.constant 0 : i32
    return %c0_i32, %c0_i32_0 : i32, i32
  }
  func.func @transform_4(%arg0: i32) -> (i32, i32) {
    %c0_i32 = arith.constant 0 : i32
    %c0_i32_0 = arith.constant 0 : i32
    %c0_i32_1 = arith.constant 0 : i32
    return %c0_i32, %c0_i32_0 : i32, i32
  }
  func.func @transform_5(%arg0: i32) -> (i32, i32) {
    %c0_i32 = arith.constant 0 : i32
    %c0_i32_0 = arith.constant 0 : i32
    %c0_i32_1 = arith.constant 0 : i32
    return %c0_i32, %c0_i32_0 : i32, i32
  }
  func.func @transform_6(%arg0: i32) -> (i32, i32) {
    %c0_i32 = arith.constant 0 : i32
    %c0_i32_0 = arith.constant 0 : i32
    %c0_i32_1 = arith.constant 0 : i32
    return %c0_i32, %c0_i32_0 : i32, i32
  }
  func.func @transform_7(%arg0: i32) -> (i32, i32) {
    %c0_i32 = arith.constant 0 : i32
    %c0_i32_0 = arith.constant 0 : i32
    %c0_i32_1 = arith.constant 0 : i32
    return %c0_i32, %c0_i32_0 : i32, i32
  }
  func.func @transform_8(%arg0: i32) -> (i32, i32) {
    %c0_i32 = arith.constant 0 : i32
    %c0_i32_0 = arith.constant 0 : i32
    %c0_i32_1 = arith.constant 0 : i32
    return %c0_i32, %c0_i32_0 : i32, i32
  }
  func.func @transform_9(%arg0: i32) -> (i32, i32) {
    %c0_i32 = arith.constant 0 : i32
    %c0_i32_0 = arith.constant 0 : i32
    %c0_i32_1 = arith.constant 0 : i32
    return %c0_i32, %c0_i32_0 : i32, i32
  }
  func.func @transform_10(%arg0: i32) -> (i32, i32) {
    %c0_i32 = arith.constant 0 : i32
    %c0_i32_0 = arith.constant 0 : i32
    %c0_i32_1 = arith.constant 0 : i32
    return %c0_i32, %c0_i32_0 : i32, i32
  }
  func.func @transform_11(%arg0: i32) -> (i32, i32) {
    %c0_i32 = arith.constant 0 : i32
    %c0_i32_0 = arith.constant 0 : i32
    %c0_i32_1 = arith.constant 0 : i32
    return %c0_i32, %c0_i32_0 : i32, i32
  }
  func.func @transform_12(%arg0: i32) -> (i32, i32) {
    %c0_i32 = arith.constant 0 : i32
    %c0_i32_0 = arith.constant 0 : i32
    return %c0_i32, %arg0 : i32, i32
  }
}

</mosaic_0001>

<bundles_post_ra>
// kernel: tpu_custom_call.1
= control target key start
LH: loop header
LB: loop body
LE: loop exit
PB: predicated region body
PF: predicated region fallthrough
CT: control target
= control target key end

     0   :  { %s4698_s0 = inlined_call_operand.hbm [shape: f32[128,17], index: 0, kind: input, shape index: {}]   ;;  %s4699_s1 = inlined_call_operand.hbm [shape: f32[128,6], index: 1, kind: input, shape index: {}]   ;;  %s4700_s2 = inlined_call_operand.hbm [shape: f32[512,23], index: 2, kind: input, shape index: {}]   ;;  %s4701_s3 = inlined_call_operand.hbm [shape: f32[512,1], index: 3, kind: input, shape index: {}]   ;;  %s4702_s4 = inlined_call_operand.hbm [shape: f32[256,256], index: 4, kind: input, shape index: {}]   ;;  %s4703_s5 = inlined_call_operand.hbm [shape: f32[256,1], index: 5, kind: input, shape index: {}]   ;;  %s4704_s6 = inlined_call_operand.hbm [shape: f32[256,1], index: 6, kind: input, shape index: {}]   ;;  %s4705_s7 = inlined_call_operand.<no memory space> [shape: f32[1,1], index: 7, kind: input, shape index: {}]   ;;  %s4706_s8 = inlined_call_operand.hbm [shape: f32[256,256], index: 8, kind: input, shape index: {}]   ;;  %s4707_s9 = inlined_call_operand.hbm [shape: f32[256,1], index: 9, kind: input, shape index: {}]   ;;  %s4708_s10 = inlined_call_operand.hbm [shape: f32[256,1], index: 10, kind: input, shape index: {}]   ;;  %s4709_s12 = inlined_call_operand.hbm [shape: f32[1,128], index: 12, kind: output, shape index: {}]   ;;  %s4710_s11 = inlined_call_operand.<no memory space> [shape: f32[1,1], index: 11, kind: input, shape index: {}]  }
   0x1   :  { %v17_v0 = vstv %s4705_s7  ;;  %v19_v1 = vstv %s4710_s11 }
   0x2   :  { %18 = vst [vmem:[#allocation2] sm:$0x1] %v17_v0  ;;  %20 = vst [vmem:[#allocation3] sm:$0x1] %v19_v1 }
   0x3   :  { %21 = vsyncpa [#allocation5], 0 }
   0x4   :  { %22 = vsyncpa [#allocation8], 0 }
   0x5   :  { %23 = vsyncpa [#allocation11], 0 }
   0x6   :  { %24 = vsyncpa [#allocation14], 0 }
   0x7   :  { %25 = vsyncpa [#allocation17], 0 }
   0x8   :  { %26 = vsyncpa [#allocation20], 0 }
   0x9   :  { %27 = vsyncpa [#allocation6], 0  ;;  %s3789_s25 = smov [#allocation7]   ;;  %s3790_s27 = smov [#allocation10]  }
   0xa   :  { %s45_s26 = sshll.u32 %s3789_s25, 4  ;;  %s69_s28 = sshll.u32 %s3790_s27, 4  ;;  %s46_s26 = int_to_ptr.vmem [resolvable:$true] %s45_s26  ;;  %s3878_s28 = int_to_ptr.vmem [resolvable:$true] %s69_s28 }
   0xb   :  { %s3533_s11 = scalar_lea.hbm %s4699_s1, 2048 }
   0xc   :  { %p3534_p0 = scmp.ne.s32.totalorder %s4699_s1, %s3533_s11  ;;  %p3537_p1 = scmp.lt.u32.totalorder %s3533_s11, %s4699_s1 }
   0xe   :  { %p3539_p2 = pnand %p3537_p1, %p3534_p0 }
  0x10   :  { %3542 = shalt.err (!%p3539_p2)
}
  0x11   :  { %s3543_s16 = scalar_lea.vmem %s46_s26, 2048  ;;  %p3548_p4 = scmp.lt.s32.totalorder %s46_s26, %s46_s26 }
  0x12   :  { %p3544_p3 = scmp.ne.s32.totalorder %s46_s26, %s3543_s16  ;;  %p3549_p5 = scmp.lt.s32.totalorder %s3543_s16, %s3543_s16 }
  0x14   :  { %p3550_p6 = por %p3549_p5, %p3548_p4 }
  0x16   :  { %p3551_p7 = pnand %p3550_p6, %p3544_p3 }
  0x18   :  { %3554 = shalt.err (!%p3551_p7)
}
  0x19   :  { %s3791_s17 = smov 128   ;;  %s3792_s18 = smov 8  }
  0x1a   :  { %51 = dma.hbm_to_vmem [thread:$0]  %s4699_s1, 2048, %s46_s26, [#allocation8], %s3791_s17, %s3791_s17, %s3792_s18  }
  0x1b   :  { %s3555_s23 = scalar_lea.hbm %s4701_s3, 8192 }
  0x1c   :  { %p3556_p8 = scmp.ne.s32.totalorder %s4701_s3, %s3555_s23  ;;  %p3559_p9 = scmp.lt.u32.totalorder %s3555_s23, %s4701_s3 }
  0x1e   :  { %p3561_p10 = pnand %p3559_p9, %p3556_p8 }
  0x20   :  { %3564 = shalt.err (!%p3561_p10)
}
  0x21   :  { %s3565_s29 = scalar_lea.vmem %s3878_s28, 8192  ;;  %p3570_p12 = scmp.lt.s32.totalorder %s3878_s28, %s3878_s28 }
  0x22   :  { %p3566_p11 = scmp.ne.s32.totalorder %s3878_s28, %s3565_s29  ;;  %p3571_p13 = scmp.lt.s32.totalorder %s3565_s29, %s3565_s29 }
  0x24   :  { %p3572_p0 = por %p3571_p13, %p3570_p12 }
  0x26   :  { %p3573_p1 = pnand %p3572_p0, %p3566_p11 }
  0x28   :  { %3576 = shalt.err (!%p3573_p1)
}
  0x29   :  { %75 = dma.hbm_to_vmem [thread:$0]  %s4701_s3, 8192, %s3878_s28, [#allocation11], %s3791_s17, %s3791_s17, %s3792_s18  }
  0x2a   :  { %s3793_s11 = smov [#allocation13]   ;;  %s3577_s15 = scalar_lea.hbm %s4703_s5, 4096 }
  0x2b   :  { %s93_s30 = sshll.u32 %s3793_s11, 4  ;;  %p3578_p2 = scmp.ne.s32.totalorder %s4703_s5, %s3577_s15  ;;  %s94_s30 = int_to_ptr.vmem [resolvable:$true] %s93_s30 }
  0x2c   :  { %p3581_p3 = scmp.lt.u32.totalorder %s3577_s15, %s4703_s5 }
  0x2e   :  { %p3583_p4 = pnand %p3581_p3, %p3578_p2 }
  0x30   :  { %3586 = shalt.err (!%p3583_p4)
}
  0x31   :  { %s3587_s22 = scalar_lea.vmem %s94_s30, 4096  ;;  %p3592_p6 = scmp.lt.s32.totalorder %s94_s30, %s94_s30 }
  0x32   :  { %p3588_p5 = scmp.ne.s32.totalorder %s94_s30, %s3587_s22  ;;  %p3593_p7 = scmp.lt.s32.totalorder %s3587_s22, %s3587_s22 }
  0x34   :  { %p3594_p8 = por %p3593_p7, %p3592_p6 }
  0x36   :  { %p3595_p9 = pnand %p3594_p8, %p3588_p5 }
  0x38   :  { %3598 = shalt.err (!%p3595_p9)
}
  0x39   :  { %99 = dma.hbm_to_vmem [thread:$0]  %s4703_s5, 4096, %s94_s30, [#allocation14], %s3791_s17, %s3791_s17, %s3792_s18  }
  0x3a   :  { %s3794_s23 = smov [#allocation16]   ;;  %s3795_s25 = smov [#allocation4]  }
  0x3b   :  { %s119_s24 = sshll.u32 %s3794_s23, 4  ;;  %s33_s27 = sshll.u32 %s3795_s25, 4  ;;  %s120_s24 = int_to_ptr.vmem [resolvable:$true] %s119_s24  ;;  %s34_s27 = int_to_ptr.vmem [resolvable:$true] %s33_s27 }
  0x3c   :  { %s3599_s1 = scalar_lea.hbm %s4706_s8, 8192 }
  0x3d   :  { %p3600_p10 = scmp.ne.s32.totalorder %s4706_s8, %s3599_s1  ;;  %p3603_p11 = scmp.lt.u32.totalorder %s3599_s1, %s4706_s8 }
  0x3f   :  { %p3605_p12 = pnand %p3603_p11, %p3600_p10 }
  0x41   :  { %3608 = shalt.err (!%p3605_p12)
}
  0x42   :  { %s3609_s5 = scalar_lea.vmem %s120_s24, 8192  ;;  %p3614_p0 = scmp.lt.s32.totalorder %s120_s24, %s120_s24 }
  0x43   :  { %p3610_p13 = scmp.ne.s32.totalorder %s120_s24, %s3609_s5  ;;  %p3615_p1 = scmp.lt.s32.totalorder %s3609_s5, %s3609_s5 }
  0x45   :  { %p3616_p2 = por %p3615_p1, %p3614_p0 }
  0x47   :  { %p3617_p3 = pnand %p3616_p2, %p3610_p13 }
  0x49   :  { %3620 = shalt.err (!%p3617_p3)
}
  0x4a   :  { %s3796_s30 = smov 256   ;;  %s3797_s15 = smov 16  }
  0x4b   :  { %125 = dma.hbm_to_vmem [thread:$0]  %s4706_s8, 8192, %s120_s24, [#allocation17], %s3796_s30, %s3796_s30, %s3797_s15  }
  0x4c   :  { %s3621_s22 = scalar_lea.hbm %s4698_s0, 2048 }
  0x4d   :  { %p3622_p4 = scmp.ne.s32.totalorder %s4698_s0, %s3621_s22  ;;  %p3625_p5 = scmp.lt.u32.totalorder %s3621_s22, %s4698_s0 }
  0x4f   :  { %p3627_p6 = pnand %p3625_p5, %p3622_p4 }
  0x51   :  { %3630 = shalt.err (!%p3627_p6)
}
  0x52   :  { %s3631_s7 = scalar_lea.vmem %s34_s27, 2048  ;;  %p3636_p8 = scmp.lt.s32.totalorder %s34_s27, %s34_s27 }
  0x53   :  { %p3632_p7 = scmp.ne.s32.totalorder %s34_s27, %s3631_s7  ;;  %p3637_p9 = scmp.lt.s32.totalorder %s3631_s7, %s3631_s7 }
  0x55   :  { %p3638_p10 = por %p3637_p9, %p3636_p8 }
  0x57   :  { %p3639_p11 = pnand %p3638_p10, %p3632_p7 }
  0x59   :  { %3642 = shalt.err (!%p3639_p11)
}
  0x5a   :  { %39 = dma.hbm_to_vmem [thread:$0]  %s4698_s0, 2048, %s34_s27, [#allocation5], %s3791_s17, %s3791_s17, %s3792_s18  }
  0x5b   :  { %s3798_s29 = smov [#allocation9]   ;;  %s3799_s26 = smov [#allocation12]  }
  0x5c   :  { %s57_s1 = sshll.u32 %s3798_s29, 4  ;;  %s81_s11 = sshll.u32 %s3799_s26, 4  ;;  %s58_s1 = int_to_ptr.vmem [resolvable:$true] %s57_s1  ;;  %s82_s11 = int_to_ptr.vmem [resolvable:$true] %s81_s11 }
  0x5d   :  { %s3643_s5 = scalar_lea.hbm %s4700_s2, 8192 }
  0x5e   :  { %p3644_p12 = scmp.ne.s32.totalorder %s4700_s2, %s3643_s5  ;;  %p3647_p13 = scmp.lt.u32.totalorder %s3643_s5, %s4700_s2 }
  0x60   :  { %p3649_p0 = pnand %p3647_p13, %p3644_p12 }
  0x62   :  { %3652 = shalt.err (!%p3649_p0)
}
  0x63   :  { %s3653_s0 = scalar_lea.vmem %s58_s1, 8192  ;;  %p3658_p2 = scmp.lt.s32.totalorder %s58_s1, %s58_s1 }
  0x64   :  { %p3654_p1 = scmp.ne.s32.totalorder %s58_s1, %s3653_s0  ;;  %p3659_p3 = scmp.lt.s32.totalorder %s3653_s0, %s3653_s0 }
  0x66   :  { %p3660_p4 = por %p3659_p3, %p3658_p2 }
  0x68   :  { %p3661_p5 = pnand %p3660_p4, %p3654_p1 }
  0x6a   :  { %3664 = shalt.err (!%p3661_p5)
}
  0x6b   :  { %63 = dma.hbm_to_vmem [thread:$0]  %s4700_s2, 8192, %s58_s1, [#allocation8], %s3791_s17, %s3791_s17, %s3792_s18  }
  0x6c   :  { %s3665_s23 = scalar_lea.hbm %s4702_s4, 8192 }
  0x6d   :  { %p3666_p6 = scmp.ne.s32.totalorder %s4702_s4, %s3665_s23  ;;  %p3669_p7 = scmp.lt.u32.totalorder %s3665_s23, %s4702_s4 }
  0x6f   :  { %p3671_p8 = pnand %p3669_p7, %p3666_p6 }
  0x71   :  { %3674 = shalt.err (!%p3671_p8)
}
  0x72   :  { %s3675_s29 = scalar_lea.vmem %s82_s11, 8192  ;;  %p3680_p10 = scmp.lt.s32.totalorder %s82_s11, %s82_s11 }
  0x73   :  { %p3676_p9 = scmp.ne.s32.totalorder %s82_s11, %s3675_s29  ;;  %p3681_p11 = scmp.lt.s32.totalorder %s3675_s29, %s3675_s29 }
  0x75   :  { %p3682_p12 = por %p3681_p11, %p3680_p10 }
  0x77   :  { %p3683_p13 = pnand %p3682_p12, %p3676_p9 }
  0x79   :  { %3686 = shalt.err (!%p3683_p13)
}
  0x7a   :  { %87 = dma.hbm_to_vmem [thread:$0]  %s4702_s4, 8192, %s82_s11, [#allocation11], %s3796_s30, %s3796_s30, %s3797_s15  }
  0x7b   :  { %s3800_s26 = smov [#allocation15]   ;;  %s3801_s14 = smov [#allocation18]  }
  0x7c   :  { %s105_s13 = sshll.u32 %s3800_s26, 4  ;;  %s131_s5 = sshll.u32 %s3801_s14, 4  ;;  %s106_s13 = int_to_ptr.vmem [resolvable:$true] %s105_s13  ;;  %s132_s5 = int_to_ptr.vmem [resolvable:$true] %s131_s5 }
  0x7d   :  { %s3687_s20 = scalar_lea.hbm %s4704_s6, 4096 }
  0x7e   :  { %p3688_p0 = scmp.ne.s32.totalorder %s4704_s6, %s3687_s20  ;;  %p3691_p1 = scmp.lt.u32.totalorder %s3687_s20, %s4704_s6 }
  0x80   :  { %p3693_p2 = pnand %p3691_p1, %p3688_p0 }
  0x82   :  { %3696 = shalt.err (!%p3693_p2)
}
  0x83   :  { %s3697_s4 = scalar_lea.vmem %s106_s13, 4096  ;;  %p3702_p4 = scmp.lt.s32.totalorder %s106_s13, %s106_s13 }
  0x84   :  { %p3698_p3 = scmp.ne.s32.totalorder %s106_s13, %s3697_s4  ;;  %p3703_p5 = scmp.lt.s32.totalorder %s3697_s4, %s3697_s4 }
  0x86   :  { %p3704_p6 = por %p3703_p5, %p3702_p4 }
  0x88   :  { %p3705_p7 = pnand %p3704_p6, %p3698_p3 }
  0x8a   :  { %3708 = shalt.err (!%p3705_p7)
}
  0x8b   :  { %111 = dma.hbm_to_vmem [thread:$0]  %s4704_s6, 4096, %s106_s13, [#allocation14], %s3791_s17, %s3791_s17, %s3792_s18  }
  0x8c   :  { %s3709_s28 = scalar_lea.hbm %s4707_s9, 4096 }
  0x8d   :  { %p3710_p8 = scmp.ne.s32.totalorder %s4707_s9, %s3709_s28  ;;  %p3713_p9 = scmp.lt.u32.totalorder %s3709_s28, %s4707_s9 }
  0x8f   :  { %p3715_p10 = pnand %p3713_p9, %p3710_p8 }
  0x91   :  { %3718 = shalt.err (!%p3715_p10)
}
  0x92   :  { %s3719_s24 = scalar_lea.vmem %s132_s5, 4096  ;;  %p3724_p12 = scmp.lt.s32.totalorder %s132_s5, %s132_s5 }
  0x93   :  { %p3720_p11 = scmp.ne.s32.totalorder %s132_s5, %s3719_s24  ;;  %p3725_p13 = scmp.lt.s32.totalorder %s3719_s24, %s3719_s24 }
  0x95   :  { %p3726_p0 = por %p3725_p13, %p3724_p12 }
  0x97   :  { %p3727_p1 = pnand %p3726_p0, %p3720_p11 }
  0x99   :  { %3730 = shalt.err (!%p3727_p1)
}
  0x9a   :  { %137 = dma.hbm_to_vmem [thread:$0]  %s4707_s9, 4096, %s132_s5, [#allocation17], %s3791_s17, %s3791_s17, %s3792_s18  }
  0x9b   :  { %s3802_s2 = smov [#allocation19]   ;;  %s3731_s14 = scalar_lea.hbm %s4708_s10, 4096 }
  0x9c   :  { %s143_s1 = sshll.u32 %s3802_s2, 4  ;;  %p3732_p2 = scmp.ne.s32.totalorder %s4708_s10, %s3731_s14  ;;  %s144_s1 = int_to_ptr.vmem [resolvable:$true] %s143_s1 }
  0x9d   :  { %p3735_p3 = scmp.lt.u32.totalorder %s3731_s14, %s4708_s10 }
  0x9f   :  { %p3737_p4 = pnand %p3735_p3, %p3732_p2 }
  0xa1   :  { %3740 = shalt.err (!%p3737_p4)
}
  0xa2   :  { %s3741_s0 = scalar_lea.vmem %s144_s1, 4096  ;;  %p3746_p6 = scmp.lt.s32.totalorder %s144_s1, %s144_s1 }
  0xa3   :  { %p3742_p5 = scmp.ne.s32.totalorder %s144_s1, %s3741_s0  ;;  %p3747_p7 = scmp.lt.s32.totalorder %s3741_s0, %s3741_s0 }
  0xa5   :  { %p3748_p8 = por %p3747_p7, %p3746_p6 }
  0xa7   :  { %p3749_p9 = pnand %p3748_p8, %p3742_p5 }
  0xa9   :  { %3752 = shalt.err (!%p3749_p9)
}
  0xaa   :  { %149 = dma.hbm_to_vmem [thread:$0]  %s4708_s10, 4096, %s144_s1, [#allocation20], %s3791_s17, %s3791_s17, %s3792_s18  }
  0xab   :  { %3775 = dma.done.wait [#allocation5], 2048  }
  0xac   :  { %3776 = vsyncadd [#allocation5], 4294965248 }
  0xad   :  { %3777 = dma.done.wait [#allocation8], 10240  }
  0xae   :  { %3778 = vsyncadd [#allocation8], 4294957056 }
  0xaf   :  { %3779 = dma.done.wait [#allocation11], 16384  }
  0xb0   :  { %3780 = vsyncadd [#allocation11], 4294950912 }
  0xb1   :  { %3781 = dma.done.wait [#allocation14], 8192  }
  0xb2   :  { %3782 = vsyncadd [#allocation14], 4294959104 }
  0xb3   :  { %3783 = dma.done.wait [#allocation17], 12288  }
  0xb4   :  { %3784 = vsyncadd [#allocation17], 4294955008 }
  0xb5   :  { %3785 = dma.done.wait [#allocation20], 4096  }
  0xb6   :  { %3786 = vsyncadd [#allocation20], 4294963200  ;;  %v3803_v2 = vmov 0   ;;  %v202_v3 = vld [vmem:[#allocation7 + $0x20] sm:$0xff]  ;;  %v203_v4 = vld [vmem:[#allocation7 + $0x28] sm:$0xff]  ;;  %s3804_s10 = smov 17  }
  0xb7   :  { %3532 = vset.pattern.permute.xlu1 %v3803_v2  ;;  %3531 = vset.pattern.permute.xlu0 %v3803_v2  ;;  %v198_v5 = vld [vmem:[#allocation7] sm:$0xff]  ;;  %v3501_v6 = vpack.i.bf16 %v203_v4, %v202_v3  ;;  %v199_v7 = vld [vmem:[#allocation7 + $0x8] sm:$0xff]  ;;  %v204_v8 = vld [vmem:[#allocation7 + $0x30] sm:$0xff]  ;;  %vm743_vm0 = vcmask 187392   ;;  %vm278_vm1 = vcmask 138240   ;;  %s3806_s17 = smov [#allocation21]  }
  0xb8   :  { %v205_v9 = vld [vmem:[#allocation7 + $0x38] sm:$0xff]  ;;  %v3491_v10 = vpack.i.bf16 %v199_v7, %v198_v5  ;;  %v200_v11 = vld [vmem:[#allocation7 + $0x10] sm:$0xff]  ;;  %v206_v17 = vld [vmem:[#allocation7 + $0x40] sm:$0xff]  ;;  %s3011_s18 = sshll.u32 %s3806_s17, 4  ;;  %s3012_s18 = int_to_ptr.vmem [resolvable:$true] %s3011_s18 }
  0xb9   :  { %v201_v12 = vld [vmem:[#allocation7 + $0x18] sm:$0xff]  ;;  %3502 = vrot.lane.b32.xlu1 %v3501_v6, %s3804_s10  ;;  %v3506_v13 = vpack.i.bf16 %v205_v9, %v204_v8  ;;  %v208_v15 = vld [vmem:[#allocation7 + $0x50] sm:$0xff]  ;;  %v207_v18 = vld [vmem:[#allocation7 + $0x48] sm:$0xff]  ;;  %s3753_s27 = scalar_lea.vmem %s3012_s18, 16  ;;  %s3757_s22 = scalar_lea.vmem %s3012_s18, 32 }
  0xba   :  { %3492 = vrot.lane.b32.xlu0 %v3491_v10, %s3804_s10  ;;  %v3496_v14 = vpack.i.bf16 %v201_v12, %v200_v11  ;;  %v209_v16 = vld [vmem:[#allocation7 + $0x58] sm:$0xff]  ;;  %v3511_v20 = vpack.i.bf16 %v207_v18, %v206_v17  ;;  %v212_v21 = vld [vmem:[#allocation7 + $0x70] sm:$0xff]  ;;  %v210_v23 = vld [vmem:[#allocation7 + $0x60] sm:$0xff]  ;;  %p3754_p10 = scmp.ne.s32.totalorder %s3012_s18, %s3753_s27  ;;  %p3758_p11 = scmp.lt.s32.totalorder %s3012_s18, %s3012_s18 }
  0xbb   :  { %v3516_v19 = vpack.i.bf16 %v209_v16, %v208_v15  ;;  %v213_v22 = vld [vmem:[#allocation7 + $0x78] sm:$0xff]  ;;  %v211_v24 = vld [vmem:[#allocation7 + $0x68] sm:$0xff]  ;;  %v359_v28 = vld [vmem:[#allocation10] sm:$0xff]  ;;  %p3759_p12 = scmp.lt.s32.totalorder %s3757_s22, %s3753_s27 }
  0xbc   :  { %v3526_v25 = vpack.i.bf16 %v213_v22, %v212_v21  ;;  %v3521_v26 = vpack.i.bf16 %v211_v24, %v210_v23  ;;  %v360_v27 = vld [vmem:[#allocation10 + $0x8] sm:$0xff]  ;;  %v361_v29 = vld [vmem:[#allocation10 + $0x10] sm:$0xff]  ;;  %v362_v30 = vld [vmem:[#allocation10 + $0x18] sm:$0xff] }
  0xbd   :  { %3507 = vrot.lane.b32.xlu1 %v3506_v13, %s3804_s10  ;;  %v363_v31 = vld [vmem:[#allocation10 + $0x20] sm:$0xff]  ;;  %v364_v32 = vld [vmem:[#allocation10 + $0x28] sm:$0xff]  ;;  %v365_v33 = vld [vmem:[#allocation10 + $0x30] sm:$0xff]  ;;  %p3760_p13 = por %p3759_p12, %p3758_p11 }
  0xbe   :  { %3497 = vrot.lane.b32.xlu0 %v3496_v14, %s3804_s10  ;;  %v366_v34 = vld [vmem:[#allocation10 + $0x38] sm:$0xff]  ;;  %v367_v35 = vld [vmem:[#allocation10 + $0x40] sm:$0xff]  ;;  %v368_v36 = vld [vmem:[#allocation10 + $0x48] sm:$0xff] }
  0xbf   :  { %v369_v37 = vld [vmem:[#allocation10 + $0x50] sm:$0xff]  ;;  %v370_v38 = vld [vmem:[#allocation10 + $0x58] sm:$0xff]  ;;  %v371_v39 = vld [vmem:[#allocation10 + $0x60] sm:$0xff]  ;;  %p3761_p0 = pnand %p3760_p13, %p3754_p10 }
  0xc0   :  { %v372_v40 = vld [vmem:[#allocation10 + $0x68] sm:$0xff]  ;;  %v373_v41 = vld [vmem:[#allocation10 + $0x70] sm:$0xff]  ;;  %v374_v42 = vld [vmem:[#allocation10 + $0x78] sm:$0xff] }
  0xc1   :  { %3517 = vrot.lane.b32.xlu1 %v3516_v19, %s3804_s10  ;;  %v375_v43 = vld [vmem:[#allocation10 + $0x80] sm:$0xff]  ;;  %v376_v44 = vld [vmem:[#allocation10 + $0x88] sm:$0xff]  ;;  %v377_v45 = vld [vmem:[#allocation10 + $0x90] sm:$0xff] }
  0xc2   :  { %3512 = vrot.lane.b32.xlu0 %v3511_v20, %s3804_s10  ;;  %v378_v46 = vld [vmem:[#allocation10 + $0x98] sm:$0xff]  ;;  %v379_v47 = vld [vmem:[#allocation10 + $0xa0] sm:$0xff]  ;;  %v380_v50 = vld [vmem:[#allocation10 + $0xa8] sm:$0xff] }
  0xc3   :  { %v295_v48 = vld [vmem:[#allocation9] sm:$0xff]  ;;  %v381_v51 = vld [vmem:[#allocation10 + $0xb0] sm:$0xff]  ;;  %v382_v52 = vld [vmem:[#allocation10 + $0xb8] sm:$0xff] }
  0xc4   :  { %v327_v49 = vld [vmem:[#allocation9 + $0x100] sm:$0xff]  ;;  %3217 = vmatprep.mubr.msk.f32.mxu0 %vm743_vm0, %v295_v48  ;;  %v384_v54 = vld [vmem:[#allocation10 + $0xc8] sm:$0xff]  ;;  %v385_v55 = vld [vmem:[#allocation10 + $0xd0] sm:$0xff] }
  0xc5   :  { %3527 = vrot.lane.b32.xlu1 %v3526_v25, %s3804_s10  ;;  %3265 = vmatprep.mubr.msk.f32.mxu1 %vm743_vm0, %v327_v49  ;;  %v383_v53 = vld [vmem:[#allocation10 + $0xc0] sm:$0xff]  ;;  %v386_v56 = vld [vmem:[#allocation10 + $0xd8] sm:$0xff]  ;;  %v388_v58 = vld [vmem:[#allocation10 + $0xe8] sm:$0xff] }
  0xc6   :  { %3522 = vrot.lane.b32.xlu0 %v3521_v26, %s3804_s10  ;;  %v387_v57 = vld [vmem:[#allocation10 + $0xe0] sm:$0xff]  ;;  %v389_v59 = vld [vmem:[#allocation10 + $0xf0] sm:$0xff]  ;;  %v390_v60 = vld [vmem:[#allocation10 + $0xf8] sm:$0xff] }
  0xc7   :  { %v391_v61 = vld [vmem:[#allocation10 + $0x100] sm:$0xff]  ;;  %v392_v62 = vld [vmem:[#allocation10 + $0x108] sm:$0xff]  ;;  %v393_v63 = vld [vmem:[#allocation10 + $0x110] sm:$0xff] }
  0xc8   :  { %v394_v0 = vld [vmem:[#allocation10 + $0x118] sm:$0xff]  ;;  %v395_v1 = vld [vmem:[#allocation10 + $0x120] sm:$0xff]  ;;  %v396_v2 = vld [vmem:[#allocation10 + $0x128] sm:$0xff] }
  0xc9   :  { %430 = vperm.xlu1 %3532, %v360_v27   ;;  %v397_v3 = vld [vmem:[#allocation10 + $0x130] sm:$0xff]  ;;  %v398_v4 = vld [vmem:[#allocation10 + $0x138] sm:$0xff]  ;;  %v399_v5 = vld [vmem:[#allocation10 + $0x140] sm:$0xff] }
  0xca   :  { %425 = vperm.xlu0 %3531, %v359_v28   ;;  %v400_v6 = vld [vmem:[#allocation10 + $0x148] sm:$0xff]  ;;  %v401_v7 = vld [vmem:[#allocation10 + $0x150] sm:$0xff]  ;;  %v402_v8 = vld [vmem:[#allocation10 + $0x158] sm:$0xff] }
  0xcb   :  { %v403_v9 = vld [vmem:[#allocation10 + $0x160] sm:$0xff]  ;;  %v404_v10 = vld [vmem:[#allocation10 + $0x168] sm:$0xff]  ;;  %v405_v11 = vld [vmem:[#allocation10 + $0x170] sm:$0xff] }
  0xcc   :  { %v406_v12 = vld [vmem:[#allocation10 + $0x178] sm:$0xff]  ;;  %v407_v13 = vld [vmem:[#allocation10 + $0x180] sm:$0xff]  ;;  %v408_v14 = vld [vmem:[#allocation10 + $0x188] sm:$0xff] }
  0xcd   :  { %435 = vperm.xlu1 %3532, %v361_v29   ;;  %v409_v15 = vld [vmem:[#allocation10 + $0x190] sm:$0xff]  ;;  %v410_v16 = vld [vmem:[#allocation10 + $0x198] sm:$0xff]  ;;  %v182_v18 = vld [vmem:[#allocation4] sm:$0xff] }
  0xce   :  { %440 = vperm.xlu0 %3531, %v362_v30   ;;  %v183_v19 = vld [vmem:[#allocation4 + $0x8] sm:$0xff]  ;;  %v411_v22 = vld [vmem:[#allocation10 + $0x1a0] sm:$0xff]  ;;  %vm4041_vm2 = vmpackc.low %vm743_vm0, %vm743_vm0 }
  0xcf   :  { %v412_v25 = vld [vmem:[#allocation10 + $0x1a8] sm:$0xff]  ;;  %v184_v29 = vld [vmem:[#allocation4 + $0x10] sm:$0xff]  ;;  %v185_v30 = vld [vmem:[#allocation4 + $0x18] sm:$0xff] }
  0xd0   :  { %v1519_v26 = vld [vmem:[#allocation13 + $0xb0] sm:$0xff] }
  0xd1   :  { %445 = vperm.xlu1 %3532, %v363_v31  }
  0xd2   :  { %450 = vperm.xlu0 %3531, %v364_v32  }
  0xd5   :  { %455 = vperm.xlu1 %3532, %v365_v33  }
  0xd6   :  { %460 = vperm.xlu0 %3531, %v366_v34  }
  0xd9   :  { %465 = vperm.xlu1 %3532, %v367_v35  }
  0xda   :  { %470 = vperm.xlu0 %3531, %v368_v36   ;;  %v413_v36 = vld [vmem:[#allocation10 + $0x1b0] sm:$0xff] }
  0xdd   :  { %475 = vperm.xlu1 %3532, %v369_v37   ;;  %v186_v37 = vld [vmem:[#allocation4 + $0x20] sm:$0xff] }
  0xde   :  { %480 = vperm.xlu0 %3531, %v370_v38   ;;  %v187_v38 = vld [vmem:[#allocation4 + $0x28] sm:$0xff] }
  0xe1   :  { %485 = vperm.xlu1 %3532, %v371_v39  }
  0xe2   :  { %490 = vperm.xlu0 %3531, %v372_v40  }
  0xe5   :  { %495 = vperm.xlu1 %3532, %v373_v41   ;;  %v414_v41 = vld [vmem:[#allocation10 + $0x1b8] sm:$0xff] }
  0xe6   :  { %500 = vperm.xlu0 %3531, %v374_v42  }
  0xe9   :  { %505 = vperm.xlu1 %3532, %v375_v43  }
  0xea   :  { %510 = vperm.xlu0 %3531, %v376_v44  }
  0xed   :  { %515 = vperm.xlu1 %3532, %v377_v45   ;;  %v415_v45 = vld [vmem:[#allocation10 + $0x1c0] sm:$0xff] }
  0xee   :  { %520 = vperm.xlu0 %3531, %v378_v46  }
  0xf1   :  { %525 = vperm.xlu1 %3532, %v379_v47   ;;  %v416_v47 = vld [vmem:[#allocation10 + $0x1c8] sm:$0xff] }
  0xf2   :  { %530 = vperm.xlu0 %3531, %v380_v50  }
  0xf5   :  { %535 = vperm.xlu1 %3532, %v381_v51   ;;  %v188_v51 = vld [vmem:[#allocation4 + $0x30] sm:$0xff] }
  0xf6   :  { %540 = vperm.xlu0 %3531, %v382_v52   ;;  %v189_v52 = vld [vmem:[#allocation4 + $0x38] sm:$0xff] }
  0xf9   :  { %545 = vperm.xlu1 %3532, %v383_v53   ;;  %v417_v53 = vld [vmem:[#allocation10 + $0x1d0] sm:$0xff] }
  0xfa   :  { %550 = vperm.xlu0 %3531, %v384_v54   ;;  %v418_v54 = vld [vmem:[#allocation10 + $0x1d8] sm:$0xff] }
  0xfd   :  { %555 = vperm.xlu1 %3532, %v385_v55  }
  0xfe   :  { %560 = vperm.xlu0 %3531, %v386_v56  }
 0x101   :  { %565 = vperm.xlu1 %3532, %v387_v57  }
 0x102   :  { %570 = vperm.xlu0 %3531, %v388_v58  }
 0x105   :  { %575 = vperm.xlu1 %3532, %v389_v59   ;;  %v419_v59 = vld [vmem:[#allocation10 + $0x1e0] sm:$0xff] }
 0x106   :  { %580 = vperm.xlu0 %3531, %v390_v60   ;;  %v420_v60 = vld [vmem:[#allocation10 + $0x1e8] sm:$0xff] }
 0x109   :  { %585 = vperm.xlu1 %3532, %v391_v61  }
 0x10a   :  { %590 = vperm.xlu0 %3531, %v392_v62  }
 0x10d   :  { %595 = vperm.xlu1 %3532, %v393_v63  }
 0x10e   :  { %600 = vperm.xlu0 %3531, %v394_v0   ;;  %v190_v0 = vld [vmem:[#allocation4 + $0x40] sm:$0xff] }
 0x111   :  { %605 = vperm.xlu1 %3532, %v395_v1   ;;  %v191_v1 = vld [vmem:[#allocation4 + $0x48] sm:$0xff] }
 0x112   :  { %610 = vperm.xlu0 %3531, %v396_v2  }
 0x115   :  { %615 = vperm.xlu1 %3532, %v397_v3   ;;  %v421_v3 = vld [vmem:[#allocation10 + $0x1f0] sm:$0xff] }
 0x116   :  { %620 = vperm.xlu0 %3531, %v398_v4  }
 0x119   :  { %625 = vperm.xlu1 %3532, %v399_v5   ;;  %v422_v5 = vld [vmem:[#allocation10 + $0x1f8] sm:$0xff] }
 0x11a   :  { %630 = vperm.xlu0 %3531, %v400_v6  }
 0x11d   :  { %635 = vperm.xlu1 %3532, %v401_v7  }
 0x11e   :  { %640 = vperm.xlu0 %3531, %v402_v8   ;;  %v1497_v8 = vld [vmem:[#allocation13] sm:$0xff] }
 0x121   :  { %645 = vperm.xlu1 %3532, %v403_v9   ;;  %v1498_v9 = vld [vmem:[#allocation13 + $0x8] sm:$0xff] }
 0x122   :  { %650 = vperm.xlu0 %3531, %v404_v10  }
 0x125   :  { %655 = vperm.xlu1 %3532, %v405_v11  }
 0x126   :  { %660 = vperm.xlu0 %3531, %v406_v12  }
 0x129   :  { %665 = vperm.xlu1 %3532, %v407_v13  }
 0x12a   :  { %670 = vperm.xlu0 %3531, %v408_v14  }
 0x12b   :  { %v3503_v31 = vpop.permute.xlu1 %3502 }
 0x12c   :  { %v3493_v17 = vpop.permute.xlu0 %3492  ;;  %v3505_v34 = vunpack.i.h.bf16 %v3503_v31  ;;  %v3504_v35 = vunpack.i.l.bf16 %v3503_v31  ;;  %v194_v31 = vld [vmem:[#allocation4 + $0x60] sm:$0xff] }
 0x12d   :  { %v3495_v20 = vunpack.i.h.bf16 %v3493_v17  ;;  %v3494_v21 = vunpack.i.l.bf16 %v3493_v17  ;;  %675 = vperm.xlu1 %3532, %v409_v15   ;;  %v192_v15 = vld [vmem:[#allocation4 + $0x50] sm:$0xff] }
 0x12e   :  { %680 = vperm.xlu0 %3531, %v410_v16   ;;  %v283_v43 = vsel %vm278_vm1, %v186_v37, %v3504_v35  ;;  %v284_v44 = vsel %vm278_vm1, %v187_v38, %v3505_v34  ;;  %v193_v16 = vld [vmem:[#allocation4 + $0x58] sm:$0xff]  ;;  %v1499_v17 = vld [vmem:[#allocation13 + $0x10] sm:$0xff] }
 0x12f   :  { %v279_v23 = vsel %vm278_vm1, %v182_v18, %v3494_v21  ;;  %v280_v24 = vsel %vm278_vm1, %v183_v19, %v3495_v20  ;;  %v3508_v46 = vpop.permute.xlu1 %3507  ;;  %v3325_v48 = vpack.c.bf16 %v284_v44, %v283_v43  ;;  %v1500_v18 = vld [vmem:[#allocation13 + $0x18] sm:$0xff] }
 0x130   :  { %v3313_v27 = vpack.c.bf16 %v280_v24, %v279_v23  ;;  %v3498_v28 = vpop.permute.xlu0 %3497  ;;  %v3510_v49 = vunpack.i.h.bf16 %v3508_v46  ;;  %v3509_v50 = vunpack.i.l.bf16 %v3508_v46  ;;  %v1501_v23 = vld [vmem:[#allocation13 + $0x20] sm:$0xff]  ;;  %v1502_v24 = vld [vmem:[#allocation13 + $0x28] sm:$0xff]  ;;  %v1504_v34 = vld [vmem:[#allocation13 + $0x38] sm:$0xff] }
 0x131   :  { %685 = vperm.xlu1 %3532, %v411_v22   ;;  %v3500_v32 = vunpack.i.h.bf16 %v3498_v28  ;;  %v3499_v33 = vunpack.i.l.bf16 %v3498_v28  ;;  %v196_v46 = vld [vmem:[#allocation4 + $0x70] sm:$0xff] }
 0x132   :  { %690 = vperm.xlu0 %3531, %v412_v25   ;;  %3315 = vmatprep.subr.msk.bf16.mxu0 %vm4041_vm2, %v3313_v27  ;;  %v285_v56 = vsel %vm278_vm1, %v188_v51, %v3509_v50  ;;  %v286_v57 = vsel %vm278_vm1, %v189_v52, %v3510_v49  ;;  %v1508_v49 = vld [vmem:[#allocation13 + $0x58] sm:$0xff] }
 0x133   :  { %3457 = vmatprep.subr.msk.bf16.mxu1 %vm4041_vm2, %v3313_v27  ;;  %3318 = vmatpush3.bf16.xpose.msk.msra.mxu0 %vm4041_vm2, %v3313_v27  ;;  %v281_v39 = vsel %vm278_vm1, %v184_v29, %v3499_v33  ;;  %v282_v40 = vsel %vm278_vm1, %v185_v30, %v3500_v32  ;;  %v3518_v55 = vpop.permute.xlu1 %3517  ;;  %v3331_v61 = vpack.c.bf16 %v286_v57, %v285_v56  ;;  %v195_v32 = vld [vmem:[#allocation4 + $0x68] sm:$0xff]  ;;  %v1503_v33 = vld [vmem:[#allocation13 + $0x30] sm:$0xff] }
 0x134   :  { %3465 = vmatpush3.bf16.xpose.msk.msra.mxu1 %vm4041_vm2, %v3313_v27  ;;  %v3319_v42 = vpack.c.bf16 %v282_v40, %v281_v39  ;;  %v3513_v58 = vpop.permute.xlu0 %3512  ;;  %v3520_v12 = vunpack.i.h.bf16 %v3518_v55  ;;  %v3519_v13 = vunpack.i.l.bf16 %v3518_v55  ;;  %v1505_v39 = vld [vmem:[#allocation13 + $0x40] sm:$0xff]  ;;  %v1506_v40 = vld [vmem:[#allocation13 + $0x48] sm:$0xff] }
 0x135   :  { %695 = vperm.xlu1 %3532, %v413_v36   ;;  %v3515_v62 = vunpack.i.h.bf16 %v3513_v58  ;;  %v3514_v63 = vunpack.i.l.bf16 %v3513_v58  ;;  %v1510_v55 = vld [vmem:[#allocation13 + $0x68] sm:$0xff] }
 0x136   :  { %700 = vperm.xlu0 %3531, %v414_v41   ;;  %3321 = vmatprep.subr.msk.bf16.mxu0 %vm4041_vm2, %v3319_v42  ;;  %v289_v20 = vsel %vm278_vm1, %v192_v15, %v3519_v13  ;;  %v290_v21 = vsel %vm278_vm1, %v193_v16, %v3520_v12  ;;  %v328_v12 = vld [vmem:[#allocation9 + $0x108] sm:$0xff]  ;;  %v297_v13 = vld [vmem:[#allocation9 + $0x10] sm:$0xff] }
 0x137   :  { %3458 = vmatprep.subr.msk.bf16.mxu1 %vm4041_vm2, %v3319_v42  ;;  %v4071_v2 = vpop.permute.xlu1 %3527  ;;  %v287_v6 = vsel %vm278_vm1, %v190_v0, %v3514_v63  ;;  %v288_v7 = vsel %vm278_vm1, %v191_v1, %v3515_v62  ;;  %v3343_v27 = vpack.c.bf16 %v290_v21, %v289_v20  ;;  %v1513_v63 = vld [vmem:[#allocation13 + $0x80] sm:$0xff]  ;;  %v1514_v0 = vld [vmem:[#allocation13 + $0x88] sm:$0xff]  ;;  %v329_v16 = vld [vmem:[#allocation9 + $0x110] sm:$0xff] }
 0x138   :  { %v3523_v4 = vpop.permute.xlu0 %3522  ;;  %v3337_v11 = vpack.c.bf16 %v288_v7, %v287_v6  ;;  %v3530_v43 = vunpack.i.h.bf16 %v4071_v2  ;;  %v3529_v44 = vunpack.i.l.bf16 %v4071_v2  ;;  %v1517_v7 = vld [vmem:[#allocation13 + $0xa0] sm:$0xff]  ;;  %v330_v21 = vld [vmem:[#allocation9 + $0x118] sm:$0xff] }
 0x139   :  { %705 = vperm.xlu1 %3532, %v415_v45   ;;  %v3525_v28 = vunpack.i.h.bf16 %v3523_v4  ;;  %v3524_v29 = vunpack.i.l.bf16 %v3523_v4  ;;  %v1516_v4 = vld [vmem:[#allocation13 + $0x98] sm:$0xff] }
 0x13a   :  { %710 = vperm.xlu0 %3531, %v416_v47   ;;  %v197_v47 = vld [vmem:[#allocation4 + $0x78] sm:$0xff]  ;;  %v293_v51 = vsel %vm278_vm1, %v196_v46, %v3529_v44  ;;  %v303_v46 = vld [vmem:[#allocation9 + $0x40] sm:$0xff] }
 0x13b   :  { %3324 = vmatpush3.bf16.xpose.msk.msra.mxu0 %vm4041_vm2, %v3319_v42  ;;  %v291_v36 = vsel %vm278_vm1, %v194_v31, %v3524_v29  ;;  %v292_v37 = vsel %vm278_vm1, %v195_v32, %v3525_v28  ;;  %v294_v52 = vsel %vm278_vm1, %v197_v47, %v3530_v43  ;;  %v1521_v28 = vld [vmem:[#allocation13 + $0xc0] sm:$0xff]  ;;  %v1522_v29 = vld [vmem:[#allocation13 + $0xc8] sm:$0xff]  ;;  %v334_v44 = vld [vmem:[#allocation9 + $0x138] sm:$0xff] }
 0x13c   :  { %3466 = vmatpush3.bf16.xpose.msk.msra.mxu1 %vm4041_vm2, %v3319_v42  ;;  %3327 = vmatprep.subr.msk.bf16.mxu0 %vm4041_vm2, %v3325_v48  ;;  %v3349_v42 = vpack.c.bf16 %v292_v37, %v291_v36  ;;  %v3355_v57 = vpack.c.bf16 %v294_v52, %v293_v51  ;;  %v300_v31 = vld [vmem:[#allocation9 + $0x28] sm:$0xff]  ;;  %v333_v37 = vld [vmem:[#allocation9 + $0x130] sm:$0xff] }
 0x13d   :  { %715 = vperm.xlu1 %3532, %v417_v53   ;;  %3459 = vmatprep.subr.msk.bf16.mxu1 %vm4041_vm2, %v3325_v48  ;;  %v1526_v51 = vld [vmem:[#allocation13 + $0xe8] sm:$0xff] }
 0x13e   :  { %720 = vperm.xlu0 %3531, %v418_v54   ;;  %v1509_v54 = vld [vmem:[#allocation13 + $0x60] sm:$0xff]  ;;  %v304_v52 = vld [vmem:[#allocation9 + $0x48] sm:$0xff] }
 0x141   :  { %725 = vperm.xlu1 %3532, %v419_v59   ;;  %v1511_v59 = vld [vmem:[#allocation13 + $0x70] sm:$0xff] }
 0x142   :  { %730 = vperm.xlu0 %3531, %v420_v60   ;;  %v1512_v60 = vld [vmem:[#allocation13 + $0x78] sm:$0xff] }
 0x143   :  { %3330 = vmatpush3.bf16.xpose.msk.msra.mxu0 %vm4041_vm2, %v3325_v48 }
 0x144   :  { %3467 = vmatpush3.bf16.xpose.msk.msra.mxu1 %vm4041_vm2, %v3325_v48  ;;  %3333 = vmatprep.subr.msk.bf16.mxu0 %vm4041_vm2, %v3331_v61  ;;  %v1507_v48 = vld [vmem:[#allocation13 + $0x50] sm:$0xff] }
 0x145   :  { %735 = vperm.xlu1 %3532, %v421_v3   ;;  %3460 = vmatprep.subr.msk.bf16.mxu1 %vm4041_vm2, %v3331_v61  ;;  %v1515_v3 = vld [vmem:[#allocation13 + $0x90] sm:$0xff] }
 0x146   :  { %740 = vperm.xlu0 %3531, %v422_v5  }
 0x148   :  { %v4083_v10 = vpop.permute.xlu1 %430 }
 0x149   :  { %v4085_v14 = vpop.permute.xlu0 %425  ;;  %1531 = vperm.xlu1 %3532, %v1497_v8   ;;  %v1518_v8 = vld [vmem:[#allocation13 + $0xa8] sm:$0xff] }
 0x14a   :  { %1536 = vperm.xlu0 %3531, %v1498_v9   ;;  %v296_v9 = vld [vmem:[#allocation9 + $0x8] sm:$0xff] }
 0x14b   :  { %3336 = vmatpush3.bf16.xpose.msk.msra.mxu0 %vm4041_vm2, %v3331_v61 }
 0x14c   :  { %3468 = vmatpush3.bf16.xpose.msk.msra.mxu1 %vm4041_vm2, %v3331_v61  ;;  %v4091_v19 = vpop.permute.xlu1 %435  ;;  %3339 = vmatprep.subr.msk.bf16.mxu0 %vm4041_vm2, %v3337_v11 }
 0x14d   :  { %v4097_v22 = vpop.permute.xlu0 %440  ;;  %1541 = vperm.xlu1 %3532, %v1499_v17   ;;  %3461 = vmatprep.subr.msk.bf16.mxu1 %vm4041_vm2, %v3337_v11  ;;  %v1520_v17 = vld [vmem:[#allocation13 + $0xb8] sm:$0xff] }
 0x14e   :  { %1546 = vperm.xlu0 %3531, %v1500_v18   ;;  %v298_v18 = vld [vmem:[#allocation9 + $0x18] sm:$0xff] }
 0x150   :  { %v4101_v25 = vpop.permute.xlu1 %445 }
 0x151   :  { %v4103_v30 = vpop.permute.xlu0 %450  ;;  %1551 = vperm.xlu1 %3532, %v1501_v23   ;;  %v299_v23 = vld [vmem:[#allocation9 + $0x20] sm:$0xff] }
 0x152   :  { %1556 = vperm.xlu0 %3531, %v1502_v24  }
 0x153   :  { %3342 = vmatpush3.bf16.xpose.msk.msra.mxu0 %vm4041_vm2, %v3337_v11 }
 0x154   :  { %3469 = vmatpush3.bf16.xpose.msk.msra.mxu1 %vm4041_vm2, %v3337_v11  ;;  %v4109_v35 = vpop.permute.xlu1 %455  ;;  %3345 = vmatprep.subr.msk.bf16.mxu0 %vm4041_vm2, %v3343_v27 }
 0x155   :  { %v4115_v38 = vpop.permute.xlu0 %460  ;;  %1561 = vperm.xlu1 %3532, %v1503_v33   ;;  %3462 = vmatprep.subr.msk.bf16.mxu1 %vm4041_vm2, %v3343_v27  ;;  %v332_v33 = vld [vmem:[#allocation9 + $0x128] sm:$0xff] }
 0x156   :  { %1566 = vperm.xlu0 %3531, %v1504_v34   ;;  %v301_v34 = vld [vmem:[#allocation9 + $0x30] sm:$0xff] }
 0x158   :  { %v4119_v41 = vpop.permute.xlu1 %465 }
 0x159   :  { %v4123_v45 = vpop.permute.xlu0 %470  ;;  %1571 = vperm.xlu1 %3532, %v1505_v39   ;;  %v1523_v39 = vld [vmem:[#allocation13 + $0xd0] sm:$0xff] }
 0x15a   :  { %1576 = vperm.xlu0 %3531, %v1506_v40   ;;  %v1524_v40 = vld [vmem:[#allocation13 + $0xd8] sm:$0xff] }
 0x15b   :  { %3348 = vmatpush3.bf16.xpose.msk.msra.mxu0 %vm4041_vm2, %v3343_v27 }
 0x15c   :  { %3470 = vmatpush3.bf16.xpose.msk.msra.mxu1 %vm4041_vm2, %v3343_v27  ;;  %v4129_v50 = vpop.permute.xlu1 %475  ;;  %3351 = vmatprep.subr.msk.bf16.mxu0 %vm4041_vm2, %v3349_v42  ;;  %v331_v27 = vld [vmem:[#allocation9 + $0x120] sm:$0xff] }
 0x15d   :  { %v4135_v53 = vpop.permute.xlu0 %480  ;;  %1581 = vperm.xlu1 %3532, %v1507_v48   ;;  %3463 = vmatprep.subr.msk.bf16.mxu1 %vm4041_vm2, %v3349_v42  ;;  %v335_v48 = vld [vmem:[#allocation9 + $0x140] sm:$0xff] }
 0x15e   :  { %1586 = vperm.xlu0 %3531, %v1508_v49   ;;  %v1525_v49 = vld [vmem:[#allocation13 + $0xe0] sm:$0xff] }
 0x160   :  { %v4139_v56 = vpop.permute.xlu1 %485 }
 0x161   :  { %v4141_v58 = vpop.permute.xlu0 %490  ;;  %1591 = vperm.xlu1 %3532, %v1509_v54   ;;  %v336_v54 = vld [vmem:[#allocation9 + $0x148] sm:$0xff] }
 0x162   :  { %1596 = vperm.xlu0 %3531, %v1510_v55   ;;  %v305_v55 = vld [vmem:[#allocation9 + $0x50] sm:$0xff] }
 0x163   :  { %3354 = vmatpush3.bf16.xpose.msk.msra.mxu0 %vm4041_vm2, %v3349_v42 }
 0x164   :  { %3471 = vmatpush3.bf16.xpose.msk.msra.mxu1 %vm4041_vm2, %v3349_v42  ;;  %v4147_v61 = vpop.permute.xlu1 %495  ;;  %3357 = vmatprep.subr.msk.bf16.mxu0 %vm4041_vm2, %v3355_v57  ;;  %v302_v42 = vld [vmem:[#allocation9 + $0x38] sm:$0xff] }
 0x165   :  { %v4151_v62 = vpop.permute.xlu0 %500  ;;  %1601 = vperm.xlu1 %3532, %v1511_v59   ;;  %3464 = vmatprep.subr.msk.bf16.mxu1 %vm4041_vm2, %v3355_v57 }
 0x166   :  { %1606 = vperm.xlu0 %3531, %v1512_v60   ;;  %v1527_v60 = vld [vmem:[#allocation13 + $0xf0] sm:$0xff] }
 0x168   :  { %v4155_v1 = vpop.permute.xlu1 %505 }
 0x169   :  { %v4157_v2 = vpop.permute.xlu0 %510  ;;  %1611 = vperm.xlu1 %3532, %v1513_v63  }
 0x16a   :  { %1616 = vperm.xlu0 %3531, %v1514_v0   ;;  %v1528_v0 = vld [vmem:[#allocation13 + $0xf8] sm:$0xff] }
 0x16b   :  { %3360 = vmatpush3.bf16.xpose.msk.msra.mxu0 %vm4041_vm2, %v3355_v57 }
 0x16c   :  { %3472 = vmatpush3.bf16.xpose.msk.msra.mxu1 %vm4041_vm2, %v3355_v57  ;;  %v4163_v5 = vpop.permute.xlu1 %515  ;;  %v337_v57 = vld [vmem:[#allocation9 + $0x150] sm:$0xff] }
 0x16d   :  { %v4165_v6 = vpop.permute.xlu0 %520  ;;  %1621 = vperm.xlu1 %3532, %v1515_v3   ;;  %v306_v3 = vld [vmem:[#allocation9 + $0x58] sm:$0xff] }
 0x16e   :  { %1626 = vperm.xlu0 %3531, %v1516_v4   ;;  %v338_v4 = vld [vmem:[#allocation9 + $0x158] sm:$0xff] }
 0x170   :  { %v4167_v11 = vpop.permute.xlu1 %525 }
 0x171   :  { %v4169_v15 = vpop.permute.xlu0 %530  ;;  %1631 = vperm.xlu1 %3532, %v1517_v7   ;;  %v307_v7 = vld [vmem:[#allocation9 + $0x60] sm:$0xff] }
 0x172   :  { %1636 = vperm.xlu0 %3531, %v1518_v8   ;;  %3218 = vmatmul.mubr.msk.f32.vlgmr.msra.gmra.mrb[0].mxu0 %vm743_vm0, %v296_v9  ;;  %v339_v8 = vld [vmem:[#allocation9 + $0x160] sm:$0xff] }
 0x173   :  { %3266 = vmatmul.mubr.msk.f32.vlgmr.msra.gmra.mrb[0].mxu1 %vm743_vm0, %v328_v12  ;;  %3220 = vmatprep.mubr.msk.f32.mxu0 %vm743_vm0, %v297_v13  ;;  %v1946_v9 = vld [vmem:[#allocation15] sm:$0xff]  ;;  %v1947_v12 = vld [vmem:[#allocation15 + $0x8] sm:$0xff] }
 0x174   :  { %v4174_v20 = vpop.permute.xlu1 %535  ;;  %3268 = vmatprep.mubr.msk.f32.mxu1 %vm743_vm0, %v329_v16  ;;  %v308_v13 = vld [vmem:[#allocation9 + $0x68] sm:$0xff] }
 0x175   :  { %v4177_v24 = vpop.permute.xlu0 %540  ;;  %1641 = vperm.xlu1 %3532, %v1519_v26   ;;  %v340_v26 = vld [vmem:[#allocation9 + $0x168] sm:$0xff] }
 0x176   :  { %1646 = vperm.xlu0 %3531, %v1520_v17   ;;  %3221 = vmatmul.mubr.msk.f32.gmra.mrb[2].mxu0 %vm743_vm0, %v298_v18  ;;  %v309_v17 = vld [vmem:[#allocation9 + $0x70] sm:$0xff] }
 0x177   :  { %3269 = vmatmul.mubr.msk.f32.gmra.mrb[2].mxu1 %vm743_vm0, %v330_v21  ;;  %3223 = vmatprep.mubr.msk.f32.mxu0 %vm743_vm0, %v299_v23  ;;  %v341_v21 = vld [vmem:[#allocation9 + $0x170] sm:$0xff] }
 0x178   :  { %v4182_v32 = vpop.permute.xlu1 %545  ;;  %3271 = vmatprep.mubr.msk.f32.mxu1 %vm743_vm0, %v331_v27  ;;  %v1948_v23 = vld [vmem:[#allocation15 + $0x10] sm:$0xff]  ;;  %v1949_v27 = vld [vmem:[#allocation15 + $0x18] sm:$0xff] }
 0x179   :  { %4715 = vst [vmem:[#allocation29_spill] sm:$0xff] %v4182_v32  ;;  %v4185_v36 = vpop.permute.xlu0 %550  ;;  %1651 = vperm.xlu1 %3532, %v1521_v28   ;;  %v310_v28 = vld [vmem:[#allocation9 + $0x78] sm:$0xff] }
 0x17a   :  { %4716 = vst [vmem:[#allocation30_spill] sm:$0xff] %v4185_v36  ;;  %1656 = vperm.xlu0 %3531, %v1522_v29   ;;  %3224 = vmatmul.mubr.msk.f32.gmra.mrb[4].mxu0 %vm743_vm0, %v300_v31  ;;  %v342_v29 = vld [vmem:[#allocation9 + $0x178] sm:$0xff]  ;;  %v311_v31 = vld [vmem:[#allocation9 + $0x80] sm:$0xff] }
 0x17b   :  { %3272 = vmatmul.mubr.msk.f32.gmra.mrb[4].mxu1 %vm743_vm0, %v332_v33  ;;  %3226 = vmatprep.mubr.msk.f32.mxu0 %vm743_vm0, %v301_v34  ;;  %v343_v33 = vld [vmem:[#allocation9 + $0x180] sm:$0xff]  ;;  %v2992_v32 = vld [vmem:[#allocation3] sm:$0x1] }
 0x17c   :  { %v4190_v43 = vpop.permute.xlu1 %555  ;;  %3274 = vmatprep.mubr.msk.f32.mxu1 %vm743_vm0, %v333_v37  ;;  %v1950_v37 = vld [vmem:[#allocation15 + $0x20] sm:$0xff] }
 0x17d   :  { %4717 = vst [vmem:[#allocation31_spill] sm:$0xff] %v4190_v43  ;;  %v4193_v47 = vpop.permute.xlu0 %560  ;;  %1661 = vperm.xlu1 %3532, %v1523_v39  }
 0x17e   :  { %4718 = vst [vmem:[#allocation32_spill] sm:$0xff] %v4193_v47  ;;  %1666 = vperm.xlu0 %3531, %v1524_v40   ;;  %3227 = vmatmul.mubr.msk.f32.gmra.mrb[6].mxu0 %vm743_vm0, %v302_v42  ;;  %v1951_v40 = vld [vmem:[#allocation15 + $0x28] sm:$0xff]  ;;  %v2296_v47 = vld [vmem:[#allocation18 + $0x70] sm:$0xff] }
 0x17f   :  { %3275 = vmatmul.mubr.msk.f32.gmra.mrb[6].mxu1 %vm743_vm0, %v334_v44  ;;  %3229 = vmatprep.mubr.msk.f32.mxu0 %vm743_vm0, %v303_v46  ;;  %v312_v42 = vld [vmem:[#allocation9 + $0x88] sm:$0xff]  ;;  %v313_v46 = vld [vmem:[#allocation9 + $0x90] sm:$0xff] }
 0x180   :  { %3277 = vmatprep.mubr.msk.f32.mxu1 %vm743_vm0, %v335_v48  ;;  %v4199_v59 = vpop.permute.xlu1 %565  ;;  %v344_v44 = vld [vmem:[#allocation9 + $0x188] sm:$0xff]  ;;  %v345_v48 = vld [vmem:[#allocation9 + $0x190] sm:$0xff] }
 0x181   :  { %1671 = vperm.xlu1 %3532, %v1525_v49   ;;  %4719 = vst [vmem:[#allocation33_spill] sm:$0xff] %v4199_v59  ;;  %v4202_v63 = vpop.permute.xlu0 %570  ;;  %v1952_v49 = vld [vmem:[#allocation15 + $0x30] sm:$0xff] }
 0x182   :  { %1676 = vperm.xlu0 %3531, %v1526_v51   ;;  %3230 = vmatmul.mubr.msk.f32.gmra.mrb[8].mxu0 %vm743_vm0, %v304_v52  ;;  %4720 = vst [vmem:[#allocation34_spill] sm:$0xff] %v4202_v63  ;;  %v1953_v51 = vld [vmem:[#allocation15 + $0x38] sm:$0xff] }
 0x183   :  { %3278 = vmatmul.mubr.msk.f32.gmra.mrb[8].mxu1 %vm743_vm0, %v336_v54  ;;  %3232 = vmatprep.mubr.msk.f32.mxu0 %vm743_vm0, %v305_v55  ;;  %v314_v52 = vld [vmem:[#allocation9 + $0x98] sm:$0xff] }
 0x184   :  { %3280 = vmatprep.mubr.msk.f32.mxu1 %vm743_vm0, %v337_v57  ;;  %v4210_v16 = vpop.permute.xlu1 %575  ;;  %v346_v55 = vld [vmem:[#allocation9 + $0x198] sm:$0xff]  ;;  %v315_v57 = vld [vmem:[#allocation9 + $0xa0] sm:$0xff] }
 0x185   :  { %1681 = vperm.xlu1 %3532, %v1527_v60   ;;  %4721 = vst [vmem:[#allocation35_spill] sm:$0xff] %v4210_v16  ;;  %v4213_v18 = vpop.permute.xlu0 %580 }
 0x186   :  { %1686 = vperm.xlu0 %3531, %v1528_v0   ;;  %3233 = vmatmul.mubr.msk.f32.gmra.mrb[10].mxu0 %vm743_vm0, %v306_v3  ;;  %4722 = vst [vmem:[#allocation36_spill] sm:$0xff] %v4213_v18  ;;  %v347_v0 = vld [vmem:[#allocation9 + $0x1a0] sm:$0xff]  ;;  %v2292_v18 = vld [vmem:[#allocation18 + $0x50] sm:$0xff] }
 0x187   :  { %3281 = vmatmul.mubr.msk.f32.gmra.mrb[10].mxu1 %vm743_vm0, %v338_v4  ;;  %3235 = vmatprep.mubr.msk.f32.mxu0 %vm743_vm0, %v307_v7  ;;  %v1954_v3 = vld [vmem:[#allocation15 + $0x40] sm:$0xff]  ;;  %v1955_v4 = vld [vmem:[#allocation15 + $0x48] sm:$0xff] }
 0x188   :  { %3283 = vmatprep.mubr.msk.f32.mxu1 %vm743_vm0, %v339_v8  ;;  %v4219_v34 = vpop.permute.xlu1 %585  ;;  %v316_v7 = vld [vmem:[#allocation9 + $0xa8] sm:$0xff] }
 0x189   :  { %1980 = vperm.xlu1 %3532, %v1946_v9   ;;  %v4222_v39 = vpop.permute.xlu0 %590  ;;  %v348_v8 = vld [vmem:[#allocation9 + $0x1a8] sm:$0xff]  ;;  %v317_v9 = vld [vmem:[#allocation9 + $0xb0] sm:$0xff] }
 0x18a   :  { %1985 = vperm.xlu0 %3531, %v1947_v12   ;;  %3236 = vmatmul.mubr.msk.f32.gmra.mrb[12].mxu0 %vm743_vm0, %v308_v13  ;;  %v349_v12 = vld [vmem:[#allocation9 + $0x1b0] sm:$0xff] }
 0x18b   :  { %3284 = vmatmul.mubr.msk.f32.gmra.mrb[12].mxu1 %vm743_vm0, %v340_v26  ;;  %3238 = vmatprep.mubr.msk.f32.mxu0 %vm743_vm0, %v309_v17  ;;  %v1956_v26 = vld [vmem:[#allocation15 + $0x50] sm:$0xff] }
 0x18c   :  { %3286 = vmatprep.mubr.msk.f32.mxu1 %vm743_vm0, %v341_v21  ;;  %v4230_v54 = vpop.permute.xlu1 %595  ;;  %v1957_v21 = vld [vmem:[#allocation15 + $0x58] sm:$0xff] }
 0x18d   :  { %1990 = vperm.xlu1 %3532, %v1948_v23   ;;  %v4233_v60 = vpop.permute.xlu0 %600  ;;  %v318_v23 = vld [vmem:[#allocation9 + $0xb8] sm:$0xff] }
 0x18e   :  { %1995 = vperm.xlu0 %3531, %v1949_v27   ;;  %3239 = vmatmul.mubr.msk.f32.gmra.mrb[14].mxu0 %vm743_vm0, %v310_v28  ;;  %v350_v27 = vld [vmem:[#allocation9 + $0x1b8] sm:$0xff]  ;;  %v319_v28 = vld [vmem:[#allocation9 + $0xc0] sm:$0xff] }
 0x18f   :  { %3287 = vmatmul.mubr.msk.f32.gmra.mrb[14].mxu1 %vm743_vm0, %v342_v29  ;;  %3241 = vmatprep.mubr.msk.f32.mxu0 %vm743_vm0, %v311_v31  ;;  %v351_v29 = vld [vmem:[#allocation9 + $0x1c0] sm:$0xff] }
 0x190   :  { %3289 = vmatprep.mubr.msk.f32.mxu1 %vm743_vm0, %v343_v33  ;;  %v4239_v13 = vpop.permute.xlu1 %605  ;;  %v1958_v31 = vld [vmem:[#allocation15 + $0x60] sm:$0xff]  ;;  %v1959_v33 = vld [vmem:[#allocation15 + $0x68] sm:$0xff] }
 0x191   :  { %2000 = vperm.xlu1 %3532, %v1950_v37   ;;  %v4242_v17 = vpop.permute.xlu0 %610  ;;  %v320_v37 = vld [vmem:[#allocation9 + $0xc8] sm:$0xff] }
 0x192   :  { %2005 = vperm.xlu0 %3531, %v1951_v40   ;;  %3242 = vmatmul.mubr.msk.f32.gmra.mrb[16].mxu0 %vm743_vm0, %v312_v42  ;;  %v352_v42 = vld [vmem:[#allocation9 + $0x1c8] sm:$0xff] }
 0x193   :  { %3290 = vmatmul.mubr.msk.f32.gmra.mrb[16].mxu1 %vm743_vm0, %v344_v44  ;;  %3244 = vmatprep.mubr.msk.f32.mxu0 %vm743_vm0, %v313_v46  ;;  %v321_v44 = vld [vmem:[#allocation9 + $0xd0] sm:$0xff] }
 0x194   :  { %3292 = vmatprep.mubr.msk.f32.mxu1 %vm743_vm0, %v345_v48  ;;  %v4250_v40 = vpop.permute.xlu1 %615  ;;  %v353_v48 = vld [vmem:[#allocation9 + $0x1d0] sm:$0xff] }
 0x195   :  { %2010 = vperm.xlu1 %3532, %v1952_v49   ;;  %v4253_v46 = vpop.permute.xlu0 %620  ;;  %v1960_v49 = vld [vmem:[#allocation15 + $0x70] sm:$0xff] }
 0x196   :  { %2015 = vperm.xlu0 %3531, %v1953_v51   ;;  %3245 = vmatmul.mubr.msk.f32.gmra.mrb[18].mxu0 %vm743_vm0, %v314_v52  ;;  %v1961_v51 = vld [vmem:[#allocation15 + $0x78] sm:$0xff] }
 0x197   :  { %3293 = vmatmul.mubr.msk.f32.gmra.mrb[18].mxu1 %vm743_vm0, %v346_v55  ;;  %3247 = vmatprep.mubr.msk.f32.mxu0 %vm743_vm0, %v315_v57  ;;  %v322_v52 = vld [vmem:[#allocation9 + $0xd8] sm:$0xff]  ;;  %v323_v57 = vld [vmem:[#allocation9 + $0xe0] sm:$0xff] }
 0x198   :  { %3295 = vmatprep.mubr.msk.f32.mxu1 %vm743_vm0, %v347_v0  ;;  %v354_v55 = vld [vmem:[#allocation9 + $0x1d8] sm:$0xff]  ;;  %v355_v0 = vld [vmem:[#allocation9 + $0x1e0] sm:$0xff] }
 0x199   :  { %2020 = vperm.xlu1 %3532, %v1954_v3   ;;  %v4259_v3 = vpop.permute.xlu1 %625 }
 0x19a   :  { %2025 = vperm.xlu0 %3531, %v1955_v4   ;;  %3248 = vmatmul.mubr.msk.f32.gmra.mrb[20].mxu0 %vm743_vm0, %v316_v7  ;;  %v1962_v4 = vld [vmem:[#allocation15 + $0x80] sm:$0xff]  ;;  %v4262_v7 = vpop.permute.xlu0 %630 }
 0x19b   :  { %3296 = vmatmul.mubr.msk.f32.gmra.mrb[20].mxu1 %vm743_vm0, %v348_v8  ;;  %3250 = vmatprep.mubr.msk.f32.mxu0 %vm743_vm0, %v317_v9  ;;  %v1963_v8 = vld [vmem:[#allocation15 + $0x88] sm:$0xff] }
 0x19c   :  { %3298 = vmatprep.mubr.msk.f32.mxu1 %vm743_vm0, %v349_v12  ;;  %v324_v9 = vld [vmem:[#allocation9 + $0xe8] sm:$0xff] }
 0x19d   :  { %2030 = vperm.xlu1 %3532, %v1956_v26   ;;  %v356_v12 = vld [vmem:[#allocation9 + $0x1e8] sm:$0xff]  ;;  %v325_v26 = vld [vmem:[#allocation9 + $0xf0] sm:$0xff] }
 0x19e   :  { %2035 = vperm.xlu0 %3531, %v1957_v21   ;;  %3251 = vmatmul.mubr.msk.f32.gmra.mrb[22].mxu0 %vm743_vm0, %v318_v23  ;;  %v357_v21 = vld [vmem:[#allocation9 + $0x1f0] sm:$0xff] }
 0x19f   :  { %3299 = vmatmul.mubr.msk.f32.gmra.mrb[22].mxu1 %vm743_vm0, %v350_v27  ;;  %3253 = vmatprep.mubr.msk.f32.mxu0 %vm743_vm0, %v319_v28  ;;  %v1964_v23 = vld [vmem:[#allocation15 + $0x90] sm:$0xff]  ;;  %v1965_v27 = vld [vmem:[#allocation15 + $0x98] sm:$0xff] }
 0x1a0   :  { %3301 = vmatprep.mubr.msk.f32.mxu1 %vm743_vm0, %v351_v29  ;;  %v326_v28 = vld [vmem:[#allocation9 + $0xf8] sm:$0xff]  ;;  %v4270_v29 = vpop.permute.xlu1 %635 }
 0x1a1   :  { %2040 = vperm.xlu1 %3532, %v1958_v31   ;;  %v358_v31 = vld [vmem:[#allocation9 + $0x1f8] sm:$0xff] }
 0x1a2   :  { %2045 = vperm.xlu0 %3531, %v1959_v33   ;;  %3254 = vmatmul.mubr.msk.f32.gmra.mrb[24].mxu0 %vm743_vm0, %v320_v37  ;;  %v4273_v33 = vpop.permute.xlu0 %640  ;;  %v1966_v37 = vld [vmem:[#allocation15 + $0xa0] sm:$0xff] }
 0x1a3   :  { %3302 = vmatmul.mubr.msk.f32.gmra.mrb[24].mxu1 %vm743_vm0, %v352_v42  ;;  %3256 = vmatprep.mubr.msk.f32.mxu0 %vm743_vm0, %v321_v44  ;;  %v1967_v42 = vld [vmem:[#allocation15 + $0xa8] sm:$0xff] }
 0x1a4   :  { %3304 = vmatprep.mubr.msk.f32.mxu1 %vm743_vm0, %v353_v48  ;;  %v4277_v44 = vpop.permute.xlu1 %645  ;;  %v1968_v48 = vld [vmem:[#allocation15 + $0xb0] sm:$0xff] }
 0x1a5   :  { %2050 = vperm.xlu1 %3532, %v1960_v49  }
 0x1a6   :  { %2055 = vperm.xlu0 %3531, %v1961_v51   ;;  %3257 = vmatmul.mubr.msk.f32.gmra.mrb[26].mxu0 %vm743_vm0, %v322_v52  ;;  %v4279_v49 = vpop.permute.xlu0 %650  ;;  %v1969_v51 = vld [vmem:[#allocation15 + $0xb8] sm:$0xff]  ;;  %v1970_v52 = vld [vmem:[#allocation15 + $0xc0] sm:$0xff] }
 0x1a7   :  { %3305 = vmatmul.mubr.msk.f32.gmra.mrb[26].mxu1 %vm743_vm0, %v354_v55  ;;  %3259 = vmatprep.mubr.msk.f32.mxu0 %vm743_vm0, %v323_v57  ;;  %v1971_v55 = vld [vmem:[#allocation15 + $0xc8] sm:$0xff] }
 0x1a8   :  { %3307 = vmatprep.mubr.msk.f32.mxu1 %vm743_vm0, %v355_v0  ;;  %v4281_v57 = vpop.permute.xlu1 %655 }
 0x1a9   :  { %2060 = vperm.xlu1 %3532, %v1962_v4   ;;  %v1972_v4 = vld [vmem:[#allocation15 + $0xd0] sm:$0xff] }
 0x1aa   :  { %2065 = vperm.xlu0 %3531, %v1963_v8   ;;  %3260 = vmatmul.mubr.msk.f32.gmra.mrb[28].mxu0 %vm743_vm0, %v324_v9  ;;  %v4283_v0 = vpop.permute.xlu0 %660  ;;  %v1973_v8 = vld [vmem:[#allocation15 + $0xd8] sm:$0xff] }
 0x1ab   :  { %3308 = vmatmul.mubr.msk.f32.gmra.mrb[28].mxu1 %vm743_vm0, %v356_v12  ;;  %3262 = vmatprep.mubr.msk.f32.mxu0 %vm743_vm0, %v325_v26  ;;  %v1974_v12 = vld [vmem:[#allocation15 + $0xe0] sm:$0xff] }
 0x1ac   :  { %3310 = vmatprep.mubr.msk.f32.mxu1 %vm743_vm0, %v357_v21  ;;  %v4285_v9 = vpop.permute.xlu1 %665  ;;  %v1975_v21 = vld [vmem:[#allocation15 + $0xe8] sm:$0xff] }
 0x1ad   :  { %2070 = vperm.xlu1 %3532, %v1964_v23   ;;  %v1976_v23 = vld [vmem:[#allocation15 + $0xf0] sm:$0xff] }
 0x1ae   :  { %2075 = vperm.xlu0 %3531, %v1965_v27   ;;  %3263 = vmatmul.mubr.msk.f32.gmra.mrb[30].mxu0 %vm743_vm0, %v326_v28  ;;  %v4287_v26 = vpop.permute.xlu0 %670  ;;  %v1977_v27 = vld [vmem:[#allocation15 + $0xf8] sm:$0xff] }
 0x1af   :  { %3311 = vmatmul.mubr.msk.f32.gmra.mrb[30].mxu1 %vm743_vm0, %v358_v31 }
 0x1b0   :  { %v4289_v28 = vpop.permute.xlu1 %675 }
 0x1b1   :  { %2080 = vperm.xlu1 %3532, %v1966_v37   ;;  %v2207_v37 = vld [vmem:[#allocation2] sm:$0x1] }
 0x1b2   :  { %2085 = vperm.xlu0 %3531, %v1967_v42   ;;  %v4291_v31 = vpop.permute.xlu0 %680  ;;  %v2282_v42 = vld [vmem:[#allocation18] sm:$0xff] }
 0x1b5   :  { %2090 = vperm.xlu1 %3532, %v1968_v48   ;;  %v4293_v48 = vpop.permute.xlu1 %685 }
 0x1b6   :  { %2095 = vperm.xlu0 %3531, %v1969_v51   ;;  %v2283_v51 = vld [vmem:[#allocation18 + $0x8] sm:$0xff] }
 0x1b9   :  { %2100 = vperm.xlu1 %3532, %v1970_v52   ;;  %v4295_v52 = vpop.permute.xlu0 %690 }
 0x1ba   :  { %2105 = vperm.xlu0 %3531, %v1971_v55   ;;  %v2284_v55 = vld [vmem:[#allocation18 + $0x10] sm:$0xff] }
 0x1bd   :  { %2110 = vperm.xlu1 %3532, %v1972_v4   ;;  %v4711_v4 = vmov 0.0|0.0  }
 0x1be   :  { %2115 = vperm.xlu0 %3531, %v1973_v8   ;;  %3361 = vmatprep.subr.bf16.mxu1 %v4711_v4  ;;  %v2285_v8 = vld [vmem:[#allocation18 + $0x18] sm:$0xff] }
 0x1bf   :  { %3409 = vmatprep.subr.bf16.mxu0 %v4711_v4  ;;  %v2291_v4 = vld [vmem:[#allocation18 + $0x48] sm:$0xff] }
 0x1c1   :  { %2120 = vperm.xlu1 %3532, %v1974_v12   ;;  %v2286_v12 = vld [vmem:[#allocation18 + $0x20] sm:$0xff] }
 0x1c2   :  { %2125 = vperm.xlu0 %3531, %v1975_v21   ;;  %v4299_v21 = vpop.permute.xlu1 %695 }
 0x1c3   :  { %4723 = vst [vmem:[#allocation37_spill] sm:$0xff] %v4299_v21 }
 0x1c5   :  { %2130 = vperm.xlu1 %3532, %v1976_v23   ;;  %v4301_v23 = vpop.permute.xlu0 %700 }
 0x1c6   :  { %2135 = vperm.xlu0 %3531, %v1977_v27   ;;  %v2287_v27 = vld [vmem:[#allocation18 + $0x28] sm:$0xff] }
 0x1c9   :  { %2210 = vperm.xlu1 %3532, %v2207_v37   ;;  %v2288_v37 = vld [vmem:[#allocation18 + $0x30] sm:$0xff]  ;;  %v4305_v16 = vpop.permute.xlu0 %710 }
 0x1ca   :  { %2316 = vperm.xlu0 %3531, %v2282_v42   ;;  %v4303_v42 = vpop.permute.xlu1 %705  ;;  %4725 = vst [vmem:[#allocation39_spill] sm:$0xff] %v4305_v16 }
 0x1cb   :  { %4724 = vst [vmem:[#allocation38_spill] sm:$0xff] %v4303_v42 }
 0x1cd   :  { %2321 = vperm.xlu1 %3532, %v2283_v51   ;;  %v2289_v51 = vld [vmem:[#allocation18 + $0x38] sm:$0xff]  ;;  %v4309_v63 = vpop.permute.xlu0 %720 }
 0x1ce   :  { %2326 = vperm.xlu0 %3531, %v2284_v55   ;;  %v2290_v55 = vld [vmem:[#allocation18 + $0x40] sm:$0xff]  ;;  %v4307_v59 = vpop.permute.xlu1 %715  ;;  %4727 = vst [vmem:[#allocation41_spill] sm:$0xff] %v4309_v63 }
 0x1cf   :  { %4726 = vst [vmem:[#allocation40_spill] sm:$0xff] %v4307_v59 }
 0x1d1   :  { %2331 = vperm.xlu1 %3532, %v2285_v8   ;;  %v2293_v8 = vld [vmem:[#allocation18 + $0x58] sm:$0xff]  ;;  %v4313_v43 = vpop.permute.xlu0 %730 }
 0x1d2   :  { %2336 = vperm.xlu0 %3531, %v2286_v12   ;;  %v2294_v12 = vld [vmem:[#allocation18 + $0x60] sm:$0xff]  ;;  %4729 = vst [vmem:[#allocation43_spill] sm:$0xff] %v4313_v43 }
 0x1d3   :  { %v2302_v43 = vld [vmem:[#allocation18 + $0xa0] sm:$0xff] }
 0x1d5   :  { %2341 = vperm.xlu1 %3532, %v2287_v27   ;;  %v4311_v27 = vpop.permute.xlu1 %725  ;;  %v4317_v59 = vpop.permute.xlu0 %740 }
 0x1d6   :  { %2346 = vperm.xlu0 %3531, %v2288_v37   ;;  %4728 = vst [vmem:[#allocation42_spill] sm:$0xff] %v4311_v27  ;;  %v2295_v37 = vld [vmem:[#allocation18 + $0x68] sm:$0xff]  ;;  %4731 = vst [vmem:[#allocation45_spill] sm:$0xff] %v4317_v59 }
 0x1d9   :  { %2351 = vperm.xlu1 %3532, %v2289_v51   ;;  %v2297_v51 = vld [vmem:[#allocation18 + $0x78] sm:$0xff]  ;;  %v4315_v42 = vpop.permute.xlu1 %735  ;;  %v4321_v27 = vpop.permute.xlu0 %1536 }
 0x1da   :  { %2356 = vperm.xlu0 %3531, %v2290_v55   ;;  %v2298_v55 = vld [vmem:[#allocation18 + $0x80] sm:$0xff]  ;;  %4730 = vst [vmem:[#allocation44_spill] sm:$0xff] %v4315_v42  ;;  %4733 = vst [vmem:[#allocation47_spill] sm:$0xff] %v4321_v27  ;;  %v2308_v27 = vld [vmem:[#allocation18 + $0xd0] sm:$0xff] }
 0x1dd   :  { %2361 = vperm.xlu1 %3532, %v2291_v4   ;;  %v2300_v4 = vld [vmem:[#allocation18 + $0x90] sm:$0xff]  ;;  %v4325_v42 = vpop.permute.xlu0 %1546 }
 0x1de   :  { %2366 = vperm.xlu0 %3531, %v2292_v18   ;;  %v2299_v18 = vld [vmem:[#allocation18 + $0x88] sm:$0xff]  ;;  %4735 = vst [vmem:[#allocation49_spill] sm:$0xff] %v4325_v42 }
 0x1df   :  { %v2219_v42 = vld [vmem:[#allocation16 + $0x8] sm:$0xff] }
 0x1e0   :  { %2538 = vmatprep.mubr.f32.mxu0 %v2219_v42  ;;  %v2742_v42 = vld [vmem:[#allocation19 + $0x58] sm:$0xff] }
 0x1e1   :  { %2371 = vperm.xlu1 %3532, %v2293_v8   ;;  %v4319_v8 = vpop.permute.xlu1 %1531 }
 0x1e2   :  { %2376 = vperm.xlu0 %3531, %v2294_v12   ;;  %4732 = vst [vmem:[#allocation46_spill] sm:$0xff] %v4319_v8  ;;  %v2301_v12 = vld [vmem:[#allocation18 + $0x98] sm:$0xff]  ;;  %v4329_v8 = vpop.permute.xlu0 %1556 }
 0x1e3   :  { %4737 = vst [vmem:[#allocation51_spill] sm:$0xff] %v4329_v8  ;;  %v2734_v8 = vld [vmem:[#allocation19 + $0x18] sm:$0xff] }
 0x1e5   :  { %2381 = vperm.xlu1 %3532, %v2295_v37   ;;  %v2304_v37 = vld [vmem:[#allocation18 + $0xb0] sm:$0xff]  ;;  %v4323_v63 = vpop.permute.xlu1 %1541 }
 0x1e6   :  { %2386 = vperm.xlu0 %3531, %v2296_v47   ;;  %v2303_v47 = vld [vmem:[#allocation18 + $0xa8] sm:$0xff]  ;;  %4734 = vst [vmem:[#allocation48_spill] sm:$0xff] %v4323_v63  ;;  %v4333_v63 = vpop.permute.xlu0 %1566 }
 0x1e7   :  { %4739 = vst [vmem:[#allocation53_spill] sm:$0xff] %v4333_v63 }
 0x1e9   :  { %2391 = vperm.xlu1 %3532, %v2297_v51   ;;  %v2305_v51 = vld [vmem:[#allocation18 + $0xb8] sm:$0xff] }
 0x1ea   :  { %2396 = vperm.xlu0 %3531, %v2298_v55   ;;  %v2306_v55 = vld [vmem:[#allocation18 + $0xc0] sm:$0xff] }
 0x1ed   :  { %2401 = vperm.xlu1 %3532, %v2299_v18   ;;  %v4327_v18 = vpop.permute.xlu1 %1551 }
 0x1ee   :  { %2406 = vperm.xlu0 %3531, %v2300_v4   ;;  %4736 = vst [vmem:[#allocation50_spill] sm:$0xff] %v4327_v18  ;;  %v2307_v4 = vld [vmem:[#allocation18 + $0xc8] sm:$0xff]  ;;  %v4337_v18 = vpop.permute.xlu0 %1576 }
 0x1ef   :  { %4741 = vst [vmem:[#allocation55_spill] sm:$0xff] %v4337_v18  ;;  %v2740_v18 = vld [vmem:[#allocation19 + $0x48] sm:$0xff] }
 0x1f1   :  { %2411 = vperm.xlu1 %3532, %v2301_v12   ;;  %v2310_v12 = vld [vmem:[#allocation18 + $0xe0] sm:$0xff]  ;;  %v4331_v59 = vpop.permute.xlu1 %1561 }
 0x1f2   :  { %2416 = vperm.xlu0 %3531, %v2302_v43   ;;  %v2309_v43 = vld [vmem:[#allocation18 + $0xd8] sm:$0xff]  ;;  %4738 = vst [vmem:[#allocation52_spill] sm:$0xff] %v4331_v59  ;;  %v2736_v59 = vld [vmem:[#allocation19 + $0x28] sm:$0xff] }
 0x1f5   :  { %2421 = vperm.xlu1 %3532, %v2303_v47   ;;  %v2731_v47 = vld [vmem:[#allocation19] sm:$0xff] }
 0x1f6   :  { %2426 = vperm.xlu0 %3531, %v2304_v37   ;;  %v2732_v37 = vld [vmem:[#allocation19 + $0x8] sm:$0xff] }
 0x1f9   :  { %2431 = vperm.xlu1 %3532, %v2305_v51   ;;  %v4335_v51 = vpop.permute.xlu1 %1571 }
 0x1fa   :  { %2436 = vperm.xlu0 %3531, %v2306_v55   ;;  %4740 = vst [vmem:[#allocation54_spill] sm:$0xff] %v4335_v51  ;;  %v2733_v55 = vld [vmem:[#allocation19 + $0x10] sm:$0xff] }
 0x1fd   :  { %2441 = vperm.xlu1 %3532, %v2307_v4   ;;  %v1434_v4 = vld [vmem:[#allocation12 + $0x8] sm:$0xff] }
 0x1fe   :  { %2446 = vperm.xlu0 %3531, %v2308_v27   ;;  %v2735_v27 = vld [vmem:[#allocation19 + $0x20] sm:$0xff]  ;;  %1753 = vmatprep.mubr.f32.mxu1 %v1434_v4  ;;  %v2741_v4 = vld [vmem:[#allocation19 + $0x50] sm:$0xff] }
 0x201   :  { %2451 = vperm.xlu1 %3532, %v2309_v43   ;;  %v4339_v43 = vpop.permute.xlu1 %1581 }
 0x202   :  { %2456 = vperm.xlu0 %3531, %v2310_v12   ;;  %4742 = vst [vmem:[#allocation56_spill] sm:$0xff] %v4339_v43  ;;  %v4341_v12 = vpop.permute.xlu0 %1586 }
 0x203   :  { %4743 = vst [vmem:[#allocation57_spill] sm:$0xff] %v4341_v12 }
 0x205   :  { %2765 = vperm.xlu1 %3532, %v2731_v47   ;;  %v2737_v47 = vld [vmem:[#allocation19 + $0x30] sm:$0xff]  ;;  %v4343_v51 = vpop.permute.xlu1 %1591 }
 0x206   :  { %2770 = vperm.xlu0 %3531, %v2732_v37   ;;  %v2738_v37 = vld [vmem:[#allocation19 + $0x38] sm:$0xff]  ;;  %4744 = vst [vmem:[#allocation58_spill] sm:$0xff] %v4343_v51 }
 0x209   :  { %2775 = vperm.xlu1 %3532, %v2733_v55   ;;  %v2739_v55 = vld [vmem:[#allocation19 + $0x40] sm:$0xff]  ;;  %v4347_v63 = vpop.permute.xlu1 %1601 }
 0x20a   :  { %2780 = vperm.xlu0 %3531, %v2734_v8   ;;  %v4345_v8 = vpop.permute.xlu0 %1596  ;;  %4746 = vst [vmem:[#allocation60_spill] sm:$0xff] %v4347_v63 }
 0x20b   :  { %4745 = vst [vmem:[#allocation59_spill] sm:$0xff] %v4345_v8  ;;  %v2746_v8 = vld [vmem:[#allocation19 + $0x78] sm:$0xff] }
 0x20d   :  { %2785 = vperm.xlu1 %3532, %v2735_v27   ;;  %v2744_v27 = vld [vmem:[#allocation19 + $0x68] sm:$0xff] }
 0x20e   :  { %2790 = vperm.xlu0 %3531, %v2736_v59   ;;  %v4349_v43 = vpop.permute.xlu0 %1606  ;;  %v2743_v59 = vld [vmem:[#allocation19 + $0x60] sm:$0xff] }
 0x20f   :  { %4747 = vst [vmem:[#allocation61_spill] sm:$0xff] %v4349_v43 }
 0x211   :  { %2795 = vperm.xlu1 %3532, %v2737_v47   ;;  %v4351_v47 = vpop.permute.xlu1 %1611 }
 0x212   :  { %2800 = vperm.xlu0 %3531, %v2738_v37   ;;  %4748 = vst [vmem:[#allocation62_spill] sm:$0xff] %v4351_v47  ;;  %v2745_v37 = vld [vmem:[#allocation19 + $0x70] sm:$0xff]  ;;  %v4353_v51 = vpop.permute.xlu0 %1616 }
 0x213   :  { %4749 = vst [vmem:[#allocation63_spill] sm:$0xff] %v4353_v51  ;;  %v2752_v51 = vld [vmem:[#allocation19 + $0xa8] sm:$0xff] }
 0x215   :  { %2805 = vperm.xlu1 %3532, %v2739_v55   ;;  %v2748_v55 = vld [vmem:[#allocation19 + $0x88] sm:$0xff]  ;;  %v4355_v12 = vpop.permute.xlu1 %1621 }
 0x216   :  { %2810 = vperm.xlu0 %3531, %v2740_v18   ;;  %v2747_v18 = vld [vmem:[#allocation19 + $0x80] sm:$0xff]  ;;  %4750 = vst [vmem:[#allocation64_spill] sm:$0xff] %v4355_v12  ;;  %v4357_v63 = vpop.permute.xlu0 %1626 }
 0x217   :  { %4751 = vst [vmem:[#allocation65_spill] sm:$0xff] %v4357_v63 }
 0x219   :  { %2815 = vperm.xlu1 %3532, %v2741_v4   ;;  %v2749_v4 = vld [vmem:[#allocation19 + $0x90] sm:$0xff] }
 0x21a   :  { %2820 = vperm.xlu0 %3531, %v2742_v42   ;;  %v2750_v42 = vld [vmem:[#allocation19 + $0x98] sm:$0xff]  ;;  %v4361_v47 = vpop.permute.xlu0 %1636 }
 0x21b   :  { %4753 = vst [vmem:[#allocation67_spill] sm:$0xff] %v4361_v47  ;;  %v2311_v47 = vld [vmem:[#allocation18 + $0xe8] sm:$0xff] }
 0x21d   :  { %2825 = vperm.xlu1 %3532, %v2743_v59   ;;  %v4359_v59 = vpop.permute.xlu1 %1631 }
 0x21e   :  { %2830 = vperm.xlu0 %3531, %v2744_v27   ;;  %4752 = vst [vmem:[#allocation66_spill] sm:$0xff] %v4359_v59  ;;  %v2751_v27 = vld [vmem:[#allocation19 + $0xa0] sm:$0xff]  ;;  %v4365_v12 = vpop.permute.xlu0 %1646 }
 0x21f   :  { %4755 = vst [vmem:[#allocation69_spill] sm:$0xff] %v4365_v12 }
 0x221   :  { %2835 = vperm.xlu1 %3532, %v2745_v37   ;;  %v2754_v37 = vld [vmem:[#allocation19 + $0xb8] sm:$0xff]  ;;  %v4363_v43 = vpop.permute.xlu1 %1641 }
 0x222   :  { %2840 = vperm.xlu0 %3531, %v2746_v8   ;;  %v2753_v8 = vld [vmem:[#allocation19 + $0xb0] sm:$0xff]  ;;  %4754 = vst [vmem:[#allocation68_spill] sm:$0xff] %v4363_v43  ;;  %v4369_v59 = vpop.permute.xlu0 %1656 }
 0x223   :  { %4757 = vst [vmem:[#allocation71_spill] sm:$0xff] %v4369_v59  ;;  %v2761_v59 = vld [vmem:[#allocation19 + $0xf0] sm:$0xff] }
 0x225   :  { %2845 = vperm.xlu1 %3532, %v2747_v18   ;;  %v2755_v18 = vld [vmem:[#allocation19 + $0xc0] sm:$0xff] }
 0x226   :  { %2850 = vperm.xlu0 %3531, %v2748_v55   ;;  %v2756_v55 = vld [vmem:[#allocation19 + $0xc8] sm:$0xff]  ;;  %v4373_v43 = vpop.permute.xlu0 %1666 }
 0x227   :  { %4759 = vst [vmem:[#allocation73_spill] sm:$0xff] %v4373_v43  ;;  %v2762_v43 = vld [vmem:[#allocation19 + $0xf8] sm:$0xff] }
 0x229   :  { %2855 = vperm.xlu1 %3532, %v2749_v4   ;;  %v4367_v4 = vpop.permute.xlu1 %1651 }
 0x22a   :  { %2860 = vperm.xlu0 %3531, %v2750_v42   ;;  %4756 = vst [vmem:[#allocation70_spill] sm:$0xff] %v4367_v4  ;;  %v2757_v42 = vld [vmem:[#allocation19 + $0xd0] sm:$0xff]  ;;  %v4377_v4 = vpop.permute.xlu0 %1676 }
 0x22b   :  { %4761 = vst [vmem:[#allocation75_spill] sm:$0xff] %v4377_v4 }
 0x22d   :  { %2865 = vperm.xlu1 %3532, %v2751_v27   ;;  %v2312_v27 = vld [vmem:[#allocation18 + $0xf0] sm:$0xff]  ;;  %v4371_v63 = vpop.permute.xlu1 %1661 }
 0x22e   :  { %2870 = vperm.xlu0 %3531, %v2752_v51   ;;  %v2758_v51 = vld [vmem:[#allocation19 + $0xd8] sm:$0xff]  ;;  %4758 = vst [vmem:[#allocation72_spill] sm:$0xff] %v4371_v63  ;;  %v4385_v16 = vpop.permute.xlu0 %1686 }
 0x22f   :  { %4763 = vst [vmem:[#allocation77_spill] sm:$0xff] %v4385_v16 }
 0x231   :  { %2875 = vperm.xlu1 %3532, %v2753_v8   ;;  %v2759_v8 = vld [vmem:[#allocation19 + $0xe0] sm:$0xff] }
 0x232   :  { %2880 = vperm.xlu0 %3531, %v2754_v37   ;;  %v2313_v37 = vld [vmem:[#allocation18 + $0xf8] sm:$0xff] }
 0x235   :  { %2885 = vperm.xlu1 %3532, %v2755_v18   ;;  %v4375_v18 = vpop.permute.xlu1 %1671 }
 0x236   :  { %2890 = vperm.xlu0 %3531, %v2756_v55   ;;  %4760 = vst [vmem:[#allocation74_spill] sm:$0xff] %v4375_v18  ;;  %v2760_v55 = vld [vmem:[#allocation19 + $0xe8] sm:$0xff] }
 0x239   :  { %2895 = vperm.xlu1 %3532, %v2757_v42   ;;  %v4382_v18 = vpop.permute.xlu1 %1681 }
 0x23a   :  { %2461 = vperm.xlu0 %3531, %v2311_v47   ;;  %4762 = vst [vmem:[#allocation76_spill] sm:$0xff] %v4382_v18 }
 0x23d   :  { %2900 = vperm.xlu1 %3532, %v2758_v51  }
 0x23e   :  { %2466 = vperm.xlu0 %3531, %v2312_v27  }
 0x241   :  { %2905 = vperm.xlu1 %3532, %v2759_v8  }
 0x242   :  { %2471 = vperm.xlu0 %3531, %v2313_v37  }
 0x245   :  { %v3219_v42 = vpop.f32.mrb[0].mxu0  ;;  %2910 = vperm.xlu1 %3532, %v2760_v55  }
 0x246   :  { %v1056_v47 = vadd.f32 %v3219_v42, %v4083_v10  ;;  %v3267_v12 = vpop.f32.mrb[0].mxu1  ;;  %2915 = vperm.xlu0 %3531, %v2761_v59   ;;  %v1050_v63 = vpop.f32.mrb[1].mxu0 }
 0x247   :  { %v1216_v51 = vadd.f32 %v3267_v12, %v4222_v39  ;;  %v1051_v27 = vadd.f32 %v1050_v63, %v4085_v14  ;;  %v1210_v8 = vpop.f32.mrb[1].mxu1 }
 0x248   :  { %v1370_v37 = vmax.f32 %v1056_v47, 0.0  ;;  %v1211_v4 = vadd.f32 %v1210_v8, %v4219_v34 }
 0x249   :  { %v1402_v55 = vmax.f32 %v1216_v51, 0.0  ;;  %v1369_v36 = vmax.f32 %v1051_v27, 0.0  ;;  %v3222_v10 = vpop.f32.mrb[2].mxu0  ;;  %2920 = vperm.xlu1 %3532, %v2762_v43  }
 0x24a   :  { %v1401_v59 = vmax.f32 %v1211_v4, 0.0  ;;  %v1066_v42 = vadd.f32 %v3222_v10, %v4097_v22  ;;  %v3270_v21 = vpop.f32.mrb[2].mxu1  ;;  %2995 = vperm.xlu0 %3531, %v2992_v32   ;;  %v1060_v39 = vpop.f32.mrb[3].mxu0 }
 0x24b   :  { %v3362_v14 = vpack.c.bf16 %v1370_v37, %v1369_v36  ;;  %v1226_v63 = vadd.f32 %v3270_v21, %v4233_v60  ;;  %v1061_v12 = vadd.f32 %v1060_v39, %v4091_v19  ;;  %v1220_v47 = vpop.f32.mrb[3].mxu1  ;;  %v4764_v36 = vmov 0.0|0.0  }
 0x24c   :  { %v3410_v18 = vpack.c.bf16 %v1402_v55, %v1401_v59  ;;  %v1372_v34 = vmax.f32 %v1066_v42, 0.0  ;;  %v1221_v8 = vadd.f32 %v1220_v47, %v4230_v54 }
 0x24d   :  { %v1404_v51 = vmax.f32 %v1226_v63, 0.0  ;;  %v1371_v27 = vmax.f32 %v1061_v12, 0.0  ;;  %v3225_v16 = vpop.f32.mrb[4].mxu0  ;;  %3363 = vmatpush1.bf16.msra.mxu1 %v3362_v14 }
 0x24e   :  { %v1403_v43 = vmax.f32 %v1221_v8, 0.0  ;;  %v1076_v22 = vadd.f32 %v3225_v16, %v4103_v30  ;;  %v3273_v4 = vpop.f32.mrb[4].mxu1  ;;  %3411 = vmatpush1.bf16.msra.mxu0 %v3410_v18  ;;  %v1070_v32 = vpop.f32.mrb[5].mxu0  ;;  %3364 = vmatprep.subr.bf16.mxu1 %v4764_v36 }
 0x24f   :  { %v3365_v60 = vpack.c.bf16 %v1372_v34, %v1371_v27  ;;  %v1236_v19 = vadd.f32 %v3273_v4, %v4242_v17  ;;  %v1071_v21 = vadd.f32 %v1070_v32, %v4101_v25  ;;  %v1230_v37 = vpop.f32.mrb[5].mxu1  ;;  %3412 = vmatprep.subr.bf16.mxu0 %v4764_v36 }
 0x250   :  { %v3413_v54 = vpack.c.bf16 %v1404_v51, %v1403_v43  ;;  %v1374_v55 = vmax.f32 %v1076_v22, 0.0  ;;  %v1231_v10 = vadd.f32 %v1230_v37, %v4239_v13 }
 0x251   :  { %v1406_v59 = vmax.f32 %v1236_v19, 0.0  ;;  %v1373_v42 = vmax.f32 %v1071_v21, 0.0  ;;  %v3228_v30 = vpop.f32.mrb[6].mxu0  ;;  %3366 = vmatpush1.bf16.msra.mxu1 %v3365_v60 }
 0x252   :  { %v1405_v16 = vmax.f32 %v1231_v10, 0.0  ;;  %v1086_v18 = vadd.f32 %v3228_v30, %v4115_v38  ;;  %v3276_v39 = vpop.f32.mrb[6].mxu1  ;;  %3414 = vmatpush1.bf16.msra.mxu0 %v3413_v54  ;;  %v1080_v14 = vpop.f32.mrb[7].mxu0  ;;  %3367 = vmatprep.subr.bf16.mxu1 %v4764_v36 }
 0x253   :  { %v3368_v25 = vpack.c.bf16 %v1374_v55, %v1373_v42  ;;  %v1246_v17 = vadd.f32 %v3276_v39, %v4253_v46  ;;  %v1081_v63 = vadd.f32 %v1080_v14, %v4109_v35  ;;  %v1240_v12 = vpop.f32.mrb[7].mxu1  ;;  %3415 = vmatprep.subr.bf16.mxu0 %v4764_v36 }
 0x254   :  { %v3416_v13 = vpack.c.bf16 %v1406_v59, %v1405_v16  ;;  %v1376_v47 = vmax.f32 %v1086_v18, 0.0  ;;  %v1241_v34 = vadd.f32 %v1240_v12, %v4250_v40 }
 0x255   :  { %v1408_v8 = vmax.f32 %v1246_v17, 0.0  ;;  %v1375_v51 = vmax.f32 %v1081_v63, 0.0  ;;  %v3231_v38 = vpop.f32.mrb[8].mxu0  ;;  %3369 = vmatpush1.bf16.msra.mxu1 %v3368_v25 }
 0x256   :  { %v1407_v27 = vmax.f32 %v1241_v34, 0.0  ;;  %v1096_v43 = vadd.f32 %v3231_v38, %v4123_v45  ;;  %v3279_v22 = vpop.f32.mrb[8].mxu1  ;;  %3417 = vmatpush1.bf16.msra.mxu0 %v3416_v13  ;;  %v1090_v4 = vpop.f32.mrb[9].mxu0  ;;  %3370 = vmatprep.subr.bf16.mxu1 %v4764_v36 }
 0x257   :  { %v3371_v35 = vpack.c.bf16 %v1376_v47, %v1375_v51  ;;  %v1256_v46 = vadd.f32 %v3279_v22, %v4262_v7  ;;  %v1091_v32 = vadd.f32 %v1090_v4, %v4119_v41  ;;  %v1250_v60 = vpop.f32.mrb[9].mxu1  ;;  %3418 = vmatprep.subr.bf16.mxu0 %v4764_v36 }
 0x258   :  { %v3419_v40 = vpack.c.bf16 %v1408_v8, %v1407_v27  ;;  %v1378_v19 = vmax.f32 %v1096_v43, 0.0  ;;  %v1251_v21 = vadd.f32 %v1250_v60, %v4259_v3 }
 0x259   :  { %v1410_v37 = vmax.f32 %v1256_v46, 0.0  ;;  %v1377_v54 = vmax.f32 %v1091_v32, 0.0  ;;  %v3234_v45 = vpop.f32.mrb[10].mxu0  ;;  %3372 = vmatpush1.bf16.msra.mxu1 %v3371_v35 }
 0x25a   :  { %v1409_v55 = vmax.f32 %v1251_v21, 0.0  ;;  %v1106_v10 = vadd.f32 %v3234_v45, %v4135_v53  ;;  %v3282_v59 = vpop.f32.mrb[10].mxu1  ;;  %3420 = vmatpush1.bf16.msra.mxu0 %v3419_v40  ;;  %v1100_v42 = vpop.f32.mrb[11].mxu0  ;;  %3373 = vmatprep.subr.bf16.mxu1 %v4764_v36 }
 0x25b   :  { %v3374_v41 = vpack.c.bf16 %v1378_v19, %v1377_v54  ;;  %v1266_v7 = vadd.f32 %v3282_v59, %v4273_v33  ;;  %v1101_v30 = vadd.f32 %v1100_v42, %v4129_v50  ;;  %v1260_v16 = vpop.f32.mrb[11].mxu1  ;;  %3421 = vmatprep.subr.bf16.mxu0 %v4764_v36 }
 0x25c   :  { %v3422_v3 = vpack.c.bf16 %v1410_v37, %v1409_v55  ;;  %v1380_v18 = vmax.f32 %v1106_v10, 0.0  ;;  %v1261_v39 = vadd.f32 %v1260_v16, %v4270_v29 }
 0x25d   :  { %v1412_v14 = vmax.f32 %v1266_v7, 0.0  ;;  %v1379_v25 = vmax.f32 %v1101_v30, 0.0  ;;  %v3237_v53 = vpop.f32.mrb[12].mxu0  ;;  %3375 = vmatpush1.bf16.msra.mxu1 %v3374_v41 }
 0x25e   :  { %v1411_v17 = vmax.f32 %v1261_v39, 0.0  ;;  %v1116_v63 = vadd.f32 %v3237_v53, %v4141_v58  ;;  %v3285_v12 = vpop.f32.mrb[12].mxu1  ;;  %3423 = vmatpush1.bf16.msra.mxu0 %v3422_v3  ;;  %v1110_v13 = vpop.f32.mrb[13].mxu0  ;;  %3376 = vmatprep.subr.bf16.mxu1 %v4764_v36 }
 0x25f   :  { %v3377_v50 = vpack.c.bf16 %v1380_v18, %v1379_v25  ;;  %v1276_v33 = vadd.f32 %v3285_v12, %v4279_v49  ;;  %v1111_v47 = vadd.f32 %v1110_v13, %v4139_v56  ;;  %v1270_v34 = vpop.f32.mrb[13].mxu1  ;;  %3424 = vmatprep.subr.bf16.mxu0 %v4764_v36 }
 0x260   :  { %v3425_v29 = vpack.c.bf16 %v1412_v14, %v1411_v17  ;;  %v1382_v8 = vmax.f32 %v1116_v63, 0.0  ;;  %v1271_v51 = vadd.f32 %v1270_v34, %v4277_v44 }
 0x261   :  { %v1414_v38 = vmax.f32 %v1276_v33, 0.0  ;;  %v1381_v27 = vmax.f32 %v1111_v47, 0.0  ;;  %v3240_v58 = vpop.f32.mrb[14].mxu0  ;;  %3378 = vmatpush1.bf16.msra.mxu1 %v3377_v50 }
 0x262   :  { %v1413_v43 = vmax.f32 %v1271_v51, 0.0  ;;  %v1126_v22 = vadd.f32 %v3240_v58, %v4151_v62  ;;  %v3288_v4 = vpop.f32.mrb[14].mxu1  ;;  %3426 = vmatpush1.bf16.msra.mxu0 %v3425_v29  ;;  %v1120_v35 = vpop.f32.mrb[15].mxu0  ;;  %3379 = vmatprep.subr.bf16.mxu1 %v4764_v36 }
 0x263   :  { %v3380_v56 = vpack.c.bf16 %v1382_v8, %v1381_v27  ;;  %v1286_v49 = vadd.f32 %v3288_v4, %v4283_v0  ;;  %v1121_v46 = vadd.f32 %v1120_v35, %v4147_v61  ;;  %v1280_v32 = vpop.f32.mrb[15].mxu1  ;;  %3427 = vmatprep.subr.bf16.mxu0 %v4764_v36 }
 0x264   :  { %v3428_v44 = vpack.c.bf16 %v1414_v38, %v1413_v43  ;;  %v1384_v60 = vmax.f32 %v1126_v22, 0.0  ;;  %v1281_v40 = vadd.f32 %v1280_v32, %v4281_v57 }
 0x265   :  { %v1416_v19 = vmax.f32 %v1286_v49, 0.0  ;;  %v1383_v21 = vmax.f32 %v1121_v46, 0.0  ;;  %v3243_v62 = vpop.f32.mrb[16].mxu0  ;;  %3381 = vmatpush1.bf16.msra.mxu1 %v3380_v56  ;;  %v4765_v46 = vld [vmem:[#allocation37_spill] sm:$0xff] }
 0x266   :  { %v1415_v37 = vmax.f32 %v1281_v40, 0.0  ;;  %v1136_v54 = vadd.f32 %v3243_v62, %v4157_v2  ;;  %v3291_v45 = vpop.f32.mrb[16].mxu1  ;;  %3429 = vmatpush1.bf16.msra.mxu0 %v3428_v44  ;;  %v1130_v55 = vpop.f32.mrb[17].mxu0  ;;  %3382 = vmatprep.subr.bf16.mxu1 %v4764_v36 }
 0x267   :  { %v3383_v61 = vpack.c.bf16 %v1384_v60, %v1383_v21  ;;  %v1296_v0 = vadd.f32 %v3291_v45, %v4287_v26  ;;  %v1131_v10 = vadd.f32 %v1130_v55, %v4155_v1  ;;  %v1290_v59 = vpop.f32.mrb[17].mxu1  ;;  %3430 = vmatprep.subr.bf16.mxu0 %v4764_v36  ;;  %v4768_v45 = vld [vmem:[#allocation29_spill] sm:$0xff] }
 0x268   :  { %v3431_v57 = vpack.c.bf16 %v1416_v19, %v1415_v37  ;;  %v1386_v42 = vmax.f32 %v1136_v54, 0.0  ;;  %v1291_v41 = vadd.f32 %v1290_v59, %v4285_v9  ;;  %v4766_v19 = vld [vmem:[#allocation30_spill] sm:$0xff] }
 0x269   :  { %v1418_v7 = vmax.f32 %v1296_v0, 0.0  ;;  %v1385_v30 = vmax.f32 %v1131_v10, 0.0  ;;  %v3246_v2 = vpop.f32.mrb[18].mxu0  ;;  %3384 = vmatpush1.bf16.msra.mxu1 %v3383_v61  ;;  %v4769_v59 = vld [vmem:[#allocation38_spill] sm:$0xff] }
 0x26a   :  { %v1417_v16 = vmax.f32 %v1291_v41, 0.0  ;;  %v1146_v3 = vadd.f32 %v3246_v2, %v4165_v6  ;;  %v3294_v18 = vpop.f32.mrb[18].mxu1  ;;  %3432 = vmatpush1.bf16.msra.mxu0 %v3431_v57  ;;  %v1140_v39 = vpop.f32.mrb[19].mxu0  ;;  %3385 = vmatprep.subr.bf16.mxu1 %v4764_v36  ;;  %v4770_v2 = vld [vmem:[#allocation32_spill] sm:$0xff] }
 0x26b   :  { %v3386_v1 = vpack.c.bf16 %v1386_v42, %v1385_v30  ;;  %v1306_v26 = vadd.f32 %v3294_v18, %v4291_v31  ;;  %v1141_v14 = vadd.f32 %v1140_v39, %v4163_v5  ;;  %v1300_v25 = vpop.f32.mrb[19].mxu1  ;;  %3433 = vmatprep.subr.bf16.mxu0 %v4764_v36 }
 0x26c   :  { %v3434_v9 = vpack.c.bf16 %v1418_v7, %v1417_v16  ;;  %v1388_v53 = vmax.f32 %v1146_v3, 0.0  ;;  %v1301_v17 = vadd.f32 %v1300_v25, %v4289_v28 }
 0x26d   :  { %v1420_v63 = vmax.f32 %v1306_v26, 0.0  ;;  %v1387_v12 = vmax.f32 %v1141_v14, 0.0  ;;  %v3249_v6 = vpop.f32.mrb[20].mxu0  ;;  %3387 = vmatpush1.bf16.msra.mxu1 %v3386_v1  ;;  %v4771_v1 = vld [vmem:[#allocation41_spill] sm:$0xff]  ;;  %v4772_v14 = vld [vmem:[#allocation31_spill] sm:$0xff] }
 0x26e   :  { %v1419_v13 = vmax.f32 %v1301_v17, 0.0  ;;  %v1156_v50 = vadd.f32 %v3249_v6, %v4169_v15  ;;  %v3297_v33 = vpop.f32.mrb[20].mxu1  ;;  %3435 = vmatpush1.bf16.msra.mxu0 %v3434_v9  ;;  %v1150_v47 = vpop.f32.mrb[21].mxu0  ;;  %3388 = vmatprep.subr.bf16.mxu1 %v4764_v36 }
 0x26f   :  { %v3389_v5 = vpack.c.bf16 %v1388_v53, %v1387_v12  ;;  %v1316_v31 = vadd.f32 %v3297_v33, %v4295_v52  ;;  %v1151_v34 = vadd.f32 %v1150_v47, %v4167_v11  ;;  %v1310_v29 = vpop.f32.mrb[21].mxu1  ;;  %3436 = vmatprep.subr.bf16.mxu0 %v4764_v36  ;;  %v4774_v47 = vld [vmem:[#allocation34_spill] sm:$0xff] }
 0x270   :  { %v3437_v28 = vpack.c.bf16 %v1420_v63, %v1419_v13  ;;  %v1390_v8 = vmax.f32 %v1156_v50, 0.0  ;;  %v1311_v51 = vadd.f32 %v1310_v29, %v4293_v48  ;;  %v4773_v63 = vld [vmem:[#allocation40_spill] sm:$0xff] }
 0x271   :  { %v1422_v38 = vmax.f32 %v1316_v31, 0.0  ;;  %v1389_v27 = vmax.f32 %v1151_v34, 0.0  ;;  %v3252_v15 = vpop.f32.mrb[22].mxu0  ;;  %3390 = vmatpush1.bf16.msra.mxu1 %v3389_v5 }
 0x272   :  { %v1421_v58 = vmax.f32 %v1311_v51, 0.0  ;;  %v1166_v43 = vadd.f32 %v3252_v15, %v4177_v24  ;;  %v3300_v22 = vpop.f32.mrb[22].mxu1  ;;  %3438 = vmatpush1.bf16.msra.mxu0 %v3437_v28  ;;  %v1160_v4 = vpop.f32.mrb[23].mxu0  ;;  %3391 = vmatprep.subr.bf16.mxu1 %v4764_v36  ;;  %v4775_v28 = vld [vmem:[#allocation43_spill] sm:$0xff]  ;;  %v4776_v51 = vld [vmem:[#allocation33_spill] sm:$0xff] }
 0x273   :  { %v3392_v11 = vpack.c.bf16 %v1390_v8, %v1389_v27  ;;  %v1326_v52 = vadd.f32 %v3300_v22, %v4301_v23  ;;  %v1161_v35 = vadd.f32 %v1160_v4, %v4174_v20  ;;  %v1320_v56 = vpop.f32.mrb[23].mxu1  ;;  %3439 = vmatprep.subr.bf16.mxu0 %v4764_v36  ;;  %v4767_v23 = vld [vmem:[#allocation39_spill] sm:$0xff] }
 0x274   :  { %v3440_v48 = vpack.c.bf16 %v1422_v38, %v1421_v58  ;;  %v1392_v49 = vmax.f32 %v1166_v43, 0.0  ;;  %v1321_v32 = vadd.f32 %v1320_v56, %v4765_v46  ;;  %v4777_v43 = vld [vmem:[#allocation42_spill] sm:$0xff]  ;;  %v4778_v56 = vld [vmem:[#allocation36_spill] sm:$0xff] }
 0x275   :  { %v1424_v44 = vmax.f32 %v1326_v52, 0.0  ;;  %v1391_v60 = vmax.f32 %v1161_v35, 0.0  ;;  %v3255_v24 = vpop.f32.mrb[24].mxu0  ;;  %3393 = vmatpush1.bf16.msra.mxu1 %v3392_v11 }
 0x276   :  { %v1423_v40 = vmax.f32 %v1321_v32, 0.0  ;;  %v1176_v21 = vadd.f32 %v3255_v24, %v4766_v19  ;;  %v3303_v62 = vpop.f32.mrb[24].mxu1  ;;  %3441 = vmatpush1.bf16.msra.mxu0 %v3440_v48  ;;  %v1170_v37 = vpop.f32.mrb[25].mxu0  ;;  %3394 = vmatprep.subr.bf16.mxu1 %v4764_v36  ;;  %v4780_v24 = vld [vmem:[#allocation35_spill] sm:$0xff] }
 0x277   :  { %v3395_v20 = vpack.c.bf16 %v1392_v49, %v1391_v60  ;;  %v1336_v54 = vadd.f32 %v3303_v62, %v4767_v23  ;;  %v1171_v55 = vadd.f32 %v1170_v37, %v4768_v45  ;;  %v1330_v61 = vpop.f32.mrb[25].mxu1  ;;  %3442 = vmatprep.subr.bf16.mxu0 %v4764_v36  ;;  %v4781_v37 = vld [vmem:[#allocation44_spill] sm:$0xff] }
 0x278   :  { %v3443_v0 = vpack.c.bf16 %v1424_v44, %v1423_v40  ;;  %v1394_v10 = vmax.f32 %v1176_v21, 0.0  ;;  %v1331_v57 = vadd.f32 %v1330_v61, %v4769_v59  ;;  %v4779_v44 = vld [vmem:[#allocation45_spill] sm:$0xff]  ;;  %v1436_v59 = vld [vmem:[#allocation12 + $0x18] sm:$0xff] }
 0x279   :  { %v1426_v42 = vmax.f32 %v1336_v54, 0.0  ;;  %v1393_v41 = vmax.f32 %v1171_v55, 0.0  ;;  %v3258_v7 = vpop.f32.mrb[26].mxu0  ;;  %3396 = vmatpush1.bf16.msra.mxu1 %v3395_v20 }
 0x27a   :  { %v1425_v30 = vmax.f32 %v1331_v57, 0.0  ;;  %v1186_v16 = vadd.f32 %v3258_v7, %v4770_v2  ;;  %v3306_v3 = vpop.f32.mrb[26].mxu1  ;;  %3444 = vmatpush1.bf16.msra.mxu0 %v3443_v0  ;;  %v1180_v18 = vpop.f32.mrb[27].mxu0  ;;  %3397 = vmatprep.subr.bf16.mxu1 %v4764_v36  ;;  %v1433_v0 = vld [vmem:[#allocation12] sm:$0xff]  ;;  %v2221_v57 = vld [vmem:[#allocation16 + $0x18] sm:$0xff]  ;;  %v1438_v7 = vld [vmem:[#allocation12 + $0x28] sm:$0xff] }
 0x27b   :  { %v3398_v39 = vpack.c.bf16 %v1394_v10, %v1393_v41  ;;  %v1346_v26 = vadd.f32 %v3306_v3, %v4771_v1  ;;  %v1181_v25 = vadd.f32 %v1180_v18, %v4772_v14  ;;  %v1340_v9 = vpop.f32.mrb[27].mxu1  ;;  %3445 = vmatprep.subr.bf16.mxu0 %v4764_v36  ;;  %v2218_v10 = vld [vmem:[#allocation16] sm:$0xff]  ;;  %v2220_v41 = vld [vmem:[#allocation16 + $0x10] sm:$0xff]  ;;  %v2225_v3 = vld [vmem:[#allocation16 + $0x38] sm:$0xff] }
 0x27c   :  { %v3446_v53 = vpack.c.bf16 %v1426_v42, %v1425_v30  ;;  %v1396_v17 = vmax.f32 %v1186_v16, 0.0  ;;  %v1341_v12 = vadd.f32 %v1340_v9, %v4773_v63  ;;  %v1435_v42 = vld [vmem:[#allocation12 + $0x10] sm:$0xff]  ;;  %v2223_v30 = vld [vmem:[#allocation16 + $0x28] sm:$0xff]  ;;  %v1437_v2 = vld [vmem:[#allocation12 + $0x20] sm:$0xff] }
 0x27d   :  { %v1428_v6 = vmax.f32 %v1346_v26, 0.0  ;;  %v1395_v13 = vmax.f32 %v1181_v25, 0.0  ;;  %v3261_v50 = vpop.f32.mrb[28].mxu0  ;;  %3399 = vmatpush1.bf16.msra.mxu1 %v3398_v39  ;;  %v1440_v16 = vld [vmem:[#allocation12 + $0x38] sm:$0xff]  ;;  %v1439_v18 = vld [vmem:[#allocation12 + $0x30] sm:$0xff]  ;;  %v1442_v1 = vld [vmem:[#allocation12 + $0x48] sm:$0xff] }
 0x27e   :  { %v1427_v33 = vmax.f32 %v1341_v12, 0.0  ;;  %v1196_v5 = vadd.f32 %v3261_v50, %v4774_v47  ;;  %v3309_v31 = vpop.f32.mrb[28].mxu1  ;;  %3447 = vmatpush1.bf16.msra.mxu0 %v3446_v53  ;;  %v1190_v34 = vpop.f32.mrb[29].mxu0  ;;  %3400 = vmatprep.subr.bf16.mxu1 %v4764_v36  ;;  %v2224_v39 = vld [vmem:[#allocation16 + $0x30] sm:$0xff]  ;;  %v2227_v26 = vld [vmem:[#allocation16 + $0x48] sm:$0xff]  ;;  %v1441_v14 = vld [vmem:[#allocation12 + $0x40] sm:$0xff] }
 0x27f   :  { %v3401_v29 = vpack.c.bf16 %v1396_v17, %v1395_v13  ;;  %v1356_v8 = vadd.f32 %v3309_v31, %v4775_v28  ;;  %v1191_v38 = vadd.f32 %v1190_v34, %v4776_v51  ;;  %v1350_v27 = vpop.f32.mrb[29].mxu1  ;;  %3448 = vmatprep.subr.bf16.mxu0 %v4764_v36  ;;  %v2226_v25 = vld [vmem:[#allocation16 + $0x40] sm:$0xff]  ;;  %v1444_v9 = vld [vmem:[#allocation12 + $0x58] sm:$0xff]  ;;  %v1443_v17 = vld [vmem:[#allocation12 + $0x50] sm:$0xff] }
 0x280   :  { %v3449_v15 = vpack.c.bf16 %v1428_v6, %v1427_v33  ;;  %v1398_v58 = vmax.f32 %v1196_v5, 0.0  ;;  %v1351_v22 = vadd.f32 %v1350_v27, %v4777_v43  ;;  %v2229_v53 = vld [vmem:[#allocation16 + $0x58] sm:$0xff]  ;;  %v2228_v63 = vld [vmem:[#allocation16 + $0x50] sm:$0xff]  ;;  %v1446_v12 = vld [vmem:[#allocation12 + $0x68] sm:$0xff] }
 0x281   :  { %v1430_v4 = vmax.f32 %v1356_v8, 0.0  ;;  %v1397_v11 = vmax.f32 %v1191_v38, 0.0  ;;  %v3264_v52 = vpop.f32.mrb[30].mxu0  ;;  %3402 = vmatpush1.bf16.msra.mxu1 %v3401_v29  ;;  %v2231_v6 = vld [vmem:[#allocation16 + $0x68] sm:$0xff]  ;;  %v1445_v13 = vld [vmem:[#allocation12 + $0x60] sm:$0xff]  ;;  %v1448_v33 = vld [vmem:[#allocation12 + $0x78] sm:$0xff]  ;;  %v4477_v38 = vpop.permute.xlu1 %1980 }
 0x282   :  { %v1429_v35 = vmax.f32 %v1351_v22, 0.0  ;;  %v1206_v48 = vadd.f32 %v3264_v52, %v4778_v56  ;;  %v3312_v49 = vpop.f32.mrb[30].mxu1  ;;  %3450 = vmatpush1.bf16.msra.mxu0 %v3449_v15  ;;  %v1200_v46 = vpop.f32.mrb[31].mxu0  ;;  %3403 = vmatprep.subr.bf16.mxu1 %v4764_v36  ;;  %v2230_v50 = vld [vmem:[#allocation16 + $0x60] sm:$0xff]  ;;  %v2233_v47 = vld [vmem:[#allocation16 + $0x78] sm:$0xff]  ;;  %v1447_v5 = vld [vmem:[#allocation12 + $0x70] sm:$0xff] }
 0x283   :  { %v3404_v32 = vpack.c.bf16 %v1398_v58, %v1397_v11  ;;  %v1366_v60 = vadd.f32 %v3312_v49, %v4779_v44  ;;  %v1201_v40 = vadd.f32 %v1200_v46, %v4780_v24  ;;  %v1360_v19 = vpop.f32.mrb[31].mxu1  ;;  %3451 = vmatprep.subr.bf16.mxu0 %v4764_v36  ;;  %v2232_v31 = vld [vmem:[#allocation16 + $0x70] sm:$0xff]  ;;  %v1450_v34 = vld [vmem:[#allocation12 + $0x88] sm:$0xff]  ;;  %v1449_v28 = vld [vmem:[#allocation12 + $0x80] sm:$0xff]  ;;  %v4479_v15 = vpop.permute.xlu0 %1985 }
 0x284   :  { %v3452_v21 = vpack.c.bf16 %v1430_v4, %v1429_v35  ;;  %v1400_v62 = vmax.f32 %v1206_v48, 0.0  ;;  %v1361_v20 = vadd.f32 %v1360_v19, %v4781_v37  ;;  %v2235_v29 = vld [vmem:[#allocation16 + $0x88] sm:$0xff]  ;;  %v2234_v8 = vld [vmem:[#allocation16 + $0x80] sm:$0xff]  ;;  %v1452_v51 = vld [vmem:[#allocation12 + $0x98] sm:$0xff] }
 0x285   :  { %v1432_v23 = vmax.f32 %v1366_v60, 0.0  ;;  %v1399_v54 = vmax.f32 %v1201_v40, 0.0  ;;  %3405 = vmatpush1.bf16.msra.mxu1 %v3404_v32  ;;  %v2237_v27 = vld [vmem:[#allocation16 + $0x98] sm:$0xff]  ;;  %v1451_v58 = vld [vmem:[#allocation12 + $0x90] sm:$0xff]  ;;  %v1454_v22 = vld [vmem:[#allocation12 + $0xa8] sm:$0xff]  ;;  %v4481_v11 = vpop.permute.xlu1 %1990 }
 0x286   :  { %v1431_v45 = vmax.f32 %v1361_v20, 0.0  ;;  %3453 = vmatpush1.bf16.msra.mxu0 %v3452_v21  ;;  %3406 = vmatprep.subr.bf16.mxu1 %v4764_v36  ;;  %v2236_v43 = vld [vmem:[#allocation16 + $0x90] sm:$0xff]  ;;  %v2239_v4 = vld [vmem:[#allocation16 + $0xa8] sm:$0xff]  ;;  %v1453_v52 = vld [vmem:[#allocation12 + $0xa0] sm:$0xff] }
 0x287   :  { %v3407_v55 = vpack.c.bf16 %v1400_v62, %v1399_v54  ;;  %3454 = vmatprep.subr.bf16.mxu0 %v4764_v36  ;;  %v2222_v36 = vld [vmem:[#allocation16 + $0x20] sm:$0xff]  ;;  %v1456_v56 = vld [vmem:[#allocation12 + $0xb8] sm:$0xff]  ;;  %v4483_v48 = vpop.permute.xlu0 %1995  ;;  %v1455_v46 = vld [vmem:[#allocation12 + $0xb0] sm:$0xff] }
 0x288   :  { %v3455_v61 = vpack.c.bf16 %v1432_v23, %v1431_v45  ;;  %v2238_v35 = vld [vmem:[#allocation16 + $0xa0] sm:$0xff]  ;;  %v2241_v49 = vld [vmem:[#allocation16 + $0xb8] sm:$0xff]  ;;  %v2240_v32 = vld [vmem:[#allocation16 + $0xb0] sm:$0xff] }
 0x289   :  { %3408 = vmatpush1.bf16.msra.mxu1 %v3407_v55  ;;  %v1458_v44 = vld [vmem:[#allocation12 + $0xc8] sm:$0xff]  ;;  %v4485_v60 = vpop.permute.xlu1 %2000  ;;  %v1457_v19 = vld [vmem:[#allocation12 + $0xc0] sm:$0xff]  ;;  %v1460_v62 = vld [vmem:[#allocation12 + $0xd8] sm:$0xff] }
 0x28a   :  { %3456 = vmatpush1.bf16.msra.mxu0 %v3455_v61  ;;  %v2243_v24 = vld [vmem:[#allocation16 + $0xc8] sm:$0xff]  ;;  %v2242_v21 = vld [vmem:[#allocation16 + $0xc0] sm:$0xff]  ;;  %v2245_v37 = vld [vmem:[#allocation16 + $0xd8] sm:$0xff] }
 0x28b   :  { %v4487_v40 = vpop.permute.xlu0 %2005  ;;  %v1459_v23 = vld [vmem:[#allocation12 + $0xd0] sm:$0xff]  ;;  %v1462_v45 = vld [vmem:[#allocation12 + $0xe8] sm:$0xff] }
 0x28c   :  { %1754 = vmatmul.mubr.f32.vlgmr.msra.gmra.mrb[32].mxu1 %v1433_v0  ;;  %v2244_v54 = vld [vmem:[#allocation16 + $0xd0] sm:$0xff]  ;;  %v2247_v61 = vld [vmem:[#allocation16 + $0xe8] sm:$0xff]  ;;  %v1461_v0 = vld [vmem:[#allocation12 + $0xe0] sm:$0xff] }
 0x28d   :  { %2539 = vmatmul.mubr.f32.vlgmr.msra.gmra.mrb[32].mxu0 %v2218_v10  ;;  %1758 = vmatprep.mubr.f32.mxu1 %v1436_v59  ;;  %v4489_v20 = vpop.permute.xlu1 %2010  ;;  %v2246_v10 = vld [vmem:[#allocation16 + $0xe0] sm:$0xff]  ;;  %v1464_v59 = vld [vmem:[#allocation12 + $0xf8] sm:$0xff] }
 0x28e   :  { %2543 = vmatprep.mubr.f32.mxu0 %v2221_v57 }
 0x28f   :  { %v4491_v55 = vpop.permute.xlu0 %2015 }
 0x290   :  { %1759 = vmatmul.mubr.f32.gmra.mrb[34].mxu1 %v1435_v42  ;;  %v2249_v42 = vld [vmem:[#allocation16 + $0xf8] sm:$0xff] }
 0x291   :  { %2544 = vmatmul.mubr.f32.gmra.mrb[34].mxu0 %v2220_v41  ;;  %1763 = vmatprep.mubr.f32.mxu1 %v1438_v7  ;;  %v4493_v57 = vpop.permute.xlu1 %2020  ;;  %v1463_v7 = vld [vmem:[#allocation12 + $0xf0] sm:$0xff] }
 0x292   :  { %2548 = vmatprep.mubr.f32.mxu0 %v2223_v30  ;;  %v2248_v30 = vld [vmem:[#allocation16 + $0xf0] sm:$0xff] }
 0x293   :  { %v4495_v41 = vpop.permute.xlu0 %2025 }
 0x294   :  { %1764 = vmatmul.mubr.f32.gmra.mrb[36].mxu1 %v1437_v2  ;;  %v1466_v2 = vld [vmem:[#allocation12 + $0x108] sm:$0xff] }
 0x295   :  { %2549 = vmatmul.mubr.f32.gmra.mrb[36].mxu0 %v2222_v36  ;;  %1768 = vmatprep.mubr.f32.mxu1 %v1440_v16  ;;  %v2251_v36 = vld [vmem:[#allocation16 + $0x108] sm:$0xff]  ;;  %v4497_v16 = vpop.permute.xlu1 %2030 }
 0x296   :  { %2553 = vmatprep.mubr.f32.mxu0 %v2225_v3  ;;  %v1465_v3 = vld [vmem:[#allocation12 + $0x100] sm:$0xff] }
 0x298   :  { %1769 = vmatmul.mubr.f32.gmra.mrb[38].mxu1 %v1439_v18  ;;  %v2250_v18 = vld [vmem:[#allocation16 + $0x100] sm:$0xff] }
 0x299   :  { %2554 = vmatmul.mubr.f32.gmra.mrb[38].mxu0 %v2224_v39  ;;  %1773 = vmatprep.mubr.f32.mxu1 %v1442_v1  ;;  %v1468_v39 = vld [vmem:[#allocation12 + $0x118] sm:$0xff]  ;;  %v4499_v1 = vpop.permute.xlu0 %2035 }
 0x29a   :  { %2558 = vmatprep.mubr.f32.mxu0 %v2227_v26  ;;  %v2253_v26 = vld [vmem:[#allocation16 + $0x118] sm:$0xff] }
 0x29c   :  { %1774 = vmatmul.mubr.f32.gmra.mrb[40].mxu1 %v1441_v14  ;;  %v1467_v14 = vld [vmem:[#allocation12 + $0x110] sm:$0xff] }
 0x29d   :  { %2559 = vmatmul.mubr.f32.gmra.mrb[40].mxu0 %v2226_v25  ;;  %1778 = vmatprep.mubr.f32.mxu1 %v1444_v9  ;;  %v2252_v25 = vld [vmem:[#allocation16 + $0x110] sm:$0xff]  ;;  %v1470_v9 = vld [vmem:[#allocation12 + $0x128] sm:$0xff] }
 0x29e   :  { %2563 = vmatprep.mubr.f32.mxu0 %v2229_v53  ;;  %v4501_v53 = vpop.permute.xlu1 %2040 }
 0x2a0   :  { %1779 = vmatmul.mubr.f32.gmra.mrb[42].mxu1 %v1443_v17  ;;  %v2255_v17 = vld [vmem:[#allocation16 + $0x128] sm:$0xff] }
 0x2a1   :  { %2564 = vmatmul.mubr.f32.gmra.mrb[42].mxu0 %v2228_v63  ;;  %1783 = vmatprep.mubr.f32.mxu1 %v1446_v12  ;;  %v4503_v63 = vpop.permute.xlu0 %2045  ;;  %v1469_v12 = vld [vmem:[#allocation12 + $0x120] sm:$0xff] }
 0x2a2   :  { %2568 = vmatprep.mubr.f32.mxu0 %v2231_v6  ;;  %v2254_v6 = vld [vmem:[#allocation16 + $0x120] sm:$0xff] }
 0x2a4   :  { %1784 = vmatmul.mubr.f32.gmra.mrb[44].mxu1 %v1445_v13  ;;  %v1472_v13 = vld [vmem:[#allocation12 + $0x138] sm:$0xff] }
 0x2a5   :  { %2569 = vmatmul.mubr.f32.gmra.mrb[44].mxu0 %v2230_v50  ;;  %1788 = vmatprep.mubr.f32.mxu1 %v1448_v33  ;;  %v2257_v50 = vld [vmem:[#allocation16 + $0x138] sm:$0xff]  ;;  %v4505_v33 = vpop.permute.xlu1 %2050 }
 0x2a6   :  { %2573 = vmatprep.mubr.f32.mxu0 %v2233_v47  ;;  %v1471_v47 = vld [vmem:[#allocation12 + $0x130] sm:$0xff] }
 0x2a8   :  { %1789 = vmatmul.mubr.f32.gmra.mrb[46].mxu1 %v1447_v5  ;;  %v2256_v5 = vld [vmem:[#allocation16 + $0x130] sm:$0xff] }
 0x2a9   :  { %2574 = vmatmul.mubr.f32.gmra.mrb[46].mxu0 %v2232_v31  ;;  %1793 = vmatprep.mubr.f32.mxu1 %v1450_v34  ;;  %v1474_v31 = vld [vmem:[#allocation12 + $0x148] sm:$0xff]  ;;  %v4507_v34 = vpop.permute.xlu0 %2055 }
 0x2aa   :  { %2578 = vmatprep.mubr.f32.mxu0 %v2235_v29  ;;  %v2259_v29 = vld [vmem:[#allocation16 + $0x148] sm:$0xff] }
 0x2ac   :  { %1794 = vmatmul.mubr.f32.gmra.mrb[48].mxu1 %v1449_v28  ;;  %v1473_v28 = vld [vmem:[#allocation12 + $0x140] sm:$0xff] }
 0x2ad   :  { %2579 = vmatmul.mubr.f32.gmra.mrb[48].mxu0 %v2234_v8  ;;  %1798 = vmatprep.mubr.f32.mxu1 %v1452_v51  ;;  %v2258_v8 = vld [vmem:[#allocation16 + $0x140] sm:$0xff]  ;;  %v1476_v51 = vld [vmem:[#allocation12 + $0x158] sm:$0xff] }
 0x2ae   :  { %2583 = vmatprep.mubr.f32.mxu0 %v2237_v27  ;;  %v4509_v27 = vpop.permute.xlu1 %2060 }
 0x2b0   :  { %1799 = vmatmul.mubr.f32.gmra.mrb[50].mxu1 %v1451_v58  ;;  %v2261_v58 = vld [vmem:[#allocation16 + $0x158] sm:$0xff] }
 0x2b1   :  { %2584 = vmatmul.mubr.f32.gmra.mrb[50].mxu0 %v2236_v43  ;;  %1803 = vmatprep.mubr.f32.mxu1 %v1454_v22  ;;  %v4511_v43 = vpop.permute.xlu0 %2065  ;;  %v1475_v22 = vld [vmem:[#allocation12 + $0x150] sm:$0xff] }
 0x2b2   :  { %2588 = vmatprep.mubr.f32.mxu0 %v2239_v4  ;;  %v2260_v4 = vld [vmem:[#allocation16 + $0x150] sm:$0xff] }
 0x2b4   :  { %1804 = vmatmul.mubr.f32.gmra.mrb[52].mxu1 %v1453_v52  ;;  %v1478_v52 = vld [vmem:[#allocation12 + $0x168] sm:$0xff] }
 0x2b5   :  { %2589 = vmatmul.mubr.f32.gmra.mrb[52].mxu0 %v2238_v35  ;;  %1808 = vmatprep.mubr.f32.mxu1 %v1456_v56  ;;  %v2263_v35 = vld [vmem:[#allocation16 + $0x168] sm:$0xff]  ;;  %v4513_v56 = vpop.permute.xlu1 %2070 }
 0x2b6   :  { %2593 = vmatprep.mubr.f32.mxu0 %v2241_v49  ;;  %v1477_v49 = vld [vmem:[#allocation12 + $0x160] sm:$0xff] }
 0x2b8   :  { %1809 = vmatmul.mubr.f32.gmra.mrb[54].mxu1 %v1455_v46  ;;  %v2262_v46 = vld [vmem:[#allocation16 + $0x160] sm:$0xff] }
 0x2b9   :  { %2594 = vmatmul.mubr.f32.gmra.mrb[54].mxu0 %v2240_v32  ;;  %1813 = vmatprep.mubr.f32.mxu1 %v1458_v44  ;;  %v1480_v32 = vld [vmem:[#allocation12 + $0x178] sm:$0xff]  ;;  %v4515_v44 = vpop.permute.xlu0 %2075 }
 0x2ba   :  { %2598 = vmatprep.mubr.f32.mxu0 %v2243_v24  ;;  %v2265_v24 = vld [vmem:[#allocation16 + $0x178] sm:$0xff] }
 0x2bc   :  { %1814 = vmatmul.mubr.f32.gmra.mrb[56].mxu1 %v1457_v19  ;;  %v1479_v19 = vld [vmem:[#allocation12 + $0x170] sm:$0xff] }
 0x2bd   :  { %2599 = vmatmul.mubr.f32.gmra.mrb[56].mxu0 %v2242_v21  ;;  %1818 = vmatprep.mubr.f32.mxu1 %v1460_v62  ;;  %v2264_v21 = vld [vmem:[#allocation16 + $0x170] sm:$0xff]  ;;  %v1482_v62 = vld [vmem:[#allocation12 + $0x188] sm:$0xff] }
 0x2be   :  { %2603 = vmatprep.mubr.f32.mxu0 %v2245_v37  ;;  %v4517_v37 = vpop.permute.xlu1 %2080 }
 0x2bf   :  { %4782 = vst [vmem:[#allocation37_spill] sm:$0xff] %v4517_v37  ;;  %v4806_v37 = vld [vmem:[#allocation49_spill] sm:$0xff] }
 0x2c0   :  { %1819 = vmatmul.mubr.f32.gmra.mrb[58].mxu1 %v1459_v23  ;;  %v2267_v23 = vld [vmem:[#allocation16 + $0x188] sm:$0xff] }
 0x2c1   :  { %2604 = vmatmul.mubr.f32.gmra.mrb[58].mxu0 %v2244_v54  ;;  %1823 = vmatprep.mubr.f32.mxu1 %v1462_v45  ;;  %v4519_v54 = vpop.permute.xlu0 %2085  ;;  %v1481_v45 = vld [vmem:[#allocation12 + $0x180] sm:$0xff] }
 0x2c2   :  { %2608 = vmatprep.mubr.f32.mxu0 %v2247_v61  ;;  %4783 = vst [vmem:[#allocation30_spill] sm:$0xff] %v4519_v54  ;;  %v2266_v61 = vld [vmem:[#allocation16 + $0x180] sm:$0xff] }
 0x2c4   :  { %1824 = vmatmul.mubr.f32.gmra.mrb[60].mxu1 %v1461_v0  ;;  %v1484_v0 = vld [vmem:[#allocation12 + $0x198] sm:$0xff] }
 0x2c5   :  { %2609 = vmatmul.mubr.f32.gmra.mrb[60].mxu0 %v2246_v10  ;;  %1828 = vmatprep.mubr.f32.mxu1 %v1464_v59  ;;  %v2269_v10 = vld [vmem:[#allocation16 + $0x198] sm:$0xff]  ;;  %v4521_v59 = vpop.permute.xlu1 %2090 }
 0x2c6   :  { %2613 = vmatprep.mubr.f32.mxu0 %v2249_v42  ;;  %4784 = vst [vmem:[#allocation39_spill] sm:$0xff] %v4521_v59  ;;  %v1483_v42 = vld [vmem:[#allocation12 + $0x190] sm:$0xff] }
 0x2c8   :  { %1829 = vmatmul.mubr.f32.gmra.mrb[62].mxu1 %v1463_v7  ;;  %v2268_v7 = vld [vmem:[#allocation16 + $0x190] sm:$0xff] }
 0x2c9   :  { %2614 = vmatmul.mubr.f32.gmra.mrb[62].mxu0 %v2248_v30  ;;  %1833 = vmatprep.mubr.f32.mxu1 %v1466_v2  ;;  %v1486_v30 = vld [vmem:[#allocation12 + $0x1a8] sm:$0xff]  ;;  %v4523_v2 = vpop.permute.xlu0 %2095 }
 0x2ca   :  { %2618 = vmatprep.mubr.f32.mxu0 %v2251_v36  ;;  %4785 = vst [vmem:[#allocation29_spill] sm:$0xff] %v4523_v2  ;;  %v2271_v36 = vld [vmem:[#allocation16 + $0x1a8] sm:$0xff] }
 0x2cc   :  { %1834 = vmatmul.mubr.f32.gmra.mrb[64].mxu1 %v1465_v3  ;;  %v1485_v3 = vld [vmem:[#allocation12 + $0x1a0] sm:$0xff] }
 0x2cd   :  { %2619 = vmatmul.mubr.f32.gmra.mrb[64].mxu0 %v2250_v18  ;;  %1838 = vmatprep.mubr.f32.mxu1 %v1468_v39  ;;  %v2270_v18 = vld [vmem:[#allocation16 + $0x1a0] sm:$0xff]  ;;  %v1488_v39 = vld [vmem:[#allocation12 + $0x1b8] sm:$0xff] }
 0x2ce   :  { %2623 = vmatprep.mubr.f32.mxu0 %v2253_v26  ;;  %v4525_v26 = vpop.permute.xlu1 %2100 }
 0x2cf   :  { %4786 = vst [vmem:[#allocation38_spill] sm:$0xff] %v4525_v26 }
 0x2d0   :  { %1839 = vmatmul.mubr.f32.gmra.mrb[66].mxu1 %v1467_v14  ;;  %v2273_v14 = vld [vmem:[#allocation16 + $0x1b8] sm:$0xff] }
 0x2d1   :  { %2624 = vmatmul.mubr.f32.gmra.mrb[66].mxu0 %v2252_v25  ;;  %1843 = vmatprep.mubr.f32.mxu1 %v1470_v9  ;;  %v4527_v25 = vpop.permute.xlu0 %2105  ;;  %v1487_v9 = vld [vmem:[#allocation12 + $0x1b0] sm:$0xff] }
 0x2d2   :  { %2628 = vmatprep.mubr.f32.mxu0 %v2255_v17  ;;  %4787 = vst [vmem:[#allocation32_spill] sm:$0xff] %v4527_v25  ;;  %v2272_v17 = vld [vmem:[#allocation16 + $0x1b0] sm:$0xff] }
 0x2d3   :  { %v4804_v25 = vld [vmem:[#allocation47_spill] sm:$0xff] }
 0x2d4   :  { %1844 = vmatmul.mubr.f32.gmra.mrb[68].mxu1 %v1469_v12  ;;  %v1490_v12 = vld [vmem:[#allocation12 + $0x1c8] sm:$0xff] }
 0x2d5   :  { %2629 = vmatmul.mubr.f32.gmra.mrb[68].mxu0 %v2254_v6  ;;  %1848 = vmatprep.mubr.f32.mxu1 %v1472_v13  ;;  %v2275_v6 = vld [vmem:[#allocation16 + $0x1c8] sm:$0xff]  ;;  %v4529_v13 = vpop.permute.xlu1 %2110 }
 0x2d6   :  { %2633 = vmatprep.mubr.f32.mxu0 %v2257_v50  ;;  %4788 = vst [vmem:[#allocation41_spill] sm:$0xff] %v4529_v13  ;;  %v1489_v50 = vld [vmem:[#allocation12 + $0x1c0] sm:$0xff] }
 0x2d8   :  { %1849 = vmatmul.mubr.f32.gmra.mrb[70].mxu1 %v1471_v47  ;;  %v2274_v47 = vld [vmem:[#allocation16 + $0x1c0] sm:$0xff] }
 0x2d9   :  { %2634 = vmatmul.mubr.f32.gmra.mrb[70].mxu0 %v2256_v5  ;;  %1853 = vmatprep.mubr.f32.mxu1 %v1474_v31  ;;  %v1492_v5 = vld [vmem:[#allocation12 + $0x1d8] sm:$0xff]  ;;  %v4531_v31 = vpop.permute.xlu0 %2115 }
 0x2da   :  { %2638 = vmatprep.mubr.f32.mxu0 %v2259_v29  ;;  %4789 = vst [vmem:[#allocation31_spill] sm:$0xff] %v4531_v31  ;;  %v2277_v29 = vld [vmem:[#allocation16 + $0x1d8] sm:$0xff] }
 0x2dc   :  { %1854 = vmatmul.mubr.f32.gmra.mrb[72].mxu1 %v1473_v28  ;;  %v1491_v28 = vld [vmem:[#allocation12 + $0x1d0] sm:$0xff] }
 0x2dd   :  { %2639 = vmatmul.mubr.f32.gmra.mrb[72].mxu0 %v2258_v8  ;;  %1858 = vmatprep.mubr.f32.mxu1 %v1476_v51  ;;  %v2276_v8 = vld [vmem:[#allocation16 + $0x1d0] sm:$0xff]  ;;  %v1494_v51 = vld [vmem:[#allocation12 + $0x1e8] sm:$0xff] }
 0x2de   :  { %2643 = vmatprep.mubr.f32.mxu0 %v2261_v58  ;;  %v4533_v58 = vpop.permute.xlu1 %2120 }
 0x2df   :  { %4790 = vst [vmem:[#allocation40_spill] sm:$0xff] %v4533_v58 }
 0x2e0   :  { %1859 = vmatmul.mubr.f32.gmra.mrb[74].mxu1 %v1475_v22  ;;  %v2279_v22 = vld [vmem:[#allocation16 + $0x1e8] sm:$0xff] }
 0x2e1   :  { %2644 = vmatmul.mubr.f32.gmra.mrb[74].mxu0 %v2260_v4  ;;  %1863 = vmatprep.mubr.f32.mxu1 %v1478_v52  ;;  %v4535_v4 = vpop.permute.xlu0 %2125  ;;  %v1493_v52 = vld [vmem:[#allocation12 + $0x1e0] sm:$0xff] }
 0x2e2   :  { %2648 = vmatprep.mubr.f32.mxu0 %v2263_v35  ;;  %4791 = vst [vmem:[#allocation34_spill] sm:$0xff] %v4535_v4  ;;  %v2278_v35 = vld [vmem:[#allocation16 + $0x1e0] sm:$0xff] }
 0x2e4   :  { %1864 = vmatmul.mubr.f32.gmra.mrb[76].mxu1 %v1477_v49  ;;  %v1496_v49 = vld [vmem:[#allocation12 + $0x1f8] sm:$0xff] }
 0x2e5   :  { %2649 = vmatmul.mubr.f32.gmra.mrb[76].mxu0 %v2262_v46  ;;  %1868 = vmatprep.mubr.f32.mxu1 %v1480_v32  ;;  %v2281_v46 = vld [vmem:[#allocation16 + $0x1f8] sm:$0xff]  ;;  %v4537_v32 = vpop.permute.xlu1 %2130 }
 0x2e6   :  { %2653 = vmatprep.mubr.f32.mxu0 %v2265_v24  ;;  %4792 = vst [vmem:[#allocation43_spill] sm:$0xff] %v4537_v32  ;;  %v1495_v24 = vld [vmem:[#allocation12 + $0x1f0] sm:$0xff] }
 0x2e8   :  { %1869 = vmatmul.mubr.f32.gmra.mrb[78].mxu1 %v1479_v19  ;;  %v2280_v19 = vld [vmem:[#allocation16 + $0x1f0] sm:$0xff] }
 0x2e9   :  { %2654 = vmatmul.mubr.f32.gmra.mrb[78].mxu0 %v2264_v21  ;;  %1873 = vmatprep.mubr.f32.mxu1 %v1482_v62  ;;  %v4539_v21 = vpop.permute.xlu0 %2135  ;;  %v4541_v62 = vpop.permute.xlu1 %2210 }
 0x2ea   :  { %2658 = vmatprep.mubr.f32.mxu0 %v2267_v23  ;;  %4793 = vst [vmem:[#allocation33_spill] sm:$0xff] %v4539_v21  ;;  %4794 = vst [vmem:[#allocation42_spill] sm:$0xff] %v4541_v62 }
 0x2ec   :  { %1874 = vmatmul.mubr.f32.gmra.mrb[80].mxu1 %v1481_v45 }
 0x2ed   :  { %2659 = vmatmul.mubr.f32.gmra.mrb[80].mxu0 %v2266_v61  ;;  %1878 = vmatprep.mubr.f32.mxu1 %v1484_v0  ;;  %v2317_v23 = vpop.permute.xlu0 %2316  ;;  %v2322_v45 = vpop.permute.xlu1 %2321 }
 0x2ee   :  { %2663 = vmatprep.mubr.f32.mxu0 %v2269_v10 }
 0x2f0   :  { %1879 = vmatmul.mubr.f32.gmra.mrb[82].mxu1 %v1483_v42 }
 0x2f1   :  { %2664 = vmatmul.mubr.f32.gmra.mrb[82].mxu0 %v2268_v7  ;;  %1883 = vmatprep.mubr.f32.mxu1 %v1486_v30  ;;  %v2327_v61 = vpop.permute.xlu0 %2326  ;;  %v4543_v0 = vpop.permute.xlu1 %2331 }
 0x2f2   :  { %2668 = vmatprep.mubr.f32.mxu0 %v2271_v36 }
 0x2f4   :  { %1884 = vmatmul.mubr.f32.gmra.mrb[84].mxu1 %v1485_v3 }
 0x2f5   :  { %2669 = vmatmul.mubr.f32.gmra.mrb[84].mxu0 %v2270_v18  ;;  %1888 = vmatprep.mubr.f32.mxu1 %v1488_v39  ;;  %v4545_v10 = vpop.permute.xlu0 %2336  ;;  %v4547_v42 = vpop.permute.xlu1 %2341 }
 0x2f6   :  { %2673 = vmatprep.mubr.f32.mxu0 %v2273_v14 }
 0x2f8   :  { %1889 = vmatmul.mubr.f32.gmra.mrb[86].mxu1 %v1487_v9 }
 0x2f9   :  { %2674 = vmatmul.mubr.f32.gmra.mrb[86].mxu0 %v2272_v17  ;;  %1893 = vmatprep.mubr.f32.mxu1 %v1490_v12  ;;  %v4549_v7 = vpop.permute.xlu0 %2346  ;;  %v4551_v30 = vpop.permute.xlu1 %2351 }
 0x2fa   :  { %2678 = vmatprep.mubr.f32.mxu0 %v2275_v6 }
 0x2fc   :  { %1894 = vmatmul.mubr.f32.gmra.mrb[88].mxu1 %v1489_v50 }
 0x2fd   :  { %2679 = vmatmul.mubr.f32.gmra.mrb[88].mxu0 %v2274_v47  ;;  %1898 = vmatprep.mubr.f32.mxu1 %v1492_v5  ;;  %v4553_v36 = vpop.permute.xlu0 %2356  ;;  %v4555_v3 = vpop.permute.xlu1 %2361 }
 0x2fe   :  { %2683 = vmatprep.mubr.f32.mxu0 %v2277_v29 }
 0x300   :  { %1899 = vmatmul.mubr.f32.gmra.mrb[90].mxu1 %v1491_v28 }
 0x301   :  { %2684 = vmatmul.mubr.f32.gmra.mrb[90].mxu0 %v2276_v8  ;;  %1903 = vmatprep.mubr.f32.mxu1 %v1494_v51  ;;  %v4557_v18 = vpop.permute.xlu0 %2366  ;;  %v4559_v39 = vpop.permute.xlu1 %2371 }
 0x302   :  { %2688 = vmatprep.mubr.f32.mxu0 %v2279_v22 }
 0x304   :  { %1904 = vmatmul.mubr.f32.gmra.mrb[92].mxu1 %v1493_v52 }
 0x305   :  { %2689 = vmatmul.mubr.f32.gmra.mrb[92].mxu0 %v2278_v35  ;;  %1908 = vmatprep.mubr.f32.mxu1 %v1496_v49  ;;  %v4561_v14 = vpop.permute.xlu0 %2376  ;;  %v4563_v9 = vpop.permute.xlu1 %2381 }
 0x306   :  { %2693 = vmatprep.mubr.f32.mxu0 %v2281_v46 }
 0x308   :  { %1909 = vmatmul.mubr.f32.gmra.mrb[94].mxu1 %v1495_v24  ;;  %v4802_v24 = vld [vmem:[#allocation46_spill] sm:$0xff] }
 0x309   :  { %2694 = vmatmul.mubr.f32.gmra.mrb[94].mxu0 %v2280_v19  ;;  %v4565_v17 = vpop.permute.xlu0 %2386  ;;  %v4567_v12 = vpop.permute.xlu1 %2391 }
 0x30d   :  { %v4569_v6 = vpop.permute.xlu0 %2396  ;;  %v4571_v50 = vpop.permute.xlu1 %2401 }
 0x311   :  { %v4573_v47 = vpop.permute.xlu0 %2406  ;;  %v4575_v5 = vpop.permute.xlu1 %2411 }
 0x315   :  { %v4577_v29 = vpop.permute.xlu0 %2416  ;;  %v4579_v28 = vpop.permute.xlu1 %2421 }
 0x316   :  { %4795 = vst [vmem:[#allocation36_spill] sm:$0xff] %v4579_v28 }
 0x319   :  { %v4581_v8 = vpop.permute.xlu0 %2426  ;;  %v4583_v51 = vpop.permute.xlu1 %2431 }
 0x31a   :  { %4796 = vst [vmem:[#allocation45_spill] sm:$0xff] %v4581_v8  ;;  %4797 = vst [vmem:[#allocation35_spill] sm:$0xff] %v4583_v51 }
 0x31d   :  { %v4585_v22 = vpop.permute.xlu0 %2436  ;;  %v4587_v52 = vpop.permute.xlu1 %2441 }
 0x31e   :  { %4798 = vst [vmem:[#allocation44_spill] sm:$0xff] %v4585_v22  ;;  %4799 = vst [vmem:[#allocation78_spill] sm:$0xff] %v4587_v52 }
 0x321   :  { %v4589_v35 = vpop.permute.xlu0 %2446  ;;  %v4591_v49 = vpop.permute.xlu1 %2451 }
 0x322   :  { %4800 = vst [vmem:[#allocation79_spill] sm:$0xff] %v4589_v35  ;;  %4801 = vst [vmem:[#allocation80_spill] sm:$0xff] %v4591_v49 }
 0x325   :  { %v4594_v32 = vpop.permute.xlu0 %2456  ;;  %v2766_v52 = vpop.permute.xlu1 %2765 }
 0x326   :  { %4803 = vst [vmem:[#allocation46_spill] sm:$0xff] %v4594_v32 }
 0x329   :  { %v2771_v8 = vpop.permute.xlu0 %2770 }
 0x35f   :  { %v1755_v46 = vpop.f32.mrb[32].mxu1 }
 0x360   :  { %v1756_v19 = vadd.f32 %v1755_v46, %v4802_v24  ;;  %v2540_v62 = vpop.f32.mrb[32].mxu0  ;;  %v1757_v21 = vpop.f32.mrb[33].mxu1 }
 0x361   :  { %v2541_v4 = vadd.f32 %v2540_v62, %v2317_v23  ;;  %v2542_v58 = vpop.f32.mrb[33].mxu0  ;;  %v4805_v62 = vld [vmem:[#allocation48_spill] sm:$0xff] }
 0x362   :  { %v1914_v13 = vmax.f32 %v1756_v19, 0.0 }
 0x363   :  { %v1760_v31 = vpop.f32.mrb[34].mxu1  ;;  %v2699_v51 = vmax.f32 %v2541_v4, 0.0 }
 0x364   :  { %v1761_v26 = vadd.f32 %v1760_v31, %v4804_v25  ;;  %v2545_v22 = vpop.f32.mrb[34].mxu0  ;;  %v1762_v2 = vpop.f32.mrb[35].mxu1  ;;  %v2138_v21 = vmul.f32 %v4477_v38, %v1914_v13 }
 0x365   :  { %v2546_v35 = vadd.f32 %v2545_v22, %v2322_v45  ;;  %v2547_v59 = vpop.f32.mrb[35].mxu0  ;;  %v2923_v32 = vmul.f32 %v2766_v52, %v2699_v51  ;;  %v2776_v45 = vpop.permute.xlu1 %2775 }
 0x366   :  { %v1915_v49 = vmax.f32 %v1761_v26, 0.0 }
 0x367   :  { %v2700_v54 = vmax.f32 %v2546_v35, 0.0  ;;  %v1765_v46 = vpop.f32.mrb[36].mxu1 }
 0x368   :  { %v2139_v24 = vmul.f32 %v4479_v15, %v1915_v49  ;;  %v1766_v58 = vadd.f32 %v1765_v46, %v4805_v62  ;;  %v2550_v23 = vpop.f32.mrb[36].mxu0  ;;  %v1767_v19 = vpop.f32.mrb[37].mxu1 }
 0x369   :  { %v2924_v25 = vmul.f32 %v2771_v8, %v2700_v54  ;;  %v2551_v31 = vadd.f32 %v2550_v23, %v2327_v61  ;;  %v2552_v2 = vpop.f32.mrb[37].mxu0  ;;  %v2781_v61 = vpop.permute.xlu0 %2780 }
 0x36a   :  { %v2170_v28 = vadd.f32 %v2139_v24, %v2138_v21  ;;  %v1916_v4 = vmax.f32 %v1766_v58, 0.0  ;;  %v4807_v24 = vld [vmem:[#allocation50_spill] sm:$0xff] }
 0x36b   :  { %v2955_v59 = vadd.f32 %v2924_v25, %v2923_v32  ;;  %v2701_v26 = vmax.f32 %v2551_v31, 0.0  ;;  %v1770_v22 = vpop.f32.mrb[38].mxu1 }
 0x36c   :  { %v2140_v35 = vmul.f32 %v4481_v11, %v1916_v4  ;;  %v1771_v38 = vadd.f32 %v1770_v22, %v4806_v37  ;;  %v2555_v13 = vpop.f32.mrb[38].mxu0  ;;  %v1772_v15 = vpop.f32.mrb[39].mxu1 }
 0x36d   :  { %v2925_v49 = vmul.f32 %v2776_v45, %v2701_v26  ;;  %v2556_v46 = vadd.f32 %v2555_v13, %v4543_v0  ;;  %v2557_v62 = vpop.f32.mrb[39].mxu0  ;;  %v2786_v0 = vpop.permute.xlu1 %2785  ;;  %v4808_v26 = vld [vmem:[#allocation51_spill] sm:$0xff] }
 0x36e   :  { %v2171_v51 = vadd.f32 %v2170_v28, %v2140_v35  ;;  %v1917_v54 = vmax.f32 %v1771_v38, 0.0 }
 0x36f   :  { %v2956_v8 = vadd.f32 %v2955_v59, %v2925_v49  ;;  %v2702_v52 = vmax.f32 %v2556_v46, 0.0  ;;  %v1775_v21 = vpop.f32.mrb[40].mxu1 }
 0x370   :  { %v2141_v32 = vmul.f32 %v4483_v48, %v1917_v54  ;;  %v1776_v58 = vadd.f32 %v1775_v21, %v4807_v24  ;;  %v2560_v23 = vpop.f32.mrb[40].mxu0  ;;  %v1777_v11 = vpop.f32.mrb[41].mxu1 }
 0x371   :  { %v2926_v19 = vmul.f32 %v2781_v61, %v2702_v52  ;;  %v2561_v37 = vadd.f32 %v2560_v23, %v4545_v10  ;;  %v2562_v25 = vpop.f32.mrb[41].mxu0  ;;  %v2791_v10 = vpop.permute.xlu0 %2790 }
 0x372   :  { %v2172_v31 = vadd.f32 %v2171_v51, %v2141_v32  ;;  %v1918_v2 = vmax.f32 %v1776_v58, 0.0 }
 0x373   :  { %v2957_v4 = vadd.f32 %v2956_v8, %v2926_v19  ;;  %v2703_v28 = vmax.f32 %v2561_v37, 0.0  ;;  %v1780_v45 = vpop.f32.mrb[42].mxu1  ;;  %v4809_v8 = vld [vmem:[#allocation52_spill] sm:$0xff] }
 0x374   :  { %v2142_v59 = vmul.f32 %v4485_v60, %v1918_v2  ;;  %v1781_v22 = vadd.f32 %v1780_v45, %v4808_v26  ;;  %v2565_v35 = vpop.f32.mrb[42].mxu0  ;;  %v1782_v48 = vpop.f32.mrb[43].mxu1  ;;  %v4810_v2 = vld [vmem:[#allocation53_spill] sm:$0xff] }
 0x375   :  { %v2927_v38 = vmul.f32 %v2786_v0, %v2703_v28  ;;  %v2566_v13 = vadd.f32 %v2565_v35, %v4547_v42  ;;  %v2567_v15 = vpop.f32.mrb[43].mxu0  ;;  %v2796_v42 = vpop.permute.xlu1 %2795 }
 0x376   :  { %v2173_v49 = vadd.f32 %v2172_v31, %v2142_v59  ;;  %v1919_v46 = vmax.f32 %v1781_v22, 0.0  ;;  %v4811_v15 = vld [vmem:[#allocation54_spill] sm:$0xff] }
 0x377   :  { %v2958_v62 = vadd.f32 %v2957_v4, %v2927_v38  ;;  %v2704_v51 = vmax.f32 %v2566_v13, 0.0  ;;  %v1785_v54 = vpop.f32.mrb[44].mxu1 }
 0x378   :  { %v2143_v61 = vmul.f32 %v4487_v40, %v1919_v46  ;;  %v1786_v52 = vadd.f32 %v1785_v54, %v4809_v8  ;;  %v2570_v21 = vpop.f32.mrb[44].mxu0  ;;  %v1787_v60 = vpop.f32.mrb[45].mxu1 }
 0x379   :  { %v2928_v32 = vmul.f32 %v2791_v10, %v2704_v51  ;;  %v2571_v24 = vadd.f32 %v2570_v21, %v4549_v7  ;;  %v2572_v58 = vpop.f32.mrb[45].mxu0  ;;  %v2801_v7 = vpop.permute.xlu0 %2800 }
 0x37a   :  { %v2174_v23 = vadd.f32 %v2173_v49, %v2143_v61  ;;  %v1920_v11 = vmax.f32 %v1786_v52, 0.0 }
 0x37b   :  { %v2959_v19 = vadd.f32 %v2958_v62, %v2928_v32  ;;  %v2705_v37 = vmax.f32 %v2571_v24, 0.0  ;;  %v1790_v25 = vpop.f32.mrb[46].mxu1  ;;  %v4812_v32 = vld [vmem:[#allocation55_spill] sm:$0xff] }
 0x37c   :  { %v2144_v31 = vmul.f32 %v4489_v20, %v1920_v11  ;;  %v1791_v0 = vadd.f32 %v1790_v25, %v4810_v2  ;;  %v2575_v4 = vpop.f32.mrb[46].mxu0  ;;  %v1792_v40 = vpop.f32.mrb[47].mxu1 }
 0x37d   :  { %v2929_v28 = vmul.f32 %v2796_v42, %v2705_v37  ;;  %v2576_v45 = vadd.f32 %v2575_v4, %v4551_v30  ;;  %v2577_v59 = vpop.f32.mrb[47].mxu0  ;;  %v2806_v30 = vpop.permute.xlu1 %2805  ;;  %v4813_v4 = vld [vmem:[#allocation56_spill] sm:$0xff] }
 0x37e   :  { %v2175_v26 = vadd.f32 %v2174_v23, %v2144_v31  ;;  %v1921_v22 = vmax.f32 %v1791_v0, 0.0 }
 0x37f   :  { %v2960_v35 = vadd.f32 %v2959_v19, %v2929_v28  ;;  %v2706_v48 = vmax.f32 %v2576_v45, 0.0  ;;  %v1795_v38 = vpop.f32.mrb[48].mxu1 }
 0x380   :  { %v2145_v13 = vmul.f32 %v4491_v55, %v1921_v22  ;;  %v1796_v49 = vadd.f32 %v1795_v38, %v4811_v15  ;;  %v2580_v46 = vpop.f32.mrb[48].mxu0  ;;  %v1797_v20 = vpop.f32.mrb[49].mxu1  ;;  %v4814_v15 = vld [vmem:[#allocation57_spill] sm:$0xff] }
 0x381   :  { %v2930_v10 = vmul.f32 %v2801_v7, %v2706_v48  ;;  %v2581_v62 = vadd.f32 %v2580_v46, %v4553_v36  ;;  %v2582_v51 = vpop.f32.mrb[49].mxu0  ;;  %v2811_v36 = vpop.permute.xlu0 %2810 }
 0x382   :  { %v2176_v54 = vadd.f32 %v2175_v26, %v2145_v13  ;;  %v1922_v61 = vmax.f32 %v1796_v49, 0.0 }
 0x383   :  { %v2961_v8 = vadd.f32 %v2960_v35, %v2930_v10  ;;  %v2707_v52 = vmax.f32 %v2581_v62, 0.0  ;;  %v1800_v21 = vpop.f32.mrb[50].mxu1 }
 0x384   :  { %v2146_v60 = vmul.f32 %v4493_v57, %v1922_v61  ;;  %v1801_v24 = vadd.f32 %v1800_v21, %v4812_v32  ;;  %v2585_v58 = vpop.f32.mrb[50].mxu0  ;;  %v1802_v55 = vpop.f32.mrb[51].mxu1  ;;  %v4815_v21 = vld [vmem:[#allocation58_spill] sm:$0xff] }
 0x385   :  { %v2931_v23 = vmul.f32 %v2806_v30, %v2707_v52  ;;  %v2586_v11 = vadd.f32 %v2585_v58, %v4555_v3  ;;  %v2587_v42 = vpop.f32.mrb[51].mxu0  ;;  %v2816_v3 = vpop.permute.xlu1 %2815 }
 0x386   :  { %v2177_v19 = vadd.f32 %v2176_v54, %v2146_v60  ;;  %v1923_v37 = vmax.f32 %v1801_v24, 0.0 }
 0x387   :  { %v2962_v25 = vadd.f32 %v2961_v8, %v2931_v23  ;;  %v2708_v31 = vmax.f32 %v2586_v11, 0.0  ;;  %v1805_v2 = vpop.f32.mrb[52].mxu1 }
 0x388   :  { %v2147_v0 = vmul.f32 %v4495_v41, %v1923_v37  ;;  %v1806_v40 = vadd.f32 %v1805_v2, %v4813_v4  ;;  %v2590_v28 = vpop.f32.mrb[52].mxu0  ;;  %v1807_v57 = vpop.f32.mrb[53].mxu1 }
 0x389   :  { %v2932_v45 = vmul.f32 %v2811_v36, %v2708_v31  ;;  %v2591_v59 = vadd.f32 %v2590_v28, %v4557_v18  ;;  %v2592_v26 = vpop.f32.mrb[53].mxu0  ;;  %v2821_v18 = vpop.permute.xlu0 %2820 }
 0x38a   :  { %v2178_v22 = vadd.f32 %v2177_v19, %v2147_v0  ;;  %v1924_v7 = vmax.f32 %v1806_v40, 0.0 }
 0x38b   :  { %v2963_v35 = vadd.f32 %v2962_v25, %v2932_v45  ;;  %v2709_v48 = vmax.f32 %v2591_v59, 0.0  ;;  %v1810_v38 = vpop.f32.mrb[54].mxu1  ;;  %v4816_v25 = vld [vmem:[#allocation59_spill] sm:$0xff] }
 0x38c   :  { %v2148_v13 = vmul.f32 %v4497_v16, %v1924_v7  ;;  %v1811_v49 = vadd.f32 %v1810_v38, %v4814_v15  ;;  %v2595_v46 = vpop.f32.mrb[54].mxu0  ;;  %v1812_v41 = vpop.f32.mrb[55].mxu1  ;;  %v4817_v7 = vld [vmem:[#allocation60_spill] sm:$0xff] }
 0x38d   :  { %v2933_v20 = vmul.f32 %v2816_v3, %v2709_v48  ;;  %v2596_v10 = vadd.f32 %v2595_v46, %v4559_v39  ;;  %v2597_v62 = vpop.f32.mrb[55].mxu0  ;;  %v2826_v39 = vpop.permute.xlu1 %2825 }
 0x38e   :  { %v2179_v51 = vadd.f32 %v2178_v22, %v2148_v13  ;;  %v1925_v54 = vmax.f32 %v1811_v49, 0.0  ;;  %v4818_v62 = vld [vmem:[#allocation61_spill] sm:$0xff] }
 0x38f   :  { %v2964_v61 = vadd.f32 %v2963_v35, %v2933_v20  ;;  %v2710_v30 = vmax.f32 %v2596_v10, 0.0  ;;  %v1815_v8 = vpop.f32.mrb[56].mxu1 }
 0x390   :  { %v2149_v52 = vmul.f32 %v4499_v1, %v1925_v54  ;;  %v1816_v60 = vadd.f32 %v1815_v8, %v4815_v21  ;;  %v2600_v32 = vpop.f32.mrb[56].mxu0  ;;  %v1817_v16 = vpop.f32.mrb[57].mxu1 }
 0x391   :  { %v2934_v24 = vmul.f32 %v2821_v18, %v2710_v30  ;;  %v2601_v58 = vadd.f32 %v2600_v32, %v4561_v14  ;;  %v2602_v55 = vpop.f32.mrb[57].mxu0  ;;  %v2831_v14 = vpop.permute.xlu0 %2830 }
 0x392   :  { %v2180_v23 = vadd.f32 %v2179_v51, %v2149_v52  ;;  %v1926_v11 = vmax.f32 %v1816_v60, 0.0 }
 0x393   :  { %v2965_v42 = vadd.f32 %v2964_v61, %v2934_v24  ;;  %v2711_v19 = vmax.f32 %v2601_v58, 0.0  ;;  %v1820_v37 = vpop.f32.mrb[58].mxu1  ;;  %v4819_v24 = vld [vmem:[#allocation62_spill] sm:$0xff] }
 0x394   :  { %v2150_v36 = vmul.f32 %v4501_v53, %v1926_v11  ;;  %v1821_v31 = vadd.f32 %v1820_v37, %v4816_v25  ;;  %v2605_v2 = vpop.f32.mrb[58].mxu0  ;;  %v1822_v1 = vpop.f32.mrb[59].mxu1 }
 0x395   :  { %v2935_v0 = vmul.f32 %v2826_v39, %v2711_v19  ;;  %v2606_v4 = vadd.f32 %v2605_v2, %v4563_v9  ;;  %v2607_v40 = vpop.f32.mrb[59].mxu0  ;;  %v2836_v9 = vpop.permute.xlu1 %2835  ;;  %v4820_v2 = vld [vmem:[#allocation63_spill] sm:$0xff] }
 0x396   :  { %v2181_v28 = vadd.f32 %v2180_v23, %v2150_v36  ;;  %v1927_v57 = vmax.f32 %v1821_v31, 0.0 }
 0x397   :  { %v2966_v45 = vadd.f32 %v2965_v42, %v2935_v0  ;;  %v2712_v59 = vmax.f32 %v2606_v4, 0.0  ;;  %v1825_v26 = vpop.f32.mrb[60].mxu1 }
 0x398   :  { %v2151_v22 = vmul.f32 %v4503_v63, %v1927_v57  ;;  %v1826_v3 = vadd.f32 %v1825_v26, %v4817_v7  ;;  %v2610_v35 = vpop.f32.mrb[60].mxu0  ;;  %v1827_v53 = vpop.f32.mrb[61].mxu1  ;;  %v4821_v7 = vld [vmem:[#allocation64_spill] sm:$0xff] }
 0x399   :  { %v2936_v48 = vmul.f32 %v2831_v14, %v2712_v59  ;;  %v2611_v38 = vadd.f32 %v2610_v35, %v4565_v17  ;;  %v2612_v13 = vpop.f32.mrb[61].mxu0  ;;  %v2841_v17 = vpop.permute.xlu0 %2840 }
 0x39a   :  { %v2182_v15 = vadd.f32 %v2181_v28, %v2151_v22  ;;  %v1928_v49 = vmax.f32 %v1826_v3, 0.0 }
 0x39b   :  { %v2967_v46 = vadd.f32 %v2966_v45, %v2936_v48  ;;  %v2713_v41 = vmax.f32 %v2611_v38, 0.0  ;;  %v1830_v20 = vpop.f32.mrb[62].mxu1 }
 0x39c   :  { %v2152_v10 = vmul.f32 %v4505_v33, %v1928_v49  ;;  %v1831_v51 = vadd.f32 %v1830_v20, %v4818_v62  ;;  %v2615_v54 = vpop.f32.mrb[62].mxu0  ;;  %v1832_v63 = vpop.f32.mrb[63].mxu1  ;;  %v4822_v20 = vld [vmem:[#allocation65_spill] sm:$0xff] }
 0x39d   :  { %v2937_v18 = vmul.f32 %v2836_v9, %v2713_v41  ;;  %v2616_v61 = vadd.f32 %v2615_v54, %v4567_v12  ;;  %v2617_v30 = vpop.f32.mrb[63].mxu0  ;;  %v2846_v12 = vpop.permute.xlu1 %2845 }
 0x39e   :  { %v2183_v8 = vadd.f32 %v2182_v15, %v2152_v10  ;;  %v1929_v52 = vmax.f32 %v1831_v51, 0.0 }
 0x39f   :  { %v2968_v21 = vadd.f32 %v2967_v46, %v2937_v18  ;;  %v2714_v60 = vmax.f32 %v2616_v61, 0.0  ;;  %v1835_v32 = vpop.f32.mrb[64].mxu1 }
 0x3a0   :  { %v2153_v16 = vmul.f32 %v4507_v34, %v1929_v52  ;;  %v1836_v58 = vadd.f32 %v1835_v32, %v4819_v24  ;;  %v2620_v55 = vpop.f32.mrb[64].mxu0  ;;  %v1837_v33 = vpop.f32.mrb[65].mxu1 }
 0x3a1   :  { %v2938_v23 = vmul.f32 %v2841_v17, %v2714_v60  ;;  %v2621_v11 = vadd.f32 %v2620_v55, %v4569_v6  ;;  %v2622_v39 = vpop.f32.mrb[65].mxu0  ;;  %v2851_v6 = vpop.permute.xlu0 %2850 }
 0x3a2   :  { %v2184_v42 = vadd.f32 %v2183_v8, %v2153_v16  ;;  %v1930_v19 = vmax.f32 %v1836_v58, 0.0 }
 0x3a3   :  { %v2969_v37 = vadd.f32 %v2968_v21, %v2938_v23  ;;  %v2715_v36 = vmax.f32 %v2621_v11, 0.0  ;;  %v1840_v25 = vpop.f32.mrb[66].mxu1  ;;  %v4823_v21 = vld [vmem:[#allocation66_spill] sm:$0xff] }
 0x3a4   :  { %v2154_v31 = vmul.f32 %v4509_v27, %v1930_v19  ;;  %v1841_v1 = vadd.f32 %v1840_v25, %v4820_v2  ;;  %v2625_v0 = vpop.f32.mrb[66].mxu0  ;;  %v1842_v34 = vpop.f32.mrb[67].mxu1 }
 0x3a5   :  { %v2939_v4 = vmul.f32 %v2846_v12, %v2715_v36  ;;  %v2626_v40 = vadd.f32 %v2625_v0, %v4571_v50  ;;  %v2627_v28 = vpop.f32.mrb[67].mxu0  ;;  %v2856_v50 = vpop.permute.xlu1 %2855  ;;  %v4825_v12 = vld [vmem:[#allocation67_spill] sm:$0xff] }
 0x3a6   :  { %v2185_v57 = vadd.f32 %v2184_v42, %v2154_v31  ;;  %v1931_v14 = vmax.f32 %v1841_v1, 0.0  ;;  %v4824_v42 = vld [vmem:[#allocation37_spill] sm:$0xff]  ;;  %v4826_v31 = vld [vmem:[#allocation36_spill] sm:$0xff] }
 0x3a7   :  { %v2970_v45 = vadd.f32 %v2969_v37, %v2939_v4  ;;  %v2716_v59 = vmax.f32 %v2626_v40, 0.0  ;;  %v1845_v26 = vpop.f32.mrb[68].mxu1 }
 0x3a8   :  { %v2155_v22 = vmul.f32 %v4511_v43, %v1931_v14  ;;  %v1846_v3 = vadd.f32 %v1845_v26, %v4821_v7  ;;  %v2630_v35 = vpop.f32.mrb[68].mxu0  ;;  %v1847_v27 = vpop.f32.mrb[69].mxu1 }
 0x3a9   :  { %v2940_v53 = vmul.f32 %v2851_v6, %v2716_v59  ;;  %v2631_v48 = vadd.f32 %v2630_v35, %v4573_v47  ;;  %v2632_v38 = vpop.f32.mrb[69].mxu0  ;;  %v2861_v47 = vpop.permute.xlu0 %2860  ;;  %v4828_v6 = vld [vmem:[#allocation68_spill] sm:$0xff] }
 0x3aa   :  { %v2186_v13 = vadd.f32 %v2185_v57, %v2155_v22  ;;  %v1932_v15 = vmax.f32 %v1846_v3, 0.0  ;;  %v4827_v57 = vld [vmem:[#allocation30_spill] sm:$0xff]  ;;  %v4829_v3 = vld [vmem:[#allocation45_spill] sm:$0xff] }
 0x3ab   :  { %v2971_v49 = vadd.f32 %v2970_v45, %v2940_v53  ;;  %v2717_v9 = vmax.f32 %v2631_v48, 0.0  ;;  %v1850_v46 = vpop.f32.mrb[70].mxu1 }
 0x3ac   :  { %v2156_v41 = vmul.f32 %v4513_v56, %v1932_v15  ;;  %v1851_v10 = vadd.f32 %v1850_v46, %v4822_v20  ;;  %v2635_v62 = vpop.f32.mrb[70].mxu0  ;;  %v1852_v43 = vpop.f32.mrb[71].mxu1 }
 0x3ad   :  { %v2941_v51 = vmul.f32 %v2856_v50, %v2717_v9  ;;  %v2636_v54 = vadd.f32 %v2635_v62, %v4575_v5  ;;  %v2637_v63 = vpop.f32.mrb[71].mxu0  ;;  %v2866_v5 = vpop.permute.xlu1 %2865  ;;  %v4830_v50 = vld [vmem:[#allocation39_spill] sm:$0xff]  ;;  %v4831_v9 = vld [vmem:[#allocation69_spill] sm:$0xff] }
 0x3ae   :  { %v2187_v18 = vadd.f32 %v2186_v13, %v2156_v41  ;;  %v1933_v61 = vmax.f32 %v1851_v10, 0.0  ;;  %v4832_v43 = vld [vmem:[#allocation35_spill] sm:$0xff] }
 0x3af   :  { %v2972_v30 = vadd.f32 %v2971_v49, %v2941_v51  ;;  %v2718_v8 = vmax.f32 %v2636_v54, 0.0  ;;  %v1855_v52 = vpop.f32.mrb[72].mxu1 }
 0x3b0   :  { %v2157_v17 = vmul.f32 %v4515_v44, %v1933_v61  ;;  %v1856_v60 = vadd.f32 %v1855_v52, %v4823_v21  ;;  %v2640_v32 = vpop.f32.mrb[72].mxu0  ;;  %v1857_v56 = vpop.f32.mrb[73].mxu1  ;;  %v4833_v52 = vld [vmem:[#allocation29_spill] sm:$0xff]  ;;  %v4834_v21 = vld [vmem:[#allocation70_spill] sm:$0xff] }
 0x3b1   :  { %v2942_v16 = vmul.f32 %v2861_v47, %v2718_v8  ;;  %v2641_v24 = vadd.f32 %v2640_v32, %v4577_v29  ;;  %v2642_v58 = vpop.f32.mrb[73].mxu0  ;;  %v2871_v29 = vpop.permute.xlu0 %2870 }
 0x3b2   :  { %v2188_v55 = vadd.f32 %v2187_v18, %v2157_v17  ;;  %v1934_v33 = vmax.f32 %v1856_v60, 0.0  ;;  %v2876_v22 = vpop.permute.xlu1 %2875 }
 0x3b3   :  { %v2973_v23 = vadd.f32 %v2972_v30, %v2942_v16  ;;  %v2719_v11 = vmax.f32 %v2641_v24, 0.0  ;;  %v1860_v39 = vpop.f32.mrb[74].mxu1  ;;  %v4835_v24 = vld [vmem:[#allocation44_spill] sm:$0xff] }
 0x3b4   :  { %v2158_v19 = vmul.f32 %v4824_v42, %v1934_v33  ;;  %v1861_v37 = vadd.f32 %v1860_v39, %v4825_v12  ;;  %v2645_v36 = vpop.f32.mrb[74].mxu0  ;;  %v1862_v44 = vpop.f32.mrb[75].mxu1 }
 0x3b5   :  { %v2943_v25 = vmul.f32 %v2866_v5, %v2719_v11  ;;  %v2646_v2 = vadd.f32 %v2645_v36, %v4826_v31  ;;  %v2647_v1 = vpop.f32.mrb[75].mxu0  ;;  %v2881_v10 = vpop.permute.xlu0 %2880 }
 0x3b6   :  { %v2189_v0 = vadd.f32 %v2188_v55, %v2158_v19  ;;  %v1935_v34 = vmax.f32 %v1861_v37, 0.0  ;;  %v2886_v61 = vpop.permute.xlu1 %2885  ;;  %v4836_v19 = vld [vmem:[#allocation38_spill] sm:$0xff]  ;;  %v4837_v37 = vld [vmem:[#allocation71_spill] sm:$0xff] }
 0x3b7   :  { %v2974_v4 = vadd.f32 %v2973_v23, %v2943_v25  ;;  %v2720_v40 = vmax.f32 %v2646_v2, 0.0  ;;  %v1865_v28 = vpop.f32.mrb[76].mxu1  ;;  %v4838_v1 = vld [vmem:[#allocation78_spill] sm:$0xff] }
 0x3b8   :  { %v2159_v14 = vmul.f32 %v4827_v57, %v1935_v34  ;;  %v1866_v45 = vadd.f32 %v1865_v28, %v4828_v6  ;;  %v2650_v59 = vpop.f32.mrb[76].mxu0  ;;  %v1867_v26 = vpop.f32.mrb[77].mxu1 }
 0x3b9   :  { %v2944_v7 = vmul.f32 %v2871_v29, %v2720_v40  ;;  %v2651_v35 = vadd.f32 %v2650_v59, %v4829_v3  ;;  %v2652_v27 = vpop.f32.mrb[77].mxu0  ;;  %v2891_v23 = vpop.permute.xlu0 %2890 }
 0x3ba   :  { %v2190_v53 = vadd.f32 %v2189_v0, %v2159_v14  ;;  %v1936_v48 = vmax.f32 %v1866_v45, 0.0  ;;  %v2896_v31 = vpop.permute.xlu1 %2895  ;;  %v4839_v14 = vld [vmem:[#allocation32_spill] sm:$0xff] }
 0x3bb   :  { %v2975_v38 = vadd.f32 %v2974_v4, %v2944_v7  ;;  %v2721_v13 = vmax.f32 %v2651_v35, 0.0  ;;  %v1870_v15 = vpop.f32.mrb[78].mxu1  ;;  %v4840_v45 = vld [vmem:[#allocation72_spill] sm:$0xff]  ;;  %v4841_v35 = vld [vmem:[#allocation79_spill] sm:$0xff] }
 0x3bc   :  { %v2160_v49 = vmul.f32 %v4830_v50, %v1936_v48  ;;  %v1871_v46 = vadd.f32 %v1870_v15, %v4831_v9  ;;  %v2655_v41 = vpop.f32.mrb[78].mxu0  ;;  %v1872_v20 = vpop.f32.mrb[79].mxu1  ;;  %v4842_v9 = vld [vmem:[#allocation41_spill] sm:$0xff] }
 0x3bd   :  { %v2945_v62 = vmul.f32 %v2876_v22, %v2721_v13  ;;  %v2656_v51 = vadd.f32 %v2655_v41, %v4832_v43  ;;  %v2657_v54 = vpop.f32.mrb[79].mxu0  ;;  %v2462_v7 = vpop.permute.xlu0 %2461  ;;  %v4843_v41 = vld [vmem:[#allocation73_spill] sm:$0xff] }
 0x3be   :  { %v2191_v63 = vadd.f32 %v2190_v53, %v2160_v49  ;;  %v1937_v18 = vmax.f32 %v1871_v46, 0.0  ;;  %v2901_v13 = vpop.permute.xlu1 %2900 }
 0x3bf   :  { %v2976_v47 = vadd.f32 %v2975_v38, %v2945_v62  ;;  %v2722_v30 = vmax.f32 %v2656_v51, 0.0  ;;  %v1875_v8 = vpop.f32.mrb[80].mxu1  ;;  %v4844_v51 = vld [vmem:[#allocation80_spill] sm:$0xff] }
 0x3c0   :  { %v2161_v17 = vmul.f32 %v4833_v52, %v1937_v18  ;;  %v1876_v60 = vadd.f32 %v1875_v8, %v4834_v21  ;;  %v2660_v32 = vpop.f32.mrb[80].mxu0  ;;  %v1877_v56 = vpop.f32.mrb[81].mxu1 }
 0x3c1   :  { %v2946_v16 = vmul.f32 %v2881_v10, %v2722_v30  ;;  %v2661_v58 = vadd.f32 %v2660_v32, %v4835_v24  ;;  %v2662_v55 = vpop.f32.mrb[81].mxu0 }
 0x3c2   :  { %v2192_v33 = vadd.f32 %v2191_v63, %v2161_v17  ;;  %v1938_v5 = vmax.f32 %v1876_v60, 0.0  ;;  %v4845_v17 = vld [vmem:[#allocation31_spill] sm:$0xff]  ;;  %v4846_v60 = vld [vmem:[#allocation74_spill] sm:$0xff]  ;;  %v2906_v24 = vpop.permute.xlu1 %2905 }
 0x3c3   :  { %v2977_v11 = vadd.f32 %v2976_v47, %v2946_v16  ;;  %v2723_v39 = vmax.f32 %v2661_v58, 0.0  ;;  %v1880_v42 = vpop.f32.mrb[82].mxu1  ;;  %v2467_v47 = vpop.permute.xlu0 %2466  ;;  %v4847_v55 = vld [vmem:[#allocation46_spill] sm:$0xff] }
 0x3c4   :  { %v2162_v12 = vmul.f32 %v4836_v19, %v1938_v5  ;;  %v1881_v36 = vadd.f32 %v1880_v42, %v4837_v37  ;;  %v2665_v44 = vpop.f32.mrb[82].mxu0  ;;  %v1882_v25 = vpop.f32.mrb[83].mxu1 }
 0x3c5   :  { %v2947_v2 = vmul.f32 %v2886_v61, %v2723_v39  ;;  %v2666_v0 = vadd.f32 %v2665_v44, %v4838_v1  ;;  %v2667_v34 = vpop.f32.mrb[83].mxu0 }
 0x3c6   :  { %v2193_v29 = vadd.f32 %v2192_v33, %v2162_v12  ;;  %v1939_v4 = vmax.f32 %v1881_v36, 0.0  ;;  %v4848_v12 = vld [vmem:[#allocation40_spill] sm:$0xff]  ;;  %v4849_v36 = vld [vmem:[#allocation75_spill] sm:$0xff] }
 0x3c7   :  { %v2978_v40 = vadd.f32 %v2977_v11, %v2947_v2  ;;  %v2724_v28 = vmax.f32 %v2666_v0, 0.0  ;;  %v1885_v57 = vpop.f32.mrb[84].mxu1  ;;  %v2472_v2 = vpop.permute.xlu0 %2471 }
 0x3c8   :  { %v2163_v6 = vmul.f32 %v4839_v14, %v1939_v4  ;;  %v1886_v59 = vadd.f32 %v1885_v57, %v4840_v45  ;;  %v2670_v26 = vpop.f32.mrb[84].mxu0  ;;  %v1887_v22 = vpop.f32.mrb[85].mxu1 }
 0x3c9   :  { %v2948_v3 = vmul.f32 %v2891_v23, %v2724_v28  ;;  %v2671_v27 = vadd.f32 %v2670_v26, %v4841_v35  ;;  %v2672_v53 = vpop.f32.mrb[85].mxu0 }
 0x3ca   :  { %v2194_v48 = vadd.f32 %v2193_v29, %v2163_v6  ;;  %v1940_v38 = vmax.f32 %v1886_v59, 0.0  ;;  %v4850_v6 = vld [vmem:[#allocation34_spill] sm:$0xff]  ;;  %v4851_v59 = vld [vmem:[#allocation76_spill] sm:$0xff] }
 0x3cb   :  { %v2979_v15 = vadd.f32 %v2978_v40, %v2948_v3  ;;  %v2725_v50 = vmax.f32 %v2671_v27, 0.0  ;;  %v1890_v49 = vpop.f32.mrb[86].mxu1  ;;  %v2911_v40 = vpop.permute.xlu1 %2910 }
 0x3cc   :  { %v2164_v46 = vmul.f32 %v4842_v9, %v1940_v38  ;;  %v1891_v20 = vadd.f32 %v1890_v49, %v4843_v41  ;;  %v2675_v10 = vpop.f32.mrb[86].mxu0  ;;  %v1892_v62 = vpop.f32.mrb[87].mxu1  ;;  %v4852_v49 = vld [vmem:[#allocation43_spill] sm:$0xff] }
 0x3cd   :  { %v2949_v43 = vmul.f32 %v2896_v31, %v2725_v50  ;;  %v2676_v54 = vadd.f32 %v2675_v10, %v4844_v51  ;;  %v2677_v63 = vpop.f32.mrb[87].mxu0 }
 0x3ce   :  { %v2195_v18 = vadd.f32 %v2194_v48, %v2164_v46  ;;  %v1941_v61 = vmax.f32 %v1891_v20, 0.0  ;;  %v4853_v46 = vld [vmem:[#allocation77_spill] sm:$0xff] }
 0x3cf   :  { %v2980_v30 = vadd.f32 %v2979_v15, %v2949_v43  ;;  %v2726_v8 = vmax.f32 %v2676_v54, 0.0  ;;  %v1895_v52 = vpop.f32.mrb[88].mxu1 }
 0x3d0   :  { %v2165_v21 = vmul.f32 %v4845_v17, %v1941_v61  ;;  %v1896_v32 = vadd.f32 %v1895_v52, %v4846_v60  ;;  %v2680_v56 = vpop.f32.mrb[88].mxu0  ;;  %v1897_v16 = vpop.f32.mrb[89].mxu1  ;;  %v2213_v17 = vlaneseq }
 0x3d1   :  { %v2950_v58 = vmul.f32 %v2901_v13, %v2726_v8  ;;  %v2681_v33 = vadd.f32 %v2680_v56, %v4847_v55  ;;  %v2682_v5 = vpop.f32.mrb[89].mxu0  ;;  %v2916_v13 = vpop.permute.xlu0 %2915 }
 0x3d2   :  { %v2196_v23 = vadd.f32 %v2195_v18, %v2165_v21  ;;  %v1942_v11 = vmax.f32 %v1896_v32, 0.0  ;;  %v2214_v16 = vshrl.u32 %v2213_v17, 7 }
 0x3d3   :  { %v2981_v39 = vadd.f32 %v2980_v30, %v2950_v58  ;;  %v2727_v42 = vmax.f32 %v2681_v33, 0.0  ;;  %v1900_v19 = vpop.f32.mrb[90].mxu1  ;;  %v4854_v30 = vld [vmem:[#allocation33_spill] sm:$0xff] }
 0x3d4   :  { %v2166_v37 = vmul.f32 %v4848_v12, %v1942_v11  ;;  %v1901_v44 = vadd.f32 %v1900_v19, %v4849_v36  ;;  %v2685_v25 = vpop.f32.mrb[90].mxu0  ;;  %v1902_v31 = vpop.f32.mrb[91].mxu1  ;;  %v2215_v5 = vsub.s32 0, %v2214_v16  ;;  %v4855_v12 = vld [vmem:[#allocation42_spill] sm:$0xff] }
 0x3d5   :  { %v2951_v1 = vmul.f32 %v2906_v24, %v2727_v42  ;;  %v2686_v0 = vadd.f32 %v2685_v25, %v2462_v7  ;;  %v2687_v34 = vpop.f32.mrb[91].mxu0 }
 0x3d6   :  { %v2197_v29 = vadd.f32 %v2196_v23, %v2166_v37  ;;  %v1943_v4 = vmax.f32 %v1901_v44, 0.0  ;;  %v2216_v37 = vrot.slane %v4855_v12, %v2215_v5 }
 0x3d7   :  { %v2982_v28 = vadd.f32 %v2981_v39, %v2951_v1  ;;  %v2728_v57 = vmax.f32 %v2686_v0, 0.0  ;;  %v1905_v14 = vpop.f32.mrb[92].mxu1  ;;  %v2996_v39 = vpop.permute.xlu0 %2995 }
 0x3d8   :  { %v2167_v45 = vmul.f32 %v4850_v6, %v1943_v4  ;;  %v1906_v26 = vadd.f32 %v1905_v14, %v4851_v59  ;;  %v2690_v22 = vpop.f32.mrb[92].mxu0  ;;  %v1907_v3 = vpop.f32.mrb[93].mxu1  ;;  %v3001_v44 = vrot.slane %v2996_v39, %v2215_v5 }
 0x3d9   :  { %v2952_v35 = vmul.f32 %v2911_v40, %v2728_v57  ;;  %v2691_v27 = vadd.f32 %v2690_v22, %v2467_v47  ;;  %v2692_v53 = vpop.f32.mrb[93].mxu0  ;;  %v2921_v47 = vpop.permute.xlu1 %2920 }
 0x3da   :  { %v2198_v48 = vadd.f32 %v2197_v29, %v2167_v45  ;;  %v1944_v38 = vmax.f32 %v1906_v26, 0.0 }
 0x3db   :  { %v2983_v7 = vadd.f32 %v2982_v28, %v2952_v35  ;;  %v2729_v15 = vmax.f32 %v2691_v27, 0.0  ;;  %v1910_v50 = vpop.f32.mrb[94].mxu1 }
 0x3dc   :  { %v2168_v9 = vmul.f32 %v4852_v49, %v1944_v38  ;;  %v1911_v41 = vadd.f32 %v1910_v50, %v4853_v46  ;;  %v2695_v20 = vpop.f32.mrb[94].mxu0  ;;  %v1912_v10 = vpop.f32.mrb[95].mxu1 }
 0x3dd   :  { %v2953_v62 = vmul.f32 %v2916_v13, %v2729_v15  ;;  %v2696_v43 = vadd.f32 %v2695_v20, %v2472_v2  ;;  %v2697_v51 = vpop.f32.mrb[95].mxu0 }
 0x3de   :  { %v2199_v54 = vadd.f32 %v2198_v48, %v2168_v9  ;;  %v1945_v63 = vmax.f32 %v1911_v41, 0.0 }
 0x3df   :  { %v2984_v18 = vadd.f32 %v2983_v7, %v2953_v62  ;;  %v2730_v61 = vmax.f32 %v2696_v43, 0.0 }
 0x3e0   :  { %v2169_v8 = vmul.f32 %v4854_v30, %v1945_v63 }
 0x3e1   :  { %v2954_v52 = vmul.f32 %v2921_v47, %v2730_v61 }
 0x3e2   :  { %v2200_v21 = vadd.f32 %v2199_v54, %v2169_v8 }
 0x3e3   :  { %v2985_v60 = vadd.f32 %v2984_v18, %v2954_v52 }
 0x3e4   :  { %v2201_v32 = vrot.slane %v2200_v21, 4 }
 0x3e5   :  { %v2986_v56 = vrot.slane %v2985_v60, 4 }
 0x3e6   :  { %v2202_v24 = vadd.f32 %v2201_v32, %v2200_v21 }
 0x3e7   :  { %v2987_v58 = vadd.f32 %v2986_v56, %v2985_v60 }
 0x3e8   :  { %v2203_v55 = vrot.slane %v2202_v24, 2 }
 0x3e9   :  { %v2988_v33 = vrot.slane %v2987_v58, 2 }
 0x3ea   :  { %v2204_v23 = vadd.f32 %v2203_v55, %v2202_v24 }
 0x3eb   :  { %v2989_v11 = vadd.f32 %v2988_v33, %v2987_v58 }
 0x3ec   :  { %v2205_v42 = vrot.slane %v2204_v23, 1 }
 0x3ed   :  { %v2990_v19 = vrot.slane %v2989_v11, 1 }
 0x3ee   :  { %v2206_v36 = vadd.f32 %v2205_v42, %v2204_v23 }
 0x3ef   :  { %v2991_v25 = vadd.f32 %v2990_v19, %v2989_v11 }
 0x3f0   :  { %v2217_v31 = vadd.f32 %v2216_v37, %v2206_v36 }
 0x3f1   :  { %v3002_v2 = vadd.f32 %v3001_v44, %v2991_v25 }
 0x3f3   :  { %v3003_v1 = vmin.f32 %v2217_v31, %v3002_v2 }
 0x3f5   :  { %3004 = vst [vmem:[#allocation21] sm:$0x1] %v3003_v1 }
 0x3f6   :  { %3764 = shalt.err (!%p3761_p0)
}
 0x3f7   :  { %s3765_s15 = scalar_lea.hbm %s4709_s12, 16 }
 0x3f8   :  { %p3766_p1 = scmp.ne.s32.totalorder %s4709_s12, %s3765_s15  ;;  %p3769_p2 = scmp.lt.u32.totalorder %s3765_s15, %s4709_s12 }
 0x3fa   :  { %p3771_p3 = pnand %p3769_p2, %p3766_p1 }
 0x3fc   :  { %3774 = shalt.err (!%p3771_p3)
}
 0x3fd   :  { %3014 = dma.vmem_to_hbm [thread:$0]  %s3012_s18, 16, %s4709_s12, [#allocation6]  }
 0x3fe   :  { %3787 = dma.done.wait [#allocation6], 16  }
 0x3ff   :  { %3788 = vsyncadd [#allocation6], 4294967280 }
 0x400   :  { %3018 = vsyncpa [#allocation5], 1 }
 0x401   :  { %3019 = vsyncpa [#allocation8], 1 }
 0x402   :  { %3020 = vsyncpa [#allocation11], 1 }
 0x403   :  { %3021 = vsyncpa [#allocation14], 1 }
 0x404   :  { %3022 = vsyncpa [#allocation17], 1 }
 0x405   :  { %3023 = vsyncpa [#allocation20], 1 }
 0x406   :  { %3024 = vsyncpa [#allocation6], 1 }

</bundles_post_ra>
